<compile_context>
chip_gen: v5e
topology: v5e:2x2
jax: 0.10.0
libtpu: 0.0.40
codegen_flags: <defaults>
</compile_context>

<pallas_src>
import numpy as np
import jax
import jax.numpy as jnp
from jax import lax
from jax.experimental import pallas as pl
from jax.experimental.pallas import tpu as pltpu


CPAD = 8      # per-tap channel padding (one full sublane group)
LANE = 128    # lane width


def _round_up(x, m):
    return (x + m - 1) // m * m


# ---------------------------------------------------------------------------
# Static geometry of the three conv/pool stages
# ---------------------------------------------------------------------------
def _stage_geometry(model_cfg, H, W):
    chans = (model_cfg["out_conv_1"], model_cfg["out_conv_2"],
             model_cfg["out_conv_3"])
    stages = []
    h, w = H, W
    for s in range(3):
        hw = h * w
        stages.append(dict(h=h, w=w, hw=hw, hwp=_round_up(hw, LANE),
                           h2=h // 2, w2=w // 2, q=(h // 2) * (w // 2),
                           cout=chans[s]))
        h, w = h // 2, w // 2
    for s in range(3):
        # lane width of the pooled output: the next stage's padded input width,
        # or the raw pooled size for the last stage (it feeds the FC stack).
        stages[s]["qp"] = stages[s + 1]["hwp"] if s < 2 else stages[s]["q"]
    return stages


# ---------------------------------------------------------------------------
# Host-side constants: im2col boundary masks + 2x2-pool decimation matrices
# ---------------------------------------------------------------------------
def _build_masks_sels(stages):
    ncols = sum(st["hwp"] for st in stages)
    selc = max(st["qp"] for st in stages)
    masks = np.zeros((9, ncols), np.float32)
    sels = np.zeros((ncols, selc), np.float32)
    off = 0
    for st in stages:
        h, w, hw = st["h"], st["w"], st["hw"]
        w2, q = st["w2"], st["q"]
        j = np.arange(hw)
        y, x = j // w, j % w
        for ky in range(3):
            for kx in range(3):
                oy, ox = ky - 1, kx - 1
                ok = (y + oy >= 0) & (y + oy < h) & (x + ox >= 0) & (x + ox < w)
                masks[ky * 3 + kx, off:off + hw] = ok
        m = np.arange(q)
        src = 2 * (m // w2) * w + 2 * (m % w2)     # t2 column holding each 2x2 max
        sels[off + src, m] = 1.0
        off += st["hwp"]
    return jnp.asarray(masks), jnp.asarray(sels)


# ---------------------------------------------------------------------------
# Fused whole-network kernel
# ---------------------------------------------------------------------------
def _make_kernel(stages, fc_dims):
    f1, f2, f3, ncls = fc_dims
    flat_hw = stages[-1]["q"]

    mask_offs = []
    off = 0
    for st in stages:
        mask_offs.append(off)
        off += st["hwp"]

    def kernel(x_ref, convw_ref, convb_ref, masks_ref, sels_ref,
               fc1w_ref, fc2w_ref, fc3w_ref, fc4w_ref, fcb_ref,
               out_ref,
               p1_ref, p2_ref, p3_ref, flat_ref):
        patch_refs = (p1_ref, p2_ref, p3_ref)

        a = x_ref[0]                                   # (CPAD, hwp_1), f32
        for s, st in enumerate(stages):
            w, hwp, qp = st["w"], st["hwp"], st["qp"]
            moff = mask_offs[s]
            p_ref = patch_refs[s]

            # ---- im2col: 9 full-width XLU rolls + precomputed boundary masks;
            #      each tap stored full-width at an 8-sublane-aligned offset.
            for ky in range(3):
                for kx in range(3):
                    tap = ky * 3 + kx
                    d = (ky - 1) * w + (kx - 1)        # flat source shift of tap
                    rolled = a if d == 0 else pltpu.roll(a, (-d) % hwp, axis=1)
                    m = masks_ref[tap:tap + 1, moff:moff + hwp]     # (1, hwp)
                    p_ref[tap * CPAD:(tap + 1) * CPAD, :] = rolled * m

            # ---- conv as one MXU GEMM, fused bias + ReLU
            conv = jnp.dot(convw_ref[s], p_ref[...],
                           preferred_element_type=jnp.float32)      # (CPAD, hwp)
            conv = jnp.maximum(conv + convb_ref[s], 0.0)

            # ---- MaxPool2d(2,2): two roll+max passes, then one decimation GEMM
            #      against the precomputed 0/1 selection matrix (wrapped / padded
            #      columns are never selected).
            t1 = jnp.maximum(conv, pltpu.roll(conv, hwp - 1, axis=1))
            t2 = jnp.maximum(t1, pltpu.roll(t1, hwp - w, axis=1))
            sel = sels_ref[moff:moff + hwp, 0:qp]
            a = jnp.dot(t2, sel, preferred_element_type=jnp.float32)  # (CPAD, qp)

        # ---- flatten (channel-major, matching torch.flatten) into a lane vector
        for c in range(CPAD):
            flat_ref[0:1, c * flat_hw:(c + 1) * flat_hw] = a[c:c + 1, :]
        flat = flat_ref[...]                           # (1, CPAD * flat_hw)

        # ---- FC stack on VMEM-resident weights.
        # TODO(synk): dropout is an eval-mode no-op; training mode would draw
        # masks from pltpu.prng_random_bits between the FC layers.
        o1, o2, o3, o4 = f1, f1 + f2, f1 + f2 + f3, f1 + f2 + f3 + ncls
        h1 = jnp.maximum(jnp.dot(flat, fc1w_ref[...],
                                 preferred_element_type=jnp.float32)
                         + fcb_ref[:, 0:o1], 0.0)
        h2 = jnp.maximum(jnp.dot(h1, fc2w_ref[...],
                                 preferred_element_type=jnp.float32)
                         + fcb_ref[:, o1:o2], 0.0)
        h3 = jnp.maximum(jnp.dot(h2, fc3w_ref[...],
                                 preferred_element_type=jnp.float32)
                         + fcb_ref[:, o2:o3], 0.0)
        logits = (jnp.dot(h3, fc4w_ref[...], preferred_element_type=jnp.float32)
                  + fcb_ref[:, o3:o4])
        out_ref[0] = logits.astype(out_ref.dtype)

    return kernel


# ---------------------------------------------------------------------------
# Wrapper: single fused pallas_call for the given config / input shape
# ---------------------------------------------------------------------------
def make_cnn_forward(model_cfg, in_shape):
    N, C_in, H, W = in_shape
    # Implemented configuration: 3x3 convs, stride 1, padding 1; 2x2/s2 pooling.
    assert C_in == 1
    assert model_cfg["kernel_conv_1"] == model_cfg["kernel_conv_2"] == \
        model_cfg["kernel_conv_3"] == 3
    assert model_cfg["stride_conv_1"] == model_cfg["stride_conv_2"] == \
        model_cfg["stride_conv_3"] == 1
    assert model_cfg["padding_conv_1"] == model_cfg["padding_conv_2"] == \
        model_cfg["padding_conv_3"] == 1
    assert model_cfg["kernel_pool"] == 2 and model_cfg["stride_pool"] == 2 \
        and model_cfg["padding_pool"] == 0
    assert H % 8 == 0 and W % 8 == 0
    assert max(model_cfg["out_conv_1"], model_cfg["out_conv_2"],
               model_cfg["out_conv_3"]) <= CPAD

    stages = _stage_geometry(model_cfg, H, W)
    f1, f2, f3, ncls = (model_cfg["out_fc1"], model_cfg["out_fc2"],
                        model_cfg["out_fc3"], model_cfg["num_classes"])
    flat_hw = stages[-1]["q"]
    hwp1 = stages[0]["hwp"]
    mask_cols = sum(st["hwp"] for st in stages)
    sel_cols = max(st["qp"] for st in stages)

    kernel = _make_kernel(stages, (f1, f2, f3, ncls))

    const_shapes = [
        (3, CPAD, 9 * CPAD),          # packed, padded conv weights
        (3, CPAD, 1),                 # packed, padded conv biases
        (9, mask_cols),               # packed im2col boundary masks
        (mask_cols, sel_cols),        # packed pool decimation matrices
        (CPAD * flat_hw, f1),         # fc1 weight (channel-major flat layout)
        (f1, f2), (f2, f3), (f3, ncls),
        (1, f1 + f2 + f3 + ncls),     # packed fc biases
    ]

    def _const_spec(shape):
        rank = len(shape)
        return pl.BlockSpec(shape, lambda n, _r=rank: (0,) * _r)

    in_specs = [pl.BlockSpec((1, CPAD, hwp1), lambda n: (n, 0, 0))]
    in_specs += [_const_spec(s) for s in const_shapes]

    call = pl.pallas_call(
        kernel,
        out_shape=jax.ShapeDtypeStruct((N, 1, ncls), jnp.float32),
        grid_spec=pltpu.PrefetchScalarGridSpec(
            num_scalar_prefetch=0,
            grid=(N,),
            in_specs=in_specs,
            out_specs=pl.BlockSpec((1, 1, ncls), lambda n: (n, 0, 0)),
            scratch_shapes=[pltpu.VMEM((9 * CPAD, st["hwp"]), jnp.float32)
                            for st in stages]
                         + [pltpu.VMEM((1, CPAD * flat_hw), jnp.float32)],
        ),
        compiler_params=pltpu.CompilerParams(
            dimension_semantics=("parallel",)),   # v7x: one sample per TensorCore
    )

    def forward(kparams, x):
        xf = x.reshape(N, C_in, H * W)
        xf = jnp.pad(xf, ((0, 0), (0, CPAD - C_in), (0, hwp1 - H * W)))
        out = call(xf, *kparams)
        return out.reshape(N, ncls)

    return forward


def prepare_kernel_params(params, model_cfg, in_hw):
    """One-time (host-side) transform of PyTorch-layout params to kernel layout."""
    H, W = in_hw
    stages = _stage_geometry(model_cfg, H, W)
    flat_hw = stages[-1]["q"]
    c3 = model_cfg["out_conv_3"]
    f1 = model_cfg["out_fc1"]

    def conv_w_pad(w):   # (OC, C, 3, 3) -> (CPAD, 9*CPAD), tap-major, zero-padded
        w = np.asarray(w, np.float32)
        oc, c, kh, kw = w.shape
        out = np.zeros((CPAD, kh * kw, CPAD), np.float32)   # (o, tap, cin)
        out[:oc, :, :c] = np.transpose(w, (0, 2, 3, 1)).reshape(oc, kh * kw, c)
        return out.reshape(CPAD, kh * kw * CPAD)

    def conv_b_pad(b):
        out = np.zeros((CPAD, 1), np.float32)
        out[:b.shape[0], 0] = np.asarray(b, np.float32)
        return out

    convw = jnp.asarray(np.stack([conv_w_pad(params["w1"]),
                                  conv_w_pad(params["w2"]),
                                  conv_w_pad(params["w3"])]))
    convb = jnp.asarray(np.stack([conv_b_pad(params["b1"]),
                                  conv_b_pad(params["b2"]),
                                  conv_b_pad(params["b3"])]))
    masks, sels = _build_masks_sels(stages)

    fc1w = np.zeros((CPAD * flat_hw, f1), np.float32)
    fc1w[:c3 * flat_hw, :] = np.asarray(params["fc1_w"], np.float32)
    fcb = np.concatenate([np.asarray(params[f"{n}_b"], np.float32).reshape(-1)
                          for n in ("fc1", "fc2", "fc3", "fc4")]).reshape(1, -1)

    return (convw, convb, masks, sels,
            jnp.asarray(fc1w),
            jnp.asarray(params["fc2_w"], jnp.float32),
            jnp.asarray(params["fc3_w"], jnp.float32),
            jnp.asarray(params["fc4_w"], jnp.float32),
            jnp.asarray(fcb))


# ---------------------------------------------------------------------------
# Pure-JAX reference (same math) used for a runtime self-check
# ---------------------------------------------------------------------------
def reference_forward(params, x):
    def conv_relu(x, w, b):
        y = lax.conv_general_dilated(
            x, w, window_strides=(1, 1), padding=((1, 1), (1, 1)),
            dimension_numbers=("NCHW", "OIHW", "NCHW"))
        return jax.nn.relu(y + b[None, :, None, None])

    def pool(x):
        return lax.reduce_window(x, -jnp.inf, lax.max,
                                 window_dimensions=(1, 1, 2, 2),
                                 window_strides=(1, 1, 2, 2), padding="VALID")

    x = pool(conv_relu(x, params["w1"], params["b1"]))
    x = pool(conv_relu(x, params["w2"], params["b2"]))
    x = pool(conv_relu(x, params["w3"], params["b3"]))
    x = x.reshape(x.shape[0], -1)
    x = jax.nn.relu(x @ params["fc1_w"] + params["fc1_b"])
    x = jax.nn.relu(x @ params["fc2_w"] + params["fc2_b"])
    x = jax.nn.relu(x @ params["fc3_w"] + params["fc3_b"])
    return x @ params["fc4_w"] + params["fc4_b"]


# ---------------------------------------------------------------------------
# Deterministic PyTorch-style init (conv: (OC, C, K, K); linear: (in, out))
# ---------------------------------------------------------------------------
def init_params(key, model_cfg, in_hw):
    keys = jax.random.split(key, 16)
    H, W = in_hw

    def uinit(k, shape, fan_in):
        bound = 1.0 / jnp.sqrt(jnp.float32(fan_in))
        return jax.random.uniform(k, shape, jnp.float32, -bound, bound)

    def out_dim(h, w, p, k, s):
        return (h + 2 * p - k) // s + 1, (w + 2 * p - k) // s + 1

    c1, c2, c3 = (model_cfg["out_conv_1"], model_cfg["out_conv_2"],
                  model_cfg["out_conv_3"])
    k = model_cfg["kernel_conv_1"]

    params = {
        "w1": uinit(keys[0], (c1, 1, k, k), 1 * k * k),
        "b1": uinit(keys[1], (c1,), 1 * k * k),
        "w2": uinit(keys[2], (c2, c1, k, k), c1 * k * k),
        "b2": uinit(keys[3], (c2,), c1 * k * k),
        "w3": uinit(keys[4], (c3, c2, k, k), c2 * k * k),
        "b3": uinit(keys[5], (c3,), c2 * k * k),
    }

    h, w = out_dim(H, W, model_cfg["padding_conv_1"], k, model_cfg["stride_conv_1"])
    h, w = out_dim(h, w, 0, 2, 2)
    h, w = out_dim(h, w, model_cfg["padding_conv_2"], k, model_cfg["stride_conv_2"])
    h, w = out_dim(h, w, 0, 2, 2)
    h, w = out_dim(h, w, model_cfg["padding_conv_3"], k, model_cfg["stride_conv_3"])
    h, w = out_dim(h, w, 0, 2, 2)
    flat = c3 * h * w

    dims = [flat, model_cfg["out_fc1"], model_cfg["out_fc2"],
            model_cfg["out_fc3"], model_cfg["num_classes"]]
    for i, name in enumerate(["fc1", "fc2", "fc3", "fc4"]):
        fan_in, fan_out = dims[i], dims[i + 1]
        params[f"{name}_w"] = uinit(keys[6 + 2 * i], (fan_in, fan_out), fan_in)
        params[f"{name}_b"] = uinit(keys[7 + 2 * i], (fan_out,), fan_in)
    return params


if __name__ == "__main__":
    model_cfg = dict(
        out_conv_1=4, kernel_conv_1=3, stride_conv_1=1, padding_conv_1=1,
        kernel_pool=2, stride_pool=2, padding_pool=0,
        out_conv_2=8, kernel_conv_2=3, stride_conv_2=1, padding_conv_2=1,
        out_conv_3=8, kernel_conv_3=3, stride_conv_3=1, padding_conv_3=1,
        out_fc1=32, out_fc2=16, out_fc3=16, num_classes=10,
        dropout_probab=0.5,
    )

    key = jax.random.PRNGKey(0)
    k_in, k_par = jax.random.split(key)
    x = jax.random.normal(k_in, (2, 1, 32, 32), dtype=jnp.float32)   # NCHW
    params = init_params(k_par, model_cfg, in_hw=(32, 32))

    kparams = prepare_kernel_params(params, model_cfg, in_hw=(32, 32))
    forward = jax.jit(make_cnn_forward(model_cfg, x.shape))

    out = jax.block_until_ready(forward(kparams, x))
    assert out.shape == (2, model_cfg["num_classes"])

    # Numerical self-check against a pure-JAX/XLA reference of the same module.
    ref = jax.block_until_ready(jax.jit(reference_forward)(params, x))
    np.testing.assert_allclose(np.asarray(out), np.asarray(ref),
                               rtol=1e-3, atol=1e-3)

    print("KERNEL_OK")
</pallas_src>

<mosaic_0001>
module attributes {stable_mosaic.version = 11 : i64} {
  func.func @kernel(%arg0: i32, %arg1: memref<1x8x1024xf32, #tpu.memory_space<vmem>>, %arg2: memref<3x8x72xf32, #tpu.memory_space<vmem>>, %arg3: memref<3x8x1xf32, #tpu.memory_space<vmem>>, %arg4: memref<9x1408xf32, #tpu.memory_space<vmem>>, %arg5: memref<1408x256xf32, #tpu.memory_space<vmem>>, %arg6: memref<128x32xf32, #tpu.memory_space<vmem>>, %arg7: memref<32x16xf32, #tpu.memory_space<vmem>>, %arg8: memref<16x16xf32, #tpu.memory_space<vmem>>, %arg9: memref<16x10xf32, #tpu.memory_space<vmem>>, %arg10: memref<1x74xf32, #tpu.memory_space<vmem>>, %arg11: memref<1x1x10xf32, #tpu.memory_space<vmem>>, %arg12: memref<72x1024xf32, #tpu.memory_space<vmem>>, %arg13: memref<72x256xf32, #tpu.memory_space<vmem>>, %arg14: memref<72x128xf32, #tpu.memory_space<vmem>>, %arg15: memref<1x128xf32, #tpu.memory_space<vmem>>) attributes {dimension_semantics = [#tpu.dimension_semantics<parallel>], iteration_bounds = array<i64: 2>, scalar_prefetch = 0 : i64, scratch_operands = 4 : i64, tpu.core_type = #tpu.core_type<tc>, window_params = [{transform_indices = @transform_0, window_bounds = array<i64: 1, 8, 1024>}, {pipeline_mode = #tpu.pipeline_mode<synchronous>, transform_indices = @transform_1, window_bounds = array<i64: 3, 8, 72>}, {pipeline_mode = #tpu.pipeline_mode<synchronous>, transform_indices = @transform_2, window_bounds = array<i64: 3, 8, 1>}, {pipeline_mode = #tpu.pipeline_mode<synchronous>, transform_indices = @transform_3, window_bounds = array<i64: 9, 1408>}, {pipeline_mode = #tpu.pipeline_mode<synchronous>, transform_indices = @transform_4, window_bounds = array<i64: 1408, 256>}, {pipeline_mode = #tpu.pipeline_mode<synchronous>, transform_indices = @transform_5, window_bounds = array<i64: 128, 32>}, {pipeline_mode = #tpu.pipeline_mode<synchronous>, transform_indices = @transform_6, window_bounds = array<i64: 32, 16>}, {pipeline_mode = #tpu.pipeline_mode<synchronous>, transform_indices = @transform_7, window_bounds = array<i64: 16, 16>}, {pipeline_mode = #tpu.pipeline_mode<synchronous>, transform_indices = @transform_8, window_bounds = array<i64: 16, 10>}, {pipeline_mode = #tpu.pipeline_mode<synchronous>, transform_indices = @transform_9, window_bounds = array<i64: 1, 74>}, {transform_indices = @transform_10, window_bounds = array<i64: 1, 1, 10>}]} {
    %c0 = arith.constant 0 : index
    %c0_0 = arith.constant 0 : index
    %c0_1 = arith.constant 0 : index
    %0 = vector.load %arg1[%c0, %c0_0, %c0_1] : memref<1x8x1024xf32, #tpu.memory_space<vmem>>, vector<1x8x1024xf32>
    %1 = vector.shape_cast %0 : vector<1x8x1024xf32> to vector<8x1024xf32>
    %c33_i32 = arith.constant 33 : i32
    %2 = tpu.dynamic_rotate %1 by %c33_i32 dim 1 : vector<8x1024xf32>, i32 -> vector<8x1024xf32>
    %c0_2 = arith.constant 0 : index
    %c0_3 = arith.constant 0 : index
    %3 = vector.load %arg4[%c0_2, %c0_3] : memref<9x1408xf32, #tpu.memory_space<vmem>>, vector<1x1024xf32>
    %4 = vector.broadcast %3 : vector<1x1024xf32> to vector<8x1024xf32>
    %5 = arith.mulf %2, %4 : vector<8x1024xf32>
    %c0_4 = arith.constant 0 : index
    %c0_5 = arith.constant 0 : index
    %6 = vector.load %arg12[%c0_4, %c0_5] : memref<72x1024xf32, #tpu.memory_space<vmem>>, vector<8x1024xf32>
    tpu.vector_store %arg12[%c0_4, %c0_5], %5 {strides = array<i32>} : memref<72x1024xf32, #tpu.memory_space<vmem>>, vector<8x1024xf32>,
    %c32_i32 = arith.constant 32 : i32
    %7 = tpu.dynamic_rotate %1 by %c32_i32 dim 1 : vector<8x1024xf32>, i32 -> vector<8x1024xf32>
    %c1 = arith.constant 1 : index
    %c0_6 = arith.constant 0 : index
    %8 = vector.load %arg4[%c1, %c0_6] : memref<9x1408xf32, #tpu.memory_space<vmem>>, vector<1x1024xf32>
    %9 = vector.broadcast %8 : vector<1x1024xf32> to vector<8x1024xf32>
    %10 = arith.mulf %7, %9 : vector<8x1024xf32>
    %c8 = arith.constant 8 : index
    %c0_7 = arith.constant 0 : index
    %11 = vector.load %arg12[%c8, %c0_7] : memref<72x1024xf32, #tpu.memory_space<vmem>>, vector<8x1024xf32>
    tpu.vector_store %arg12[%c8, %c0_7], %10 {strides = array<i32>} : memref<72x1024xf32, #tpu.memory_space<vmem>>, vector<8x1024xf32>,
    %c31_i32 = arith.constant 31 : i32
    %12 = tpu.dynamic_rotate %1 by %c31_i32 dim 1 : vector<8x1024xf32>, i32 -> vector<8x1024xf32>
    %c2 = arith.constant 2 : index
    %c0_8 = arith.constant 0 : index
    %13 = vector.load %arg4[%c2, %c0_8] : memref<9x1408xf32, #tpu.memory_space<vmem>>, vector<1x1024xf32>
    %14 = vector.broadcast %13 : vector<1x1024xf32> to vector<8x1024xf32>
    %15 = arith.mulf %12, %14 : vector<8x1024xf32>
    %c16 = arith.constant 16 : index
    %c0_9 = arith.constant 0 : index
    %16 = vector.load %arg12[%c16, %c0_9] : memref<72x1024xf32, #tpu.memory_space<vmem>>, vector<8x1024xf32>
    tpu.vector_store %arg12[%c16, %c0_9], %15 {strides = array<i32>} : memref<72x1024xf32, #tpu.memory_space<vmem>>, vector<8x1024xf32>,
    %c1_i32 = arith.constant 1 : i32
    %17 = tpu.dynamic_rotate %1 by %c1_i32 dim 1 : vector<8x1024xf32>, i32 -> vector<8x1024xf32>
    %c3 = arith.constant 3 : index
    %c0_10 = arith.constant 0 : index
    %18 = vector.load %arg4[%c3, %c0_10] : memref<9x1408xf32, #tpu.memory_space<vmem>>, vector<1x1024xf32>
    %19 = vector.broadcast %18 : vector<1x1024xf32> to vector<8x1024xf32>
    %20 = arith.mulf %17, %19 : vector<8x1024xf32>
    %c24 = arith.constant 24 : index
    %c0_11 = arith.constant 0 : index
    %21 = vector.load %arg12[%c24, %c0_11] : memref<72x1024xf32, #tpu.memory_space<vmem>>, vector<8x1024xf32>
    tpu.vector_store %arg12[%c24, %c0_11], %20 {strides = array<i32>} : memref<72x1024xf32, #tpu.memory_space<vmem>>, vector<8x1024xf32>,
    %c4 = arith.constant 4 : index
    %c0_12 = arith.constant 0 : index
    %22 = vector.load %arg4[%c4, %c0_12] : memref<9x1408xf32, #tpu.memory_space<vmem>>, vector<1x1024xf32>
    %23 = vector.broadcast %22 : vector<1x1024xf32> to vector<8x1024xf32>
    %24 = arith.mulf %1, %23 : vector<8x1024xf32>
    %c32 = arith.constant 32 : index
    %c0_13 = arith.constant 0 : index
    %25 = vector.load %arg12[%c32, %c0_13] : memref<72x1024xf32, #tpu.memory_space<vmem>>, vector<8x1024xf32>
    tpu.vector_store %arg12[%c32, %c0_13], %24 {strides = array<i32>} : memref<72x1024xf32, #tpu.memory_space<vmem>>, vector<8x1024xf32>,
    %c1023_i32 = arith.constant 1023 : i32
    %26 = tpu.dynamic_rotate %1 by %c1023_i32 dim 1 : vector<8x1024xf32>, i32 -> vector<8x1024xf32>
    %c5 = arith.constant 5 : index
    %c0_14 = arith.constant 0 : index
    %27 = vector.load %arg4[%c5, %c0_14] : memref<9x1408xf32, #tpu.memory_space<vmem>>, vector<1x1024xf32>
    %28 = vector.broadcast %27 : vector<1x1024xf32> to vector<8x1024xf32>
    %29 = arith.mulf %26, %28 : vector<8x1024xf32>
    %c40 = arith.constant 40 : index
    %c0_15 = arith.constant 0 : index
    %30 = vector.load %arg12[%c40, %c0_15] : memref<72x1024xf32, #tpu.memory_space<vmem>>, vector<8x1024xf32>
    tpu.vector_store %arg12[%c40, %c0_15], %29 {strides = array<i32>} : memref<72x1024xf32, #tpu.memory_space<vmem>>, vector<8x1024xf32>,
    %c993_i32 = arith.constant 993 : i32
    %31 = tpu.dynamic_rotate %1 by %c993_i32 dim 1 : vector<8x1024xf32>, i32 -> vector<8x1024xf32>
    %c6 = arith.constant 6 : index
    %c0_16 = arith.constant 0 : index
    %32 = vector.load %arg4[%c6, %c0_16] : memref<9x1408xf32, #tpu.memory_space<vmem>>, vector<1x1024xf32>
    %33 = vector.broadcast %32 : vector<1x1024xf32> to vector<8x1024xf32>
    %34 = arith.mulf %31, %33 : vector<8x1024xf32>
    %c48 = arith.constant 48 : index
    %c0_17 = arith.constant 0 : index
    %35 = vector.load %arg12[%c48, %c0_17] : memref<72x1024xf32, #tpu.memory_space<vmem>>, vector<8x1024xf32>
    tpu.vector_store %arg12[%c48, %c0_17], %34 {strides = array<i32>} : memref<72x1024xf32, #tpu.memory_space<vmem>>, vector<8x1024xf32>,
    %c992_i32 = arith.constant 992 : i32
    %36 = tpu.dynamic_rotate %1 by %c992_i32 dim 1 : vector<8x1024xf32>, i32 -> vector<8x1024xf32>
    %c7 = arith.constant 7 : index
    %c0_18 = arith.constant 0 : index
    %37 = vector.load %arg4[%c7, %c0_18] : memref<9x1408xf32, #tpu.memory_space<vmem>>, vector<1x1024xf32>
    %38 = vector.broadcast %37 : vector<1x1024xf32> to vector<8x1024xf32>
    %39 = arith.mulf %36, %38 : vector<8x1024xf32>
    %c56 = arith.constant 56 : index
    %c0_19 = arith.constant 0 : index
    %40 = vector.load %arg12[%c56, %c0_19] : memref<72x1024xf32, #tpu.memory_space<vmem>>, vector<8x1024xf32>
    tpu.vector_store %arg12[%c56, %c0_19], %39 {strides = array<i32>} : memref<72x1024xf32, #tpu.memory_space<vmem>>, vector<8x1024xf32>,
    %c991_i32 = arith.constant 991 : i32
    %41 = tpu.dynamic_rotate %1 by %c991_i32 dim 1 : vector<8x1024xf32>, i32 -> vector<8x1024xf32>
    %c8_20 = arith.constant 8 : index
    %c0_21 = arith.constant 0 : index
    %42 = vector.load %arg4[%c8_20, %c0_21] : memref<9x1408xf32, #tpu.memory_space<vmem>>, vector<1x1024xf32>
    %43 = vector.broadcast %42 : vector<1x1024xf32> to vector<8x1024xf32>
    %44 = arith.mulf %41, %43 : vector<8x1024xf32>
    %c64 = arith.constant 64 : index
    %c0_22 = arith.constant 0 : index
    %45 = vector.load %arg12[%c64, %c0_22] : memref<72x1024xf32, #tpu.memory_space<vmem>>, vector<8x1024xf32>
    tpu.vector_store %arg12[%c64, %c0_22], %44 {strides = array<i32>} : memref<72x1024xf32, #tpu.memory_space<vmem>>, vector<8x1024xf32>,
    %c0_23 = arith.constant 0 : index
    %c0_24 = arith.constant 0 : index
    %c0_25 = arith.constant 0 : index
    %46 = vector.load %arg2[%c0_23, %c0_24, %c0_25] : memref<3x8x72xf32, #tpu.memory_space<vmem>>, vector<1x8x72xf32>
    %47 = vector.shape_cast %46 : vector<1x8x72xf32> to vector<8x72xf32>
    %c0_26 = arith.constant 0 : index
    %c0_27 = arith.constant 0 : index
    %48 = vector.load %arg12[%c0_26, %c0_27] : memref<72x1024xf32, #tpu.memory_space<vmem>>, vector<72x1024xf32>
    %cst = arith.constant dense<0.000000e+00> : vector<8x1024xf32>
    %49 = tpu.matmul %47, %48, %cst {dimension_numbers = #tpu.dot_dimension_numbers<[1], [0], [0], [1], [0, 0, 1, 1], [], []>} : vector<8x72xf32>, vector<72x1024xf32>, vector<8x1024xf32> -> vector<8x1024xf32>
    %c0_28 = arith.constant 0 : index
    %c0_29 = arith.constant 0 : index
    %c0_30 = arith.constant 0 : index
    %50 = vector.load %arg3[%c0_28, %c0_29, %c0_30] : memref<3x8x1xf32, #tpu.memory_space<vmem>>, vector<1x8x1xf32>
    %51 = vector.shape_cast %50 : vector<1x8x1xf32> to vector<8x1xf32>
    %52 = vector.broadcast %51 : vector<8x1xf32> to vector<8x1024xf32>
    %53 = arith.addf %49, %52 : vector<8x1024xf32>
    %cst_31 = arith.constant 0.000000e+00 : f32
    %54 = vector.broadcast %cst_31 : f32 to vector<8x1024xf32>
    %55 = arith.maximumf %53, %54 : vector<8x1024xf32>
    %c1023_i32_32 = arith.constant 1023 : i32
    %56 = tpu.dynamic_rotate %55 by %c1023_i32_32 dim 1 : vector<8x1024xf32>, i32 -> vector<8x1024xf32>
    %57 = arith.maximumf %55, %56 : vector<8x1024xf32>
    %c992_i32_33 = arith.constant 992 : i32
    %58 = tpu.dynamic_rotate %57 by %c992_i32_33 dim 1 : vector<8x1024xf32>, i32 -> vector<8x1024xf32>
    %59 = arith.maximumf %57, %58 : vector<8x1024xf32>
    %c0_34 = arith.constant 0 : index
    %c0_35 = arith.constant 0 : index
    %60 = vector.load %arg5[%c0_34, %c0_35] : memref<1408x256xf32, #tpu.memory_space<vmem>>, vector<1024x256xf32>
    %cst_36 = arith.constant dense<0.000000e+00> : vector<8x256xf32>
    %61 = tpu.matmul %59, %60, %cst_36 {dimension_numbers = #tpu.dot_dimension_numbers<[1], [0], [0], [1], [0, 0, 1, 1], [], []>} : vector<8x1024xf32>, vector<1024x256xf32>, vector<8x256xf32> -> vector<8x256xf32>
    %c17_i32 = arith.constant 17 : i32
    %62 = tpu.dynamic_rotate %61 by %c17_i32 dim 1 : vector<8x256xf32>, i32 -> vector<8x256xf32>
    %c0_37 = arith.constant 0 : index
    %c1024 = arith.constant 1024 : index
    %63 = vector.load %arg4[%c0_37, %c1024] : memref<9x1408xf32, #tpu.memory_space<vmem>>, vector<1x256xf32>
    %64 = vector.broadcast %63 : vector<1x256xf32> to vector<8x256xf32>
    %65 = arith.mulf %62, %64 : vector<8x256xf32>
    %c0_38 = arith.constant 0 : index
    %c0_39 = arith.constant 0 : index
    %66 = vector.load %arg13[%c0_38, %c0_39] : memref<72x256xf32, #tpu.memory_space<vmem>>, vector<8x256xf32>
    tpu.vector_store %arg13[%c0_38, %c0_39], %65 {strides = array<i32>} : memref<72x256xf32, #tpu.memory_space<vmem>>, vector<8x256xf32>,
    %c16_i32 = arith.constant 16 : i32
    %67 = tpu.dynamic_rotate %61 by %c16_i32 dim 1 : vector<8x256xf32>, i32 -> vector<8x256xf32>
    %c1_40 = arith.constant 1 : index
    %c1024_41 = arith.constant 1024 : index
    %68 = vector.load %arg4[%c1_40, %c1024_41] : memref<9x1408xf32, #tpu.memory_space<vmem>>, vector<1x256xf32>
    %69 = vector.broadcast %68 : vector<1x256xf32> to vector<8x256xf32>
    %70 = arith.mulf %67, %69 : vector<8x256xf32>
    %c8_42 = arith.constant 8 : index
    %c0_43 = arith.constant 0 : index
    %71 = vector.load %arg13[%c8_42, %c0_43] : memref<72x256xf32, #tpu.memory_space<vmem>>, vector<8x256xf32>
    tpu.vector_store %arg13[%c8_42, %c0_43], %70 {strides = array<i32>} : memref<72x256xf32, #tpu.memory_space<vmem>>, vector<8x256xf32>,
    %c15_i32 = arith.constant 15 : i32
    %72 = tpu.dynamic_rotate %61 by %c15_i32 dim 1 : vector<8x256xf32>, i32 -> vector<8x256xf32>
    %c2_44 = arith.constant 2 : index
    %c1024_45 = arith.constant 1024 : index
    %73 = vector.load %arg4[%c2_44, %c1024_45] : memref<9x1408xf32, #tpu.memory_space<vmem>>, vector<1x256xf32>
    %74 = vector.broadcast %73 : vector<1x256xf32> to vector<8x256xf32>
    %75 = arith.mulf %72, %74 : vector<8x256xf32>
    %c16_46 = arith.constant 16 : index
    %c0_47 = arith.constant 0 : index
    %76 = vector.load %arg13[%c16_46, %c0_47] : memref<72x256xf32, #tpu.memory_space<vmem>>, vector<8x256xf32>
    tpu.vector_store %arg13[%c16_46, %c0_47], %75 {strides = array<i32>} : memref<72x256xf32, #tpu.memory_space<vmem>>, vector<8x256xf32>,
    %c1_i32_48 = arith.constant 1 : i32
    %77 = tpu.dynamic_rotate %61 by %c1_i32_48 dim 1 : vector<8x256xf32>, i32 -> vector<8x256xf32>
    %c3_49 = arith.constant 3 : index
    %c1024_50 = arith.constant 1024 : index
    %78 = vector.load %arg4[%c3_49, %c1024_50] : memref<9x1408xf32, #tpu.memory_space<vmem>>, vector<1x256xf32>
    %79 = vector.broadcast %78 : vector<1x256xf32> to vector<8x256xf32>
    %80 = arith.mulf %77, %79 : vector<8x256xf32>
    %c24_51 = arith.constant 24 : index
    %c0_52 = arith.constant 0 : index
    %81 = vector.load %arg13[%c24_51, %c0_52] : memref<72x256xf32, #tpu.memory_space<vmem>>, vector<8x256xf32>
    tpu.vector_store %arg13[%c24_51, %c0_52], %80 {strides = array<i32>} : memref<72x256xf32, #tpu.memory_space<vmem>>, vector<8x256xf32>,
    %c4_53 = arith.constant 4 : index
    %c1024_54 = arith.constant 1024 : index
    %82 = vector.load %arg4[%c4_53, %c1024_54] : memref<9x1408xf32, #tpu.memory_space<vmem>>, vector<1x256xf32>
    %83 = vector.broadcast %82 : vector<1x256xf32> to vector<8x256xf32>
    %84 = arith.mulf %61, %83 : vector<8x256xf32>
    %c32_55 = arith.constant 32 : index
    %c0_56 = arith.constant 0 : index
    %85 = vector.load %arg13[%c32_55, %c0_56] : memref<72x256xf32, #tpu.memory_space<vmem>>, vector<8x256xf32>
    tpu.vector_store %arg13[%c32_55, %c0_56], %84 {strides = array<i32>} : memref<72x256xf32, #tpu.memory_space<vmem>>, vector<8x256xf32>,
    %c255_i32 = arith.constant 255 : i32
    %86 = tpu.dynamic_rotate %61 by %c255_i32 dim 1 : vector<8x256xf32>, i32 -> vector<8x256xf32>
    %c5_57 = arith.constant 5 : index
    %c1024_58 = arith.constant 1024 : index
    %87 = vector.load %arg4[%c5_57, %c1024_58] : memref<9x1408xf32, #tpu.memory_space<vmem>>, vector<1x256xf32>
    %88 = vector.broadcast %87 : vector<1x256xf32> to vector<8x256xf32>
    %89 = arith.mulf %86, %88 : vector<8x256xf32>
    %c40_59 = arith.constant 40 : index
    %c0_60 = arith.constant 0 : index
    %90 = vector.load %arg13[%c40_59, %c0_60] : memref<72x256xf32, #tpu.memory_space<vmem>>, vector<8x256xf32>
    tpu.vector_store %arg13[%c40_59, %c0_60], %89 {strides = array<i32>} : memref<72x256xf32, #tpu.memory_space<vmem>>, vector<8x256xf32>,
    %c241_i32 = arith.constant 241 : i32
    %91 = tpu.dynamic_rotate %61 by %c241_i32 dim 1 : vector<8x256xf32>, i32 -> vector<8x256xf32>
    %c6_61 = arith.constant 6 : index
    %c1024_62 = arith.constant 1024 : index
    %92 = vector.load %arg4[%c6_61, %c1024_62] : memref<9x1408xf32, #tpu.memory_space<vmem>>, vector<1x256xf32>
    %93 = vector.broadcast %92 : vector<1x256xf32> to vector<8x256xf32>
    %94 = arith.mulf %91, %93 : vector<8x256xf32>
    %c48_63 = arith.constant 48 : index
    %c0_64 = arith.constant 0 : index
    %95 = vector.load %arg13[%c48_63, %c0_64] : memref<72x256xf32, #tpu.memory_space<vmem>>, vector<8x256xf32>
    tpu.vector_store %arg13[%c48_63, %c0_64], %94 {strides = array<i32>} : memref<72x256xf32, #tpu.memory_space<vmem>>, vector<8x256xf32>,
    %c240_i32 = arith.constant 240 : i32
    %96 = tpu.dynamic_rotate %61 by %c240_i32 dim 1 : vector<8x256xf32>, i32 -> vector<8x256xf32>
    %c7_65 = arith.constant 7 : index
    %c1024_66 = arith.constant 1024 : index
    %97 = vector.load %arg4[%c7_65, %c1024_66] : memref<9x1408xf32, #tpu.memory_space<vmem>>, vector<1x256xf32>
    %98 = vector.broadcast %97 : vector<1x256xf32> to vector<8x256xf32>
    %99 = arith.mulf %96, %98 : vector<8x256xf32>
    %c56_67 = arith.constant 56 : index
    %c0_68 = arith.constant 0 : index
    %100 = vector.load %arg13[%c56_67, %c0_68] : memref<72x256xf32, #tpu.memory_space<vmem>>, vector<8x256xf32>
    tpu.vector_store %arg13[%c56_67, %c0_68], %99 {strides = array<i32>} : memref<72x256xf32, #tpu.memory_space<vmem>>, vector<8x256xf32>,
    %c239_i32 = arith.constant 239 : i32
    %101 = tpu.dynamic_rotate %61 by %c239_i32 dim 1 : vector<8x256xf32>, i32 -> vector<8x256xf32>
    %c8_69 = arith.constant 8 : index
    %c1024_70 = arith.constant 1024 : index
    %102 = vector.load %arg4[%c8_69, %c1024_70] : memref<9x1408xf32, #tpu.memory_space<vmem>>, vector<1x256xf32>
    %103 = vector.broadcast %102 : vector<1x256xf32> to vector<8x256xf32>
    %104 = arith.mulf %101, %103 : vector<8x256xf32>
    %c64_71 = arith.constant 64 : index
    %c0_72 = arith.constant 0 : index
    %105 = vector.load %arg13[%c64_71, %c0_72] : memref<72x256xf32, #tpu.memory_space<vmem>>, vector<8x256xf32>
    tpu.vector_store %arg13[%c64_71, %c0_72], %104 {strides = array<i32>} : memref<72x256xf32, #tpu.memory_space<vmem>>, vector<8x256xf32>,
    %c1_73 = arith.constant 1 : index
    %c0_74 = arith.constant 0 : index
    %c0_75 = arith.constant 0 : index
    %106 = vector.load %arg2[%c1_73, %c0_74, %c0_75] : memref<3x8x72xf32, #tpu.memory_space<vmem>>, vector<1x8x72xf32>
    %107 = vector.shape_cast %106 : vector<1x8x72xf32> to vector<8x72xf32>
    %c0_76 = arith.constant 0 : index
    %c0_77 = arith.constant 0 : index
    %108 = vector.load %arg13[%c0_76, %c0_77] : memref<72x256xf32, #tpu.memory_space<vmem>>, vector<72x256xf32>
    %cst_78 = arith.constant dense<0.000000e+00> : vector<8x256xf32>
    %109 = tpu.matmul %107, %108, %cst_78 {dimension_numbers = #tpu.dot_dimension_numbers<[1], [0], [0], [1], [0, 0, 1, 1], [], []>} : vector<8x72xf32>, vector<72x256xf32>, vector<8x256xf32> -> vector<8x256xf32>
    %c1_79 = arith.constant 1 : index
    %c0_80 = arith.constant 0 : index
    %c0_81 = arith.constant 0 : index
    %110 = vector.load %arg3[%c1_79, %c0_80, %c0_81] : memref<3x8x1xf32, #tpu.memory_space<vmem>>, vector<1x8x1xf32>
    %111 = vector.shape_cast %110 : vector<1x8x1xf32> to vector<8x1xf32>
    %112 = vector.broadcast %111 : vector<8x1xf32> to vector<8x256xf32>
    %113 = arith.addf %109, %112 : vector<8x256xf32>
    %cst_82 = arith.constant 0.000000e+00 : f32
    %114 = vector.broadcast %cst_82 : f32 to vector<8x256xf32>
    %115 = arith.maximumf %113, %114 : vector<8x256xf32>
    %c255_i32_83 = arith.constant 255 : i32
    %116 = tpu.dynamic_rotate %115 by %c255_i32_83 dim 1 : vector<8x256xf32>, i32 -> vector<8x256xf32>
    %117 = arith.maximumf %115, %116 : vector<8x256xf32>
    %c240_i32_84 = arith.constant 240 : i32
    %118 = tpu.dynamic_rotate %117 by %c240_i32_84 dim 1 : vector<8x256xf32>, i32 -> vector<8x256xf32>
    %119 = arith.maximumf %117, %118 : vector<8x256xf32>
    %c1024_85 = arith.constant 1024 : index
    %c0_86 = arith.constant 0 : index
    %120 = vector.load %arg5[%c1024_85, %c0_86] : memref<1408x256xf32, #tpu.memory_space<vmem>>, vector<256x128xf32>
    %cst_87 = arith.constant dense<0.000000e+00> : vector<8x128xf32>
    %121 = tpu.matmul %119, %120, %cst_87 {dimension_numbers = #tpu.dot_dimension_numbers<[1], [0], [0], [1], [0, 0, 1, 1], [], []>} : vector<8x256xf32>, vector<256x128xf32>, vector<8x128xf32> -> vector<8x128xf32>
    %c9_i32 = arith.constant 9 : i32
    %122 = tpu.dynamic_rotate %121 by %c9_i32 dim 1 : vector<8x128xf32>, i32 -> vector<8x128xf32>
    %c0_88 = arith.constant 0 : index
    %c1280 = arith.constant 1280 : index
    %123 = vector.load %arg4[%c0_88, %c1280] : memref<9x1408xf32, #tpu.memory_space<vmem>>, vector<1x128xf32>
    %124 = vector.broadcast %123 : vector<1x128xf32> to vector<8x128xf32>
    %125 = arith.mulf %122, %124 : vector<8x128xf32>
    %c0_89 = arith.constant 0 : index
    %c0_90 = arith.constant 0 : index
    %126 = vector.load %arg14[%c0_89, %c0_90] : memref<72x128xf32, #tpu.memory_space<vmem>>, vector<8x128xf32>
    tpu.vector_store %arg14[%c0_89, %c0_90], %125 {strides = array<i32>} : memref<72x128xf32, #tpu.memory_space<vmem>>, vector<8x128xf32>,
    %c8_i32 = arith.constant 8 : i32
    %127 = tpu.dynamic_rotate %121 by %c8_i32 dim 1 : vector<8x128xf32>, i32 -> vector<8x128xf32>
    %c1_91 = arith.constant 1 : index
    %c1280_92 = arith.constant 1280 : index
    %128 = vector.load %arg4[%c1_91, %c1280_92] : memref<9x1408xf32, #tpu.memory_space<vmem>>, vector<1x128xf32>
    %129 = vector.broadcast %128 : vector<1x128xf32> to vector<8x128xf32>
    %130 = arith.mulf %127, %129 : vector<8x128xf32>
    %c8_93 = arith.constant 8 : index
    %c0_94 = arith.constant 0 : index
    %131 = vector.load %arg14[%c8_93, %c0_94] : memref<72x128xf32, #tpu.memory_space<vmem>>, vector<8x128xf32>
    tpu.vector_store %arg14[%c8_93, %c0_94], %130 {strides = array<i32>} : memref<72x128xf32, #tpu.memory_space<vmem>>, vector<8x128xf32>,
    %c7_i32 = arith.constant 7 : i32
    %132 = tpu.dynamic_rotate %121 by %c7_i32 dim 1 : vector<8x128xf32>, i32 -> vector<8x128xf32>
    %c2_95 = arith.constant 2 : index
    %c1280_96 = arith.constant 1280 : index
    %133 = vector.load %arg4[%c2_95, %c1280_96] : memref<9x1408xf32, #tpu.memory_space<vmem>>, vector<1x128xf32>
    %134 = vector.broadcast %133 : vector<1x128xf32> to vector<8x128xf32>
    %135 = arith.mulf %132, %134 : vector<8x128xf32>
    %c16_97 = arith.constant 16 : index
    %c0_98 = arith.constant 0 : index
    %136 = vector.load %arg14[%c16_97, %c0_98] : memref<72x128xf32, #tpu.memory_space<vmem>>, vector<8x128xf32>
    tpu.vector_store %arg14[%c16_97, %c0_98], %135 {strides = array<i32>} : memref<72x128xf32, #tpu.memory_space<vmem>>, vector<8x128xf32>,
    %c1_i32_99 = arith.constant 1 : i32
    %137 = tpu.dynamic_rotate %121 by %c1_i32_99 dim 1 : vector<8x128xf32>, i32 -> vector<8x128xf32>
    %c3_100 = arith.constant 3 : index
    %c1280_101 = arith.constant 1280 : index
    %138 = vector.load %arg4[%c3_100, %c1280_101] : memref<9x1408xf32, #tpu.memory_space<vmem>>, vector<1x128xf32>
    %139 = vector.broadcast %138 : vector<1x128xf32> to vector<8x128xf32>
    %140 = arith.mulf %137, %139 : vector<8x128xf32>
    %c24_102 = arith.constant 24 : index
    %c0_103 = arith.constant 0 : index
    %141 = vector.load %arg14[%c24_102, %c0_103] : memref<72x128xf32, #tpu.memory_space<vmem>>, vector<8x128xf32>
    tpu.vector_store %arg14[%c24_102, %c0_103], %140 {strides = array<i32>} : memref<72x128xf32, #tpu.memory_space<vmem>>, vector<8x128xf32>,
    %c4_104 = arith.constant 4 : index
    %c1280_105 = arith.constant 1280 : index
    %142 = vector.load %arg4[%c4_104, %c1280_105] : memref<9x1408xf32, #tpu.memory_space<vmem>>, vector<1x128xf32>
    %143 = vector.broadcast %142 : vector<1x128xf32> to vector<8x128xf32>
    %144 = arith.mulf %121, %143 : vector<8x128xf32>
    %c32_106 = arith.constant 32 : index
    %c0_107 = arith.constant 0 : index
    %145 = vector.load %arg14[%c32_106, %c0_107] : memref<72x128xf32, #tpu.memory_space<vmem>>, vector<8x128xf32>
    tpu.vector_store %arg14[%c32_106, %c0_107], %144 {strides = array<i32>} : memref<72x128xf32, #tpu.memory_space<vmem>>, vector<8x128xf32>,
    %c127_i32 = arith.constant 127 : i32
    %146 = tpu.dynamic_rotate %121 by %c127_i32 dim 1 : vector<8x128xf32>, i32 -> vector<8x128xf32>
    %c5_108 = arith.constant 5 : index
    %c1280_109 = arith.constant 1280 : index
    %147 = vector.load %arg4[%c5_108, %c1280_109] : memref<9x1408xf32, #tpu.memory_space<vmem>>, vector<1x128xf32>
    %148 = vector.broadcast %147 : vector<1x128xf32> to vector<8x128xf32>
    %149 = arith.mulf %146, %148 : vector<8x128xf32>
    %c40_110 = arith.constant 40 : index
    %c0_111 = arith.constant 0 : index
    %150 = vector.load %arg14[%c40_110, %c0_111] : memref<72x128xf32, #tpu.memory_space<vmem>>, vector<8x128xf32>
    tpu.vector_store %arg14[%c40_110, %c0_111], %149 {strides = array<i32>} : memref<72x128xf32, #tpu.memory_space<vmem>>, vector<8x128xf32>,
    %c121_i32 = arith.constant 121 : i32
    %151 = tpu.dynamic_rotate %121 by %c121_i32 dim 1 : vector<8x128xf32>, i32 -> vector<8x128xf32>
    %c6_112 = arith.constant 6 : index
    %c1280_113 = arith.constant 1280 : index
    %152 = vector.load %arg4[%c6_112, %c1280_113] : memref<9x1408xf32, #tpu.memory_space<vmem>>, vector<1x128xf32>
    %153 = vector.broadcast %152 : vector<1x128xf32> to vector<8x128xf32>
    %154 = arith.mulf %151, %153 : vector<8x128xf32>
    %c48_114 = arith.constant 48 : index
    %c0_115 = arith.constant 0 : index
    %155 = vector.load %arg14[%c48_114, %c0_115] : memref<72x128xf32, #tpu.memory_space<vmem>>, vector<8x128xf32>
    tpu.vector_store %arg14[%c48_114, %c0_115], %154 {strides = array<i32>} : memref<72x128xf32, #tpu.memory_space<vmem>>, vector<8x128xf32>,
    %c120_i32 = arith.constant 120 : i32
    %156 = tpu.dynamic_rotate %121 by %c120_i32 dim 1 : vector<8x128xf32>, i32 -> vector<8x128xf32>
    %c7_116 = arith.constant 7 : index
    %c1280_117 = arith.constant 1280 : index
    %157 = vector.load %arg4[%c7_116, %c1280_117] : memref<9x1408xf32, #tpu.memory_space<vmem>>, vector<1x128xf32>
    %158 = vector.broadcast %157 : vector<1x128xf32> to vector<8x128xf32>
    %159 = arith.mulf %156, %158 : vector<8x128xf32>
    %c56_118 = arith.constant 56 : index
    %c0_119 = arith.constant 0 : index
    %160 = vector.load %arg14[%c56_118, %c0_119] : memref<72x128xf32, #tpu.memory_space<vmem>>, vector<8x128xf32>
    tpu.vector_store %arg14[%c56_118, %c0_119], %159 {strides = array<i32>} : memref<72x128xf32, #tpu.memory_space<vmem>>, vector<8x128xf32>,
    %c119_i32 = arith.constant 119 : i32
    %161 = tpu.dynamic_rotate %121 by %c119_i32 dim 1 : vector<8x128xf32>, i32 -> vector<8x128xf32>
    %c8_120 = arith.constant 8 : index
    %c1280_121 = arith.constant 1280 : index
    %162 = vector.load %arg4[%c8_120, %c1280_121] : memref<9x1408xf32, #tpu.memory_space<vmem>>, vector<1x128xf32>
    %163 = vector.broadcast %162 : vector<1x128xf32> to vector<8x128xf32>
    %164 = arith.mulf %161, %163 : vector<8x128xf32>
    %c64_122 = arith.constant 64 : index
    %c0_123 = arith.constant 0 : index
    %165 = vector.load %arg14[%c64_122, %c0_123] : memref<72x128xf32, #tpu.memory_space<vmem>>, vector<8x128xf32>
    tpu.vector_store %arg14[%c64_122, %c0_123], %164 {strides = array<i32>} : memref<72x128xf32, #tpu.memory_space<vmem>>, vector<8x128xf32>,
    %c2_124 = arith.constant 2 : index
    %c0_125 = arith.constant 0 : index
    %c0_126 = arith.constant 0 : index
    %166 = vector.load %arg2[%c2_124, %c0_125, %c0_126] : memref<3x8x72xf32, #tpu.memory_space<vmem>>, vector<1x8x72xf32>
    %167 = vector.shape_cast %166 : vector<1x8x72xf32> to vector<8x72xf32>
    %c0_127 = arith.constant 0 : index
    %c0_128 = arith.constant 0 : index
    %168 = vector.load %arg14[%c0_127, %c0_128] : memref<72x128xf32, #tpu.memory_space<vmem>>, vector<72x128xf32>
    %cst_129 = arith.constant dense<0.000000e+00> : vector<8x128xf32>
    %169 = tpu.matmul %167, %168, %cst_129 {dimension_numbers = #tpu.dot_dimension_numbers<[1], [0], [0], [1], [0, 0, 1, 1], [], []>} : vector<8x72xf32>, vector<72x128xf32>, vector<8x128xf32> -> vector<8x128xf32>
    %c2_130 = arith.constant 2 : index
    %c0_131 = arith.constant 0 : index
    %c0_132 = arith.constant 0 : index
    %170 = vector.load %arg3[%c2_130, %c0_131, %c0_132] : memref<3x8x1xf32, #tpu.memory_space<vmem>>, vector<1x8x1xf32>
    %171 = vector.shape_cast %170 : vector<1x8x1xf32> to vector<8x1xf32>
    %172 = vector.broadcast %171 : vector<8x1xf32> to vector<8x128xf32>
    %173 = arith.addf %169, %172 : vector<8x128xf32>
    %cst_133 = arith.constant 0.000000e+00 : f32
    %174 = vector.broadcast %cst_133 : f32 to vector<8x128xf32>
    %175 = arith.maximumf %173, %174 : vector<8x128xf32>
    %c127_i32_134 = arith.constant 127 : i32
    %176 = tpu.dynamic_rotate %175 by %c127_i32_134 dim 1 : vector<8x128xf32>, i32 -> vector<8x128xf32>
    %177 = arith.maximumf %175, %176 : vector<8x128xf32>
    %c120_i32_135 = arith.constant 120 : i32
    %178 = tpu.dynamic_rotate %177 by %c120_i32_135 dim 1 : vector<8x128xf32>, i32 -> vector<8x128xf32>
    %179 = arith.maximumf %177, %178 : vector<8x128xf32>
    %c1280_136 = arith.constant 1280 : index
    %c0_137 = arith.constant 0 : index
    %180 = vector.load %arg5[%c1280_136, %c0_137] : memref<1408x256xf32, #tpu.memory_space<vmem>>, vector<128x16xf32>
    %cst_138 = arith.constant dense<0.000000e+00> : vector<8x16xf32>
    %181 = tpu.matmul %179, %180, %cst_138 {dimension_numbers = #tpu.dot_dimension_numbers<[1], [0], [0], [1], [0, 0, 1, 1], [], []>} : vector<8x128xf32>, vector<128x16xf32>, vector<8x16xf32> -> vector<8x16xf32>
    %182 = vector.extract_strided_slice %181 {offsets = [0, 0], sizes = [1, 16], strides = [1, 1]} : vector<8x16xf32> to vector<1x16xf32>
    %c0_139 = arith.constant 0 : index
    %c0_140 = arith.constant 0 : index
    %183 = vector.load %arg15[%c0_139, %c0_140] : memref<1x128xf32, #tpu.memory_space<vmem>>, vector<1x16xf32>
    tpu.vector_store %arg15[%c0_139, %c0_140], %182 {strides = array<i32>} : memref<1x128xf32, #tpu.memory_space<vmem>>, vector<1x16xf32>,
    %184 = vector.extract_strided_slice %181 {offsets = [1, 0], sizes = [1, 16], strides = [1, 1]} : vector<8x16xf32> to vector<1x16xf32>
    %c0_141 = arith.constant 0 : index
    %c16_142 = arith.constant 16 : index
    %185 = vector.load %arg15[%c0_141, %c16_142] : memref<1x128xf32, #tpu.memory_space<vmem>>, vector<1x16xf32>
    tpu.vector_store %arg15[%c0_141, %c16_142], %184 {strides = array<i32>} : memref<1x128xf32, #tpu.memory_space<vmem>>, vector<1x16xf32>,
    %186 = vector.extract_strided_slice %181 {offsets = [2, 0], sizes = [1, 16], strides = [1, 1]} : vector<8x16xf32> to vector<1x16xf32>
    %c0_143 = arith.constant 0 : index
    %c32_144 = arith.constant 32 : index
    %187 = vector.load %arg15[%c0_143, %c32_144] : memref<1x128xf32, #tpu.memory_space<vmem>>, vector<1x16xf32>
    tpu.vector_store %arg15[%c0_143, %c32_144], %186 {strides = array<i32>} : memref<1x128xf32, #tpu.memory_space<vmem>>, vector<1x16xf32>,
    %188 = vector.extract_strided_slice %181 {offsets = [3, 0], sizes = [1, 16], strides = [1, 1]} : vector<8x16xf32> to vector<1x16xf32>
    %c0_145 = arith.constant 0 : index
    %c48_146 = arith.constant 48 : index
    %189 = vector.load %arg15[%c0_145, %c48_146] : memref<1x128xf32, #tpu.memory_space<vmem>>, vector<1x16xf32>
    tpu.vector_store %arg15[%c0_145, %c48_146], %188 {strides = array<i32>} : memref<1x128xf32, #tpu.memory_space<vmem>>, vector<1x16xf32>,
    %190 = vector.extract_strided_slice %181 {offsets = [4, 0], sizes = [1, 16], strides = [1, 1]} : vector<8x16xf32> to vector<1x16xf32>
    %c0_147 = arith.constant 0 : index
    %c64_148 = arith.constant 64 : index
    %191 = vector.load %arg15[%c0_147, %c64_148] : memref<1x128xf32, #tpu.memory_space<vmem>>, vector<1x16xf32>
    tpu.vector_store %arg15[%c0_147, %c64_148], %190 {strides = array<i32>} : memref<1x128xf32, #tpu.memory_space<vmem>>, vector<1x16xf32>,
    %192 = vector.extract_strided_slice %181 {offsets = [5, 0], sizes = [1, 16], strides = [1, 1]} : vector<8x16xf32> to vector<1x16xf32>
    %c0_149 = arith.constant 0 : index
    %c80 = arith.constant 80 : index
    %193 = vector.load %arg15[%c0_149, %c80] : memref<1x128xf32, #tpu.memory_space<vmem>>, vector<1x16xf32>
    tpu.vector_store %arg15[%c0_149, %c80], %192 {strides = array<i32>} : memref<1x128xf32, #tpu.memory_space<vmem>>, vector<1x16xf32>,
    %194 = vector.extract_strided_slice %181 {offsets = [6, 0], sizes = [1, 16], strides = [1, 1]} : vector<8x16xf32> to vector<1x16xf32>
    %c0_150 = arith.constant 0 : index
    %c96 = arith.constant 96 : index
    %195 = vector.load %arg15[%c0_150, %c96] : memref<1x128xf32, #tpu.memory_space<vmem>>, vector<1x16xf32>
    tpu.vector_store %arg15[%c0_150, %c96], %194 {strides = array<i32>} : memref<1x128xf32, #tpu.memory_space<vmem>>, vector<1x16xf32>,
    %196 = vector.extract_strided_slice %181 {offsets = [7, 0], sizes = [1, 16], strides = [1, 1]} : vector<8x16xf32> to vector<1x16xf32>
    %c0_151 = arith.constant 0 : index
    %c112 = arith.constant 112 : index
    %197 = vector.load %arg15[%c0_151, %c112] : memref<1x128xf32, #tpu.memory_space<vmem>>, vector<1x16xf32>
    tpu.vector_store %arg15[%c0_151, %c112], %196 {strides = array<i32>} : memref<1x128xf32, #tpu.memory_space<vmem>>, vector<1x16xf32>,
    %c0_152 = arith.constant 0 : index
    %c0_153 = arith.constant 0 : index
    %198 = vector.load %arg15[%c0_152, %c0_153] : memref<1x128xf32, #tpu.memory_space<vmem>>, vector<1x128xf32>
    %c0_154 = arith.constant 0 : index
    %c0_155 = arith.constant 0 : index
    %199 = vector.load %arg6[%c0_154, %c0_155] : memref<128x32xf32, #tpu.memory_space<vmem>>, vector<128x32xf32>
    %cst_156 = arith.constant dense<0.000000e+00> : vector<1x32xf32>
    %200 = tpu.matmul %198, %199, %cst_156 {dimension_numbers = #tpu.dot_dimension_numbers<[1], [0], [0], [1], [0, 0, 1, 1], [], []>} : vector<1x128xf32>, vector<128x32xf32>, vector<1x32xf32> -> vector<1x32xf32>
    %c0_157 = arith.constant 0 : index
    %c0_158 = arith.constant 0 : index
    %201 = vector.load %arg10[%c0_157, %c0_158] : memref<1x74xf32, #tpu.memory_space<vmem>>, vector<1x32xf32>
    %202 = arith.addf %200, %201 : vector<1x32xf32>
    %cst_159 = arith.constant 0.000000e+00 : f32
    %203 = vector.broadcast %cst_159 : f32 to vector<1x32xf32>
    %204 = arith.maximumf %202, %203 : vector<1x32xf32>
    %c0_160 = arith.constant 0 : index
    %c0_161 = arith.constant 0 : index
    %205 = vector.load %arg7[%c0_160, %c0_161] : memref<32x16xf32, #tpu.memory_space<vmem>>, vector<32x16xf32>
    %cst_162 = arith.constant dense<0.000000e+00> : vector<1x16xf32>
    %206 = tpu.matmul %204, %205, %cst_162 {dimension_numbers = #tpu.dot_dimension_numbers<[1], [0], [0], [1], [0, 0, 1, 1], [], []>} : vector<1x32xf32>, vector<32x16xf32>, vector<1x16xf32> -> vector<1x16xf32>
    %c0_163 = arith.constant 0 : index
    %c32_164 = arith.constant 32 : index
    %207 = vector.load %arg10[%c0_163, %c32_164] : memref<1x74xf32, #tpu.memory_space<vmem>>, vector<1x16xf32>
    %208 = arith.addf %206, %207 : vector<1x16xf32>
    %cst_165 = arith.constant 0.000000e+00 : f32
    %209 = vector.broadcast %cst_165 : f32 to vector<1x16xf32>
    %210 = arith.maximumf %208, %209 : vector<1x16xf32>
    %c0_166 = arith.constant 0 : index
    %c0_167 = arith.constant 0 : index
    %211 = vector.load %arg8[%c0_166, %c0_167] : memref<16x16xf32, #tpu.memory_space<vmem>>, vector<16x16xf32>
    %cst_168 = arith.constant dense<0.000000e+00> : vector<1x16xf32>
    %212 = tpu.matmul %210, %211, %cst_168 {dimension_numbers = #tpu.dot_dimension_numbers<[1], [0], [0], [1], [0, 0, 1, 1], [], []>} : vector<1x16xf32>, vector<16x16xf32>, vector<1x16xf32> -> vector<1x16xf32>
    %c0_169 = arith.constant 0 : index
    %c48_170 = arith.constant 48 : index
    %213 = vector.load %arg10[%c0_169, %c48_170] : memref<1x74xf32, #tpu.memory_space<vmem>>, vector<1x16xf32>
    %214 = arith.addf %212, %213 : vector<1x16xf32>
    %cst_171 = arith.constant 0.000000e+00 : f32
    %215 = vector.broadcast %cst_171 : f32 to vector<1x16xf32>
    %216 = arith.maximumf %214, %215 : vector<1x16xf32>
    %c0_172 = arith.constant 0 : index
    %c0_173 = arith.constant 0 : index
    %217 = vector.load %arg9[%c0_172, %c0_173] : memref<16x10xf32, #tpu.memory_space<vmem>>, vector<16x10xf32>
    %cst_174 = arith.constant dense<0.000000e+00> : vector<1x10xf32>
    %218 = tpu.matmul %216, %217, %cst_174 {dimension_numbers = #tpu.dot_dimension_numbers<[1], [0], [0], [1], [0, 0, 1, 1], [], []>} : vector<1x16xf32>, vector<16x10xf32>, vector<1x10xf32> -> vector<1x10xf32>
    %c0_175 = arith.constant 0 : index
    %c64_176 = arith.constant 64 : index
    %219 = vector.load %arg10[%c0_175, %c64_176] : memref<1x74xf32, #tpu.memory_space<vmem>>, vector<1x10xf32>
    %220 = arith.addf %218, %219 : vector<1x10xf32>
    %c0_177 = arith.constant 0 : index
    %c0_178 = arith.constant 0 : index
    %c0_179 = arith.constant 0 : index
    %221 = vector.load %arg11[%c0_177, %c0_178, %c0_179] : memref<1x1x10xf32, #tpu.memory_space<vmem>>, vector<1x1x10xf32>
    %222 = vector.shape_cast %221 : vector<1x1x10xf32> to vector<1x10xf32>
    %223 = vector.shape_cast %220 : vector<1x10xf32> to vector<1x1x10xf32>
    tpu.vector_store %arg11[%c0_177, %c0_178, %c0_179], %223 {strides = array<i32>} : memref<1x1x10xf32, #tpu.memory_space<vmem>>, vector<1x1x10xf32>,
    return
  }
  func.func @transform_0(%arg0: i32) -> (i32, i32, i32) {
    %c0_i32 = arith.constant 0 : i32
    %c0_i32_0 = arith.constant 0 : i32
    %c0_i32_1 = arith.constant 0 : i32
    return %arg0, %c0_i32, %c0_i32_0 : i32, i32, i32
  }
  func.func @transform_1(%arg0: i32) -> (i32, i32, i32) {
    %c0_i32 = arith.constant 0 : i32
    %c0_i32_0 = arith.constant 0 : i32
    %c0_i32_1 = arith.constant 0 : i32
    %c0_i32_2 = arith.constant 0 : i32
    return %c0_i32, %c0_i32_0, %c0_i32_1 : i32, i32, i32
  }
  func.func @transform_2(%arg0: i32) -> (i32, i32, i32) {
    %c0_i32 = arith.constant 0 : i32
    %c0_i32_0 = arith.constant 0 : i32
    %c0_i32_1 = arith.constant 0 : i32
    %c0_i32_2 = arith.constant 0 : i32
    return %c0_i32, %c0_i32_0, %c0_i32_1 : i32, i32, i32
  }
  func.func @transform_3(%arg0: i32) -> (i32, i32) {
    %c0_i32 = arith.constant 0 : i32
    %c0_i32_0 = arith.constant 0 : i32
    %c0_i32_1 = arith.constant 0 : i32
    return %c0_i32, %c0_i32_0 : i32, i32
  }
  func.func @transform_4(%arg0: i32) -> (i32, i32) {
    %c0_i32 = arith.constant 0 : i32
    %c0_i32_0 = arith.constant 0 : i32
    %c0_i32_1 = arith.constant 0 : i32
    return %c0_i32, %c0_i32_0 : i32, i32
  }
  func.func @transform_5(%arg0: i32) -> (i32, i32) {
    %c0_i32 = arith.constant 0 : i32
    %c0_i32_0 = arith.constant 0 : i32
    %c0_i32_1 = arith.constant 0 : i32
    return %c0_i32, %c0_i32_0 : i32, i32
  }
  func.func @transform_6(%arg0: i32) -> (i32, i32) {
    %c0_i32 = arith.constant 0 : i32
    %c0_i32_0 = arith.constant 0 : i32
    %c0_i32_1 = arith.constant 0 : i32
    return %c0_i32, %c0_i32_0 : i32, i32
  }
  func.func @transform_7(%arg0: i32) -> (i32, i32) {
    %c0_i32 = arith.constant 0 : i32
    %c0_i32_0 = arith.constant 0 : i32
    %c0_i32_1 = arith.constant 0 : i32
    return %c0_i32, %c0_i32_0 : i32, i32
  }
  func.func @transform_8(%arg0: i32) -> (i32, i32) {
    %c0_i32 = arith.constant 0 : i32
    %c0_i32_0 = arith.constant 0 : i32
    %c0_i32_1 = arith.constant 0 : i32
    return %c0_i32, %c0_i32_0 : i32, i32
  }
  func.func @transform_9(%arg0: i32) -> (i32, i32) {
    %c0_i32 = arith.constant 0 : i32
    %c0_i32_0 = arith.constant 0 : i32
    %c0_i32_1 = arith.constant 0 : i32
    return %c0_i32, %c0_i32_0 : i32, i32
  }
  func.func @transform_10(%arg0: i32) -> (i32, i32, i32) {
    %c0_i32 = arith.constant 0 : i32
    %c0_i32_0 = arith.constant 0 : i32
    %c0_i32_1 = arith.constant 0 : i32
    return %arg0, %c0_i32, %c0_i32_0 : i32, i32, i32
  }
}

</mosaic_0001>

<bundles_post_ra>
// kernel: forward.1
= control target key start
LH: loop header
LB: loop body
LE: loop exit
PB: predicated region body
PF: predicated region fallthrough
CT: control target
= control target key end

     0   :  { %s4241_s0 = inlined_call_operand.vmem [shape: f32[2,8,1024], index: 0, kind: input, shape index: {}]   ;;  %s4242_s1 = inlined_call_operand.hbm [shape: f32[3,8,72], index: 1, kind: input, shape index: {}]   ;;  %s4243_s2 = inlined_call_operand.vmem [shape: f32[3,8,1], index: 2, kind: input, shape index: {}]   ;;  %s4244_s3 = inlined_call_operand.hbm [shape: f32[9,1408], index: 3, kind: input, shape index: {}]   ;;  %s4245_s4 = inlined_call_operand.hbm [shape: f32[1408,256], index: 4, kind: input, shape index: {}]   ;;  %s4246_s5 = inlined_call_operand.vmem [shape: f32[128,32], index: 5, kind: input, shape index: {}]   ;;  %s4247_s6 = inlined_call_operand.vmem [shape: f32[32,16], index: 6, kind: input, shape index: {}]   ;;  %s4248_s7 = inlined_call_operand.hbm [shape: f32[16,16], index: 7, kind: input, shape index: {}]   ;;  %s4249_s8 = inlined_call_operand.hbm [shape: f32[16,10], index: 8, kind: input, shape index: {}]   ;;  %s4250_s9 = inlined_call_operand.hbm [shape: f32[1,74], index: 9, kind: input, shape index: {}]   ;;  %s4251_s10 = inlined_call_operand.hbm [shape: f32[2,1,10], index: 10, kind: output, shape index: {}]  }
   0x1   :  { %4257 = sst [smem:[#allocation28_spill]] %s4244_s3 }
   0x2   :  { %4258 = sst [smem:[#allocation29_spill]] %s4248_s7 }
   0x3   :  { %15 = vsyncpa [#allocation7], 0 }
   0x4   :  { %16 = vsyncpa [#allocation10], 0 }
   0x5   :  { %17 = vsyncpa [#allocation13], 0 }
   0x6   :  { %18 = vsyncpa [#allocation16], 0 }
   0x7   :  { %19 = vsyncpa [#allocation8], 0 }
   0x8   :  { %21 = vsyncpa [#allocation8 + $0x1], 0  ;;  %s3199_s13 = smov 0   ;;  %s3201_s14 = smov 0  }
   0x9   :  { %s3203_s15 = smov 0   ;;  %s3205_s16 = smov 0  }
   0xa LB: > { %4259 = sst [smem:[#allocation23_spill]] %s3094_s13  ;;  %s3220_s17 = sadd.s32 4294967295, %s3106_s16   ;;  %s3106_s16 = sphi %s3205_s16, %s4272_s16   ;;  %s3102_s15 = sphi %s3203_s15, %s4274_s15   ;;  %s3098_s14 = sphi %s3201_s14, %s4276_s14   ;;  %s3094_s13 = sphi %s3199_s13, %s4275_s13  }
   0xb   : > { %4260 = sst [smem:[#allocation24_spill]] %s3102_s15  ;;  %s2627_s18 = sadd.s32 4294967294, %s3106_s16  }
   0xc   : > { %s3224_s19 = sadd.s32 1, %s3106_s16   ;;  %s249_s20 = sadd.s32 1, %s3102_s15 }
   0xd   : > { %4261 = sst [smem:[#allocation25_spill]] %s3224_s19  ;;  %s246_s21 = ssub.s32 %s3106_s16, %s3224_s19 }
   0xe   : > { %p259_p0 = scmp.ne.s32.totalorder %s3102_s15, %s3098_s14  ;;  %p247_p1 = scmp.eq.s32.totalorder %s246_s21, 0 }
   0xf   : > { %p260_p2 = scmp.eq.s32.totalorder %s3220_s17, 1  ;;  %p265_p3 = scmp.ne.s32.totalorder %s3098_s14, %s3094_s13 }
  0x10   : > { %p266_p4 = scmp.eq.s32.totalorder %s2627_s18, 1  ;;  %p2628_p7 = scmp.ge.s32.totalorder %s3106_s16, 1 }
  0x11   : > { %s3235_s22 = scalar_select %p247_p1, %s3102_s15, %s249_s20  }
  0x12   : > { %p3237_p5 = por %p260_p2, %p259_p0  ;;  %p3241_p6 = por %p266_p4, %p265_p3 }
  0x13   : > { %4262 = sst [smem:[#allocation26_spill]] %s3235_s22  ;;  %p273_p8 = scmp.lt.s32.totalorder %s3106_s16, 3 }
  0x14   : > { %s4264_s24 = scalar_select %p3241_p6, 1, 0 }
  0x15   : > { %p2713_p9 = scmp.eq.s32.totalorder %s3220_s17, 0  ;;  %p3248_p10 = pnand %p2628_p7, %p273_p8 }
  0x16   : > { %4265 = sst [smem:[#allocation27_spill]] %s4264_s24  ;;  %s3108_s29 = smov [#allocation9]  }
  0x17   : > { %s4267_s3 = sld [smem:[#allocation28_spill]]  ;;  %p2690_p11 = pneg %p3248_p10 }
  0x18   : > { %s303_s30 = sshll.u32 %s3108_s29, 4  ;;  %s4269_s7 = sld [smem:[#allocation29_spill]]  ;;  %s304_s30 = int_to_ptr.vmem [resolvable:$true] %s303_s30 }
  0x19   : > { %p3259_p12 = pnand %p2713_p9, %p2690_p11  ;;  %s3109_s21 = smov 1408  }
  0x1a   : > { %s3110_s26 = smov 88   ;;  %s3111_s27 = smov [#allocation12]  }
  0x1b   : > { %s337_s29 = sshll.u32 %s3111_s27, 4  ;;  %s284_s15 = sshll.u32 %s4242_s1, 4  ;;  %s338_s29 = int_to_ptr.vmem [resolvable:$true] %s337_s29  ;;  %s285_s15 = int_to_ptr.hbm [resolvable:$true] %s284_s15 }
  0x1c   : > { %s3112_s19 = smov 128   ;;  %s3113_s12 = smov 8  }
  0x1d   : > { %s301_s28 = sshll.u32 %s4267_s3, 4  ;;  %s315_s24 = sshll.u32 %s4245_s4, 4  ;;  %s302_s28 = int_to_ptr.hbm [resolvable:$true] %s301_s28  ;;  %s316_s24 = int_to_ptr.hbm [resolvable:$true] %s315_s24 }
  0x1e   : > { %s335_s20 = sshll.u32 %s4269_s7, 4  ;;  %s3114_s13 = smov [#allocation6]   ;;  %s336_s20 = int_to_ptr.hbm [resolvable:$true] %s335_s20 }
  0x1f   : > { %2696 = dma.hbm_to_vmem [thread:$0]  (!%p3259_p12), %s302_s28, 2816, %s304_s30, [#allocation10], %s3109_s21, %s3109_s21, %s3110_s26  }
  0x20   : > { %2702 = dma.hbm_to_vmem [thread:$0]  (!%p3259_p12), %s336_s20, 256, %s338_s29, [#allocation13], %s3112_s19, %s3112_s19, %s3113_s12  }
  0x21   : > { %s286_s28 = sshll.u32 %s3114_s13, 4  ;;  %s3115_s3 = smov [#allocation11]   ;;  %s287_s28 = int_to_ptr.vmem [resolvable:$true] %s286_s28 }
  0x22   : > { %2693 = dma.hbm_to_vmem [thread:$0]  (!%p3259_p12), %s285_s15, 384, %s287_s28, [#allocation7], %s3112_s19, %s3112_s19, %s3113_s12  }
  0x23   : > { %s317_s22 = sshll.u32 %s3115_s3, 4  ;;  %s3116_s30 = smov 256   ;;  %s318_s22 = int_to_ptr.vmem [resolvable:$true] %s317_s22 }
  0x24   : > { %s3117_s21 = smov 16   ;;  %s349_s7 = sshll.u32 %s4249_s8, 4  ;;  %s350_s7 = int_to_ptr.hbm [resolvable:$true] %s349_s7 }
  0x25   : > { %2699 = dma.hbm_to_vmem [thread:$0]  (!%p3259_p12), %s316_s24, 45056, %s318_s22, [#allocation10], %s3116_s30, %s3116_s30, %s3117_s21  }
  0x26   : > { %s3118_s27 = smov [#allocation14]   ;;  %s364_s15 = sshll.u32 %s4250_s9, 4  ;;  %s365_s15 = int_to_ptr.hbm [resolvable:$true] %s364_s15 }
  0x27   : > { %s351_s13 = sshll.u32 %s3118_s27, 4  ;;  %s3119_s28 = smov [#allocation15]   ;;  %s352_s13 = int_to_ptr.vmem [resolvable:$true] %s351_s13 }
  0x28   : > { %2705 = dma.hbm_to_vmem [thread:$0]  (!%p3259_p12), %s350_s7, 256, %s352_s13, [#allocation13], %s3112_s19, %s3112_s19, %s3113_s12  }
  0x29   : > { %s366_s3 = sshll.u32 %s3119_s28, 4  ;;  %387 = sbr.rel (%p3248_p10) target bundleno = 2848 (0xb20), region = 60  ;;  %s367_s3 = int_to_ptr.vmem [resolvable:$true] %s366_s3 }
  0x2a   : > { %2708 = dma.hbm_to_vmem [thread:$0]  (!%p3259_p12), %s365_s15, 16, %s367_s3, [#allocation16]  }
  0x2e   : > { %3073 = dma.done.wait (%p2713_p9), [#allocation7], 384  }
  0x2f   : > { %3075 = vsyncadd (%p2713_p9), [#allocation7], 4294966912 }
  0x30   : > { %3077 = dma.done.wait (%p2713_p9), [#allocation10], 47872  }
  0x31   : > { %3079 = vsyncadd (%p2713_p9), [#allocation10], 4294919424 }
  0x32   : > { %3081 = dma.done.wait (%p2713_p9), [#allocation13], 512  }
  0x33   : > { %3083 = vsyncadd (%p2713_p9), [#allocation13], 4294966784 }
  0x34   : > { %3085 = dma.done.wait (%p2713_p9), [#allocation16], 16  }
  0x35   : > { %3087 = vsyncadd (%p2713_p9), [#allocation16], 4294967280  ;;  %p450_p13 = scmp.lt.s32.totalorder %s3220_s17, 1  ;;  %s3120_s22 = smov 97   ;;  %v479_v15 = vlaneseq  ;;  %vm1076_vm8 = vcmask 588800   ;;  %vm2328_vm15 = vcmask 122880  }
  0x36   : > { %s3121_s30 = smov 96   ;;  %s3122_s21 = smov 95   ;;  %v961_v11 = vld [vmem:[#allocation9 + $0x58] ss:$8 sm:$0xf] }
  0x37   : > { %s451_s19 = scalar_select %p450_p13, %s3220_s17, 1  ;;  %v962_v12 = vld [vmem:[#allocation9 + $0x58] ss:$8 sm:$0xf0]  ;;  %v3445_v23 = vand.u32 127, %v479_v15 }
  0x38   : > { %s3123_s20 = smov 1   ;;  %s3124_s26 = smov 127   ;;  %v899_v13 = vld [vmem:[#allocation9 + $0x7] ss:$8 sm:$0xf]  ;;  %v3441_v19 = vor.u32 %v962_v12, %v961_v11 }
  0x39   : > { %s2663_s24 = sshll.u32 %s451_s19, 6  ;;  %s3125_s7 = smov 31   ;;  %v900_v14 = vld [vmem:[#allocation9 + $0x7] ss:$8 sm:$0xf0]  ;;  %vm889_vm0 = vcmp.lt.s32.totalorder %v3445_v23, 96 }
  0x3a   : > { %s3313_s12 = scalar_lea.vmem %s4241_s0, %s2663_s24  ;;  %s3126_s27 = smov 32   ;;  %v3443_v20 = vor.u32 %v900_v14, %v899_v13  ;;  %v837_v21 = vld [vmem:[#allocation9 + $0x6] ss:$8 sm:$0xf]  ;;  %vm951_vm1 = vcmp.lt.s32.totalorder %v3445_v23, 95  ;;  %v965_v25 = vperm.slane %v3441_v19, 0 }
  0x3b   : > { %v3316_v0 = vld [vmem:[%s3313_s12] sm:$0xff]  ;;  %v3325_v1 = vld [vmem:[%s3313_s12 + $0x8] sm:$0xff]  ;;  %v3340_v2 = vld [vmem:[%s3313_s12 + $0x18] sm:$0xff]  ;;  %s3127_s13 = smov 33   ;;  %vm827_vm2 = vcmp.lt.s32.totalorder %v3445_v23, 97  ;;  %vm765_vm3 = vcmp.lt.s32.totalorder %v3445_v23, 127  ;;  %s2508_s29 = scalar_lea.hbm %s4251_s10, %s3220_s17 }
  0x3c   : > { %811 = vrot.lane.b32.xlu2 %v3316_v0, %s3120_s22  ;;  %873 = vrot.lane.b32.xlu1 %v3316_v0, %s3121_s30  ;;  %v3343_v3 = vld [vmem:[%s3313_s12 + $0x10] sm:$0xff]  ;;  %v3346_v4 = vld [vmem:[%s3313_s12 + $0x38] sm:$0xff]  ;;  %v903_v26 = vperm.slane %v3443_v20, 0  ;;  %v966_v54 = vperm.slane %v3441_v19, 1  ;;  %v904_v55 = vperm.slane %v3443_v20, 1  ;;  %vm666_vm4 = vcmp.lt.s32.totalorder %v3445_v23, 1 }
  0x3d   : > { %935 = vrot.lane.b32.xlu0 %v3316_v0, %s3122_s21  ;;  %v3361_v5 = vld [vmem:[%s3313_s12 + $0x20] sm:$0xff]  ;;  %v3388_v6 = vld [vmem:[%s3313_s12 + $0x28] sm:$0xff]  ;;  %v3397_v7 = vld [vmem:[%s3313_s12 + $0x30] sm:$0xff]  ;;  %vm604_vm5 = vcmp.lt.s32.totalorder %v3445_v23, 31  ;;  %vm542_vm6 = vcmp.lt.s32.totalorder %v3445_v23, 32  ;;  %vm481_vm7 = vcmp.lt.s32.totalorder %v3445_v23, 33 }
  0x3e   : > { %v838_v22 = vld [vmem:[#allocation9 + $0x6] ss:$8 sm:$0xf0]  ;;  %v775_v27 = vld [vmem:[#allocation9 + $0x5] ss:$8 sm:$0xf] }
  0x3f   : > { %v3447_v24 = vor.u32 %v838_v22, %v837_v21  ;;  %v776_v28 = vld [vmem:[#allocation9 + $0x5] ss:$8 sm:$0xf0]  ;;  %v713_v31 = vld [vmem:[#allocation9 + $0x4] ss:$8 sm:$0xf] }
  0x40   : > { %v714_v32 = vld [vmem:[#allocation9 + $0x4] ss:$8 sm:$0xf0]  ;;  %v3469_v39 = vor.u32 %v776_v28, %v775_v27  ;;  %v676_v47 = vld [vmem:[#allocation9 + $0x3] ss:$8 sm:$0xf] }
  0x41   : > { %v841_v36 = vperm.slane %v3447_v24, 0  ;;  %v3471_v40 = vor.u32 %v714_v32, %v713_v31  ;;  %v677_v48 = vld [vmem:[#allocation9 + $0x3] ss:$8 sm:$0xf0]  ;;  %v968_v28 = vperm.slane %v3441_v19, 3  ;;  %s3129_s15 = smov 113  }
  0x42   : > { %v779_v43 = vperm.slane %v3469_v39, 0  ;;  %v3497_v53 = vor.u32 %v677_v48, %v676_v47  ;;  %v614_v60 = vld [vmem:[#allocation9 + $0x2] ss:$8 sm:$0xf]  ;;  %s3130_s28 = smov 112   ;;  %s3131_s3 = smov 111  }
  0x43   : > { %v717_v44 = vperm.slane %v3471_v40, 0  ;;  %v615_v61 = vld [vmem:[#allocation9 + $0x2] ss:$8 sm:$0xf0]  ;;  %s3132_s19 = smov 15   ;;  %s3133_s24 = smov 16  }
  0x44   : > { %813 = vrot.lane.b32.xlu2 %v3325_v1, %s3120_s22  ;;  %875 = vrot.lane.b32.xlu1 %v3325_v1, %s3121_s30  ;;  %v680_v57 = vperm.slane %v3497_v53, 0  ;;  %v3522_v14 = vor.u32 %v615_v61, %v614_v60  ;;  %v553_v31 = vld [vmem:[#allocation9 + $0x1] ss:$8 sm:$0xf0]  ;;  %s3134_s25 = smov 17   ;;  %vm2027_vm9 = vcmp.lt.s32.totalorder %v3445_v23, 111 }
  0x45   : > { %937 = vrot.lane.b32.xlu0 %v3325_v1, %s3122_s21  ;;  %v733_v52 = vmul.f32 %v717_v44, %v3316_v0  ;;  %vm1991_vm10 = vcmp.lt.s32.totalorder %v3445_v23, 113  ;;  %vm2009_vm11 = vcmp.lt.s32.totalorder %v3445_v23, 112  ;;  %vm1928_vm12 = vcmp.lt.s32.totalorder %v3445_v23, 15 }
  0x46   : > { %v618_v15 = vperm.slane %v3522_v14, 0  ;;  %vm1910_vm13 = vcmp.lt.s32.totalorder %v3445_v23, 16  ;;  %vm1892_vm14 = vcmp.lt.s32.totalorder %v3445_v23, 17  ;;  %v2656_v23 = vld [vmem:[%s4243_s2 + $0x10] sm:$0xff] }
  0x4c   : > { %650 = vrot.lane.b32.xlu2 %v3316_v0, %s3123_s20  ;;  %751 = vrot.lane.b32.xlu1 %v3325_v1, %s3124_s26 }
  0x4d   : > { %749 = vrot.lane.b32.xlu0 %v3316_v0, %s3124_s26 }
  0x54   : > { %941 = vrot.lane.b32.xlu2 %v3340_v2, %s3122_s21  ;;  %939 = vrot.lane.b32.xlu1 %v3343_v3, %s3122_s21 }
  0x55   : > { %664 = vrot.lane.b32.xlu0 %v3346_v4, %s3123_s20 }
  0x5c   : > { %877 = vrot.lane.b32.xlu2 %v3343_v3, %s3121_s30  ;;  %602 = vrot.lane.b32.xlu1 %v3346_v4, %s3125_s7 }
  0x5d   : > { %588 = vrot.lane.b32.xlu0 %v3316_v0, %s3125_s7 }
  0x64   : > { %526 = vrot.lane.b32.xlu2 %v3316_v0, %s3126_s27  ;;  %943 = vrot.lane.b32.xlu1 %v3361_v5, %s3122_s21 }
  0x65   : > { %879 = vrot.lane.b32.xlu0 %v3340_v2, %s3121_s30 }
  0x6c   : > { %817 = vrot.lane.b32.xlu2 %v3340_v2, %s3120_s22  ;;  %815 = vrot.lane.b32.xlu1 %v3343_v3, %s3120_s22 }
  0x6d   : > { %540 = vrot.lane.b32.xlu0 %v3346_v4, %s3126_s27 }
  0x74   : > { %477 = vrot.lane.b32.xlu2 %v3346_v4, %s3127_s13  ;;  %463 = vrot.lane.b32.xlu1 %v3316_v0, %s3127_s13 }
  0x75   : > { %881 = vrot.lane.b32.xlu0 %v3361_v5, %s3121_s30 }
  0x7c   : > { %819 = vrot.lane.b32.xlu2 %v3361_v5, %s3120_s22  ;;  %755 = vrot.lane.b32.xlu1 %v3340_v2, %s3124_s26 }
  0x7d   : > { %753 = vrot.lane.b32.xlu0 %v3343_v3, %s3124_s26 }
  0x84   : > { %652 = vrot.lane.b32.xlu2 %v3325_v1, %s3123_s20  ;;  %945 = vrot.lane.b32.xlu1 %v3388_v6, %s3122_s21 }
  0x85   : > { %757 = vrot.lane.b32.xlu0 %v3361_v5, %s3124_s26 }
  0x8c   : > { %947 = vrot.lane.b32.xlu2 %v3397_v7, %s3122_s21  ;;  %883 = vrot.lane.b32.xlu1 %v3388_v6, %s3121_s30 }
  0x8d   : > { %654 = vrot.lane.b32.xlu0 %v3343_v3, %s3123_s20 }
  0x94   : > { %592 = vrot.lane.b32.xlu2 %v3343_v3, %s3125_s7  ;;  %590 = vrot.lane.b32.xlu1 %v3325_v1, %s3125_s7 }
  0x95   : > { %949 = vrot.lane.b32.xlu0 %v3346_v4, %s3122_s21  ;;  %s3136_s21 = smov 120  }
  0x96   : > { %v3411_v8 = vpop.permute.xlu2 %811 }
  0x9c   : > { %885 = vrot.lane.b32.xlu2 %v3397_v7, %s3121_s30  ;;  %821 = vrot.lane.b32.xlu1 %v3388_v6, %s3120_s22 }
  0x9d   : > { %656 = vrot.lane.b32.xlu0 %v3340_v2, %s3123_s20 }
  0x9e   : > { %v3419_v9 = vpop.permute.xlu2 %813 }
  0x9f   : > { %v834_v41 = vsel %vm827_vm2, %v3411_v8, %v3419_v9 }
  0xa0   : > { %v857_v42 = vmul.f32 %v841_v36, %v834_v41  ;;  %v842_v41 = vperm.slane %v3447_v24, 1 }
  0xa4   : > { %530 = vrot.lane.b32.xlu2 %v3343_v3, %s3126_s27  ;;  %528 = vrot.lane.b32.xlu1 %v3325_v1, %s3126_s27 }
  0xa5   : > { %887 = vrot.lane.b32.xlu0 %v3346_v4, %s3121_s30 }
  0xa6   : > { %v3427_v10 = vpop.permute.xlu2 %650 }
  0xac   : > { %823 = vrot.lane.b32.xlu2 %v3397_v7, %s3120_s22  ;;  %759 = vrot.lane.b32.xlu1 %v3388_v6, %s3124_s26 }
  0xad   : > { %594 = vrot.lane.b32.xlu0 %v3340_v2, %s3125_s7 }
  0xae   : > { %v3435_v16 = vpop.permute.xlu2 %941  ;;  %v3437_v17 = vpop.permute.xlu1 %873 }
  0xaf   : > { %v3439_v18 = vpop.permute.xlu0 %935 }
  0xb4   : > { %467 = vrot.lane.b32.xlu2 %v3343_v3, %s3127_s13  ;;  %465 = vrot.lane.b32.xlu1 %v3325_v1, %s3127_s13 }
  0xb5   : > { %825 = vrot.lane.b32.xlu0 %v3346_v4, %s3120_s22  ;;  %s3135_s22 = smov 121  }
  0xb6   : > { %v3459_v29 = vpop.permute.xlu2 %877  ;;  %v876_v30 = vpop.permute.xlu1 %875 }
  0xb7   : > { %v896_v33 = vsel %vm889_vm0, %v3437_v17, %v876_v30  ;;  %v938_v34 = vpop.permute.xlu0 %937  ;;  %v895_v56 = vsel %vm889_vm0, %v876_v30, %v3459_v29  ;;  %v552_v30 = vld [vmem:[#allocation9 + $0x1] ss:$8 sm:$0xf] }
  0xb8   : > { %v958_v35 = vsel %vm951_vm1, %v3439_v18, %v938_v34  ;;  %v919_v38 = vmul.f32 %v903_v26, %v896_v33  ;;  %v920_v12 = vmul.f32 %v904_v55, %v895_v56 }
  0xb9   : > { %v981_v37 = vmul.f32 %v965_v25, %v958_v35 }
  0xbb   : > { %1087 = vmatpush.msra.mxu0 %v981_v37  ;;  %v3557_v37 = vor.u32 %v553_v31, %v552_v30  ;;  %v843_v30 = vperm.slane %v3447_v24, 2 }
  0xbc   : > { %763 = vrot.lane.b32.xlu2 %v3346_v4, %s3124_s26  ;;  %761 = vrot.lane.b32.xlu1 %v3397_v7, %s3124_s26 }
  0xbd   : > { %532 = vrot.lane.b32.xlu0 %v3340_v2, %s3126_s27  ;;  %1088 = vmatpush.msra.mxu0 %v919_v38  ;;  %v556_v38 = vperm.slane %v3557_v37, 0 }
  0xbe   : > { %v3486_v45 = vpop.permute.xlu2 %526  ;;  %v3488_v46 = vpop.permute.xlu1 %751 }
  0xbf   : > { %1089 = vmatpush.msra.mxu0 %v857_v42  ;;  %v3490_v49 = vpop.permute.xlu0 %749  ;;  %v490_v42 = vld [vmem:[#allocation9] ss:$8 sm:$0xf] }
  0xc0   : > { %v772_v50 = vsel %vm765_vm3, %v3490_v49, %v3488_v46 }
  0xc1   : > { %v795_v51 = vmul.f32 %v779_v43, %v772_v50  ;;  %v491_v43 = vld [vmem:[#allocation9] ss:$8 sm:$0xf0] }
  0xc3   : > { %1090 = vmatpush.msra.mxu0 %v795_v51 }
  0xc4   : > { %596 = vrot.lane.b32.xlu2 %v3361_v5, %s3125_s7  ;;  %658 = vrot.lane.b32.xlu1 %v3361_v5, %s3123_s20 }
  0xc5   : > { %469 = vrot.lane.b32.xlu0 %v3340_v2, %s3127_s13  ;;  %1091 = vmatpush.msra.mxu0 %v733_v52 }
  0xc6   : > { %v3512_v58 = vpop.permute.xlu2 %817  ;;  %v940_v59 = vpop.permute.xlu1 %939 }
  0xc7   : > { %v3514_v62 = vpop.permute.xlu0 %664  ;;  %v957_v63 = vsel %vm951_vm1, %v938_v34, %v940_v59  ;;  %v956_v60 = vsel %vm951_vm1, %v940_v59, %v3435_v16 }
  0xc8   : > { %v674_v0 = vsel %vm666_vm4, %v3514_v62, %v3427_v10  ;;  %v982_v11 = vmul.f32 %v966_v54, %v957_v63  ;;  %v3579_v54 = vor.u32 %v491_v43, %v490_v42  ;;  %v719_v42 = vperm.slane %v3471_v40, 2 }
  0xc9   : > { %v696_v13 = vmul.f32 %v680_v57, %v674_v0  ;;  %v967_v57 = vperm.slane %v3441_v19, 2 }
  0xca   : > { %1107 = vmatpush.msra.mxu1 %v982_v11  ;;  %v494_v56 = vperm.slane %v3579_v54, 0 }
  0xcb   : > { %1092 = vmatpush.msra.mxu0 %v696_v13  ;;  %v905_v13 = vperm.slane %v3443_v20, 2 }
  0xcc   : > { %662 = vrot.lane.b32.xlu1 %v3397_v7, %s3123_s20  ;;  %1108 = vmatpush.msra.mxu1 %v920_v12  ;;  %v844_v12 = vperm.slane %v3447_v24, 3 }
  0xcd   : > { %660 = vrot.lane.b32.xlu0 %v3388_v6, %s3123_s20  ;;  %534 = vrot.lane.b32.xlu2 %v3361_v5, %s3126_s27 }
  0xce   : > { %v3532_v21 = vpop.permute.xlu2 %477  ;;  %v3534_v22 = vpop.permute.xlu1 %602 }
  0xcf   : > { %v3536_v25 = vpop.permute.xlu0 %588 }
  0xd0   : > { %v612_v26 = vsel %vm604_vm5, %v3534_v22, %v3536_v25 }
  0xd1   : > { %v634_v27 = vmul.f32 %v618_v15, %v612_v26 }
  0xd3   : > { %1093 = vmatpush.msra.mxu0 %v634_v27 }
  0xd4   : > { %600 = vrot.lane.b32.xlu1 %v3397_v7, %s3125_s7 }
  0xd5   : > { %598 = vrot.lane.b32.xlu0 %v3388_v6, %s3125_s7  ;;  %471 = vrot.lane.b32.xlu2 %v3361_v5, %s3127_s13  ;;  %s3137_s7 = smov 119  }
  0xd6   : > { %v3549_v32 = vpop.permute.xlu2 %819  ;;  %v3551_v33 = vpop.permute.xlu1 %943 }
  0xd7   : > { %v880_v34 = vpop.permute.xlu0 %879  ;;  %v955_v35 = vsel %vm951_vm1, %v3435_v16, %v3551_v33  ;;  %v831_v16 = vsel %vm827_vm2, %v3512_v58, %v3549_v32 }
  0xd8   : > { %v984_v36 = vmul.f32 %v968_v28, %v955_v35  ;;  %v894_v59 = vsel %vm889_vm0, %v3459_v29, %v880_v34  ;;  %v983_v28 = vmul.f32 %v967_v57, %v956_v60  ;;  %v860_v35 = vmul.f32 %v844_v12, %v831_v16 }
  0xd9   : > { %v780_v29 = vperm.slane %v3469_v39, 1  ;;  %v735_v57 = vmul.f32 %v719_v42, %v3343_v3  ;;  %v782_v12 = vperm.slane %v3469_v39, 3 }
  0xda   : > { %1147 = vmatpush.msra.mxu3 %v984_v36  ;;  %v921_v36 = vmul.f32 %v905_v13, %v894_v59 }
  0xdc   : > { %538 = vrot.lane.b32.xlu1 %v3397_v7, %s3126_s27 }
  0xdd   : > { %536 = vrot.lane.b32.xlu0 %v3388_v6, %s3126_s27  ;;  %473 = vrot.lane.b32.xlu2 %v3388_v6, %s3127_s13 }
  0xde   : > { %v3568_v44 = vpop.permute.xlu2 %652  ;;  %v816_v47 = vpop.permute.xlu1 %815 }
  0xdf   : > { %v833_v48 = vsel %vm827_vm2, %v3419_v9, %v816_v47  ;;  %v3573_v50 = vpop.permute.xlu0 %540  ;;  %v906_v9 = vperm.slane %v3443_v20, 3  ;;  %v832_v31 = vsel %vm827_vm2, %v816_v47, %v3512_v58  ;;  %v673_v60 = vsel %vm666_vm4, %v3427_v10, %v3568_v44 }
  0xe0   : > { %v550_v51 = vsel %vm542_vm6, %v3573_v50, %v3486_v45  ;;  %v858_v52 = vmul.f32 %v842_v41, %v833_v48  ;;  %v718_v41 = vperm.slane %v3471_v40, 1 }
  0xe1   : > { %v572_v55 = vmul.f32 %v556_v38, %v550_v51  ;;  %v859_v38 = vmul.f32 %v843_v30, %v832_v31 }
  0xe2   : > { %1109 = vmatpush.msra.mxu1 %v858_v52  ;;  %v681_v52 = vperm.slane %v3497_v53, 1 }
  0xe3   : > { %1094 = vmatpush.msra.mxu0 %v572_v55 }
  0xe5   : > { %475 = vrot.lane.b32.xlu0 %v3397_v7, %s3127_s13  ;;  %s3138_s13 = smov 7  }
  0xe6   : > { %v3590_v61 = vpop.permute.xlu2 %947  ;;  %v3592_v63 = vpop.permute.xlu1 %463 }
  0xe7   : > { %v489_v0 = vsel %vm481_vm7, %v3532_v21, %v3592_v63  ;;  %v3598_v11 = vpop.permute.xlu0 %881 }
  0xe8   : > { %v893_v15 = vsel %vm889_vm0, %v880_v34, %v3598_v11  ;;  %v510_v26 = vmul.f32 %v494_v56, %v489_v0  ;;  %v781_v34 = vperm.slane %v3469_v39, 2  ;;  %v697_v0 = vmul.f32 %v681_v52, %v673_v60 }
  0xe9   : > { %v922_v27 = vmul.f32 %v906_v9, %v893_v15  ;;  %v734_v9 = vmul.f32 %v718_v41, %v3325_v1  ;;  %v682_v15 = vperm.slane %v3497_v53, 2  ;;  %v557_v60 = vperm.slane %v3557_v37, 1 }
  0xea   : > { %1095 = vmatpush.msra.mxu0 %v510_v26 }
  0xeb   : > { %1148 = vmatpush.msra.mxu3 %v922_v27 }
  0xec   : > { %1127 = vmatpush.msrb.mxu0 %v983_v28 }
  0xed   : > { %1149 = vmatpush.msra.mxu3 %v860_v35  ;;  %v619_v35 = vperm.slane %v3522_v14, 1 }
  0xee   : > { %1128 = vmatpush.msrb.mxu0 %v921_v36  ;;  %v3620_v43 = vpop.permute.xlu2 %592  ;;  %v756_v48 = vpop.permute.xlu1 %755  ;;  %v620_v36 = vperm.slane %v3522_v14, 2 }
  0xef   : > { %v754_v58 = vpop.permute.xlu0 %753 }
  0xf0   : > { %1129 = vmatpush.msrb.mxu0 %v859_v38  ;;  %v770_v47 = vsel %vm765_vm3, %v754_v58, %v756_v48  ;;  %v771_v51 = vsel %vm765_vm3, %v3488_v46, %v754_v58  ;;  %v720_v46 = vperm.slane %v3471_v40, 3 }
  0xf1   : > { %v796_v55 = vmul.f32 %v780_v29, %v771_v51  ;;  %v797_v56 = vmul.f32 %v781_v34, %v770_v47  ;;  %v3671_v51 = vld [vmem:[#allocation6] sm:$0xff] }
  0xf2   : > { %v736_v59 = vmul.f32 %v720_v46, %v3340_v2  ;;  %v971_v2 = vperm.slane %v3441_v19, 6  ;;  %2645 = vmatmul.msk.f32.vlgmr.msra.gmra.mxu0 %vm1076_vm8, %v3671_v51 }
  0xf3   : > { %1110 = vmatpush.msra.mxu1 %v796_v55  ;;  %1130 = vmatpush.msrb.mxu0 %v797_v56 }
  0xf5   : > { %1111 = vmatpush.msra.mxu1 %v734_v9  ;;  %1131 = vmatpush.msrb.mxu0 %v735_v57 }
  0xf6   : > { %v3636_v13 = vpop.permute.xlu2 %885  ;;  %v3638_v16 = vpop.permute.xlu1 %945 }
  0xf7   : > { %1112 = vmatpush.msra.mxu1 %v697_v0  ;;  %v3640_v1 = vpop.permute.xlu0 %757  ;;  %v558_v0 = vperm.slane %v3557_v37, 2 }
  0xf8   : > { %v769_v3 = vsel %vm765_vm3, %v756_v48, %v3640_v1 }
  0xf9   : > { %v798_v10 = vmul.f32 %v782_v12, %v769_v3  ;;  %v909_v12 = vperm.slane %v3443_v20, 6 }
  0xfb   : > { %1150 = vmatpush.msra.mxu3 %v798_v10 }
  0xfd   : > { %1151 = vmatpush.msra.mxu3 %v736_v59 }
  0xfe   : > { %v3647_v26 = vpop.permute.xlu2 %530  ;;  %v3649_v27 = vpop.permute.xlu1 %883 }
  0xff   : > { %v655_v28 = vpop.permute.xlu0 %654 }
 0x100   : > { %v672_v30 = vsel %vm666_vm4, %v3568_v44, %v655_v28 }
 0x101   : > { %v698_v31 = vmul.f32 %v682_v15, %v672_v30 }
 0x103   : > { %1132 = vmatpush.msrb.mxu0 %v698_v31 }
 0x106   : > { %v591_v29 = vpop.permute.xlu1 %590  ;;  %v3665_v44 = vpop.permute.xlu2 %823 }
 0x107   : > { %v610_v38 = vsel %vm604_vm5, %v591_v29, %v3620_v43  ;;  %v611_v34 = vsel %vm604_vm5, %v3536_v25, %v591_v29  ;;  %v3663_v41 = vpop.permute.xlu0 %949  ;;  %v683_v25 = vperm.slane %v3497_v53, 3 }
 0x108   : > { %v635_v42 = vmul.f32 %v619_v35, %v611_v34  ;;  %v952_v48 = vsel %vm951_vm1, %v3590_v61, %v3663_v41  ;;  %v636_v58 = vmul.f32 %v620_v36, %v610_v38  ;;  %v621_v36 = vperm.slane %v3522_v14, 3 }
 0x109   : > { %v987_v47 = vmul.f32 %v971_v2, %v952_v48  ;;  %v969_v34 = vperm.slane %v3441_v19, 4  ;;  %v496_v48 = vperm.slane %v3579_v54, 2 }
 0x10a   : > { %1113 = vmatpush.msra.mxu1 %v635_v42  ;;  %1133 = vmatpush.msrb.mxu0 %v636_v58  ;;  %v495_v42 = vperm.slane %v3579_v54, 1  ;;  %v954_v58 = vsel %vm951_vm1, %v3551_v33, %v3638_v16  ;;  %v892_v33 = vsel %vm889_vm0, %v3598_v11, %v3649_v27 }
 0x10b   : > { %1207 = vmatpush.msra.mxu2 %v987_v47  ;;  %v847_v47 = vperm.slane %v3447_v24, 6 }
 0x10e   : > { %v822_v52 = vpop.permute.xlu1 %821  ;;  %v3681_v57 = vpop.permute.xlu2 %467 }
 0x10f   : > { %v3676_v55 = vpop.permute.xlu0 %656 }
 0x110   : > { %v671_v56 = vsel %vm666_vm4, %v655_v28, %v3676_v55 }
 0x111   : > { %v699_v9 = vmul.f32 %v683_v25, %v671_v56  ;;  %v970_v25 = vperm.slane %v3441_v19, 5  ;;  %v907_v56 = vperm.slane %v3443_v20, 4 }
 0x113   : > { %1152 = vmatpush.msra.mxu3 %v699_v9  ;;  %v845_v9 = vperm.slane %v3447_v24, 4 }
 0x116   : > { %v529_v46 = vpop.permute.xlu1 %528  ;;  %v3698_v35 = vpop.permute.xlu2 %763 }
 0x117   : > { %v548_v3 = vsel %vm542_vm6, %v529_v46, %v3647_v26  ;;  %v549_v10 = vsel %vm542_vm6, %v3486_v45, %v529_v46  ;;  %v3692_v59 = vpop.permute.xlu0 %887  ;;  %v908_v46 = vperm.slane %v3443_v20, 5 }
 0x118   : > { %v890_v15 = vsel %vm889_vm0, %v3636_v13, %v3692_v59  ;;  %v573_v28 = vmul.f32 %v557_v60, %v549_v10  ;;  %v574_v30 = vmul.f32 %v558_v0, %v548_v3  ;;  %v985_v3 = vmul.f32 %v969_v34, %v954_v58 }
 0x119   : > { %v925_v31 = vmul.f32 %v909_v12, %v890_v15  ;;  %v721_v34 = vperm.slane %v3471_v40, 4  ;;  %v784_v58 = vperm.slane %v3469_v39, 5 }
 0x11a   : > { %1114 = vmatpush.msra.mxu1 %v573_v28  ;;  %1134 = vmatpush.msrb.mxu0 %v574_v30  ;;  %v891_v28 = vsel %vm889_vm0, %v3649_v27, %v3636_v13  ;;  %v783_v30 = vperm.slane %v3469_v39, 4  ;;  %v722_v27 = vperm.slane %v3471_v40, 5 }
 0x11b   : > { %1208 = vmatpush.msra.mxu2 %v925_v31 }
 0x11e   : > { %v760_v2 = vpop.permute.xlu1 %759  ;;  %v3722_v60 = vpop.permute.xlu2 %596 }
 0x11f   : > { %v3701_v29 = vpop.permute.xlu0 %594  ;;  %v768_v13 = vsel %vm765_vm3, %v3640_v1, %v760_v2 }
 0x120   : > { %v609_v45 = vsel %vm604_vm5, %v3620_v43, %v3701_v29  ;;  %v953_v43 = vsel %vm951_vm1, %v3638_v16, %v3590_v61 }
 0x121   : > { %v637_v38 = vmul.f32 %v621_v36, %v609_v45  ;;  %v986_v31 = vmul.f32 %v970_v25, %v953_v43  ;;  %v923_v36 = vmul.f32 %v907_v56, %v892_v33  ;;  %v830_v45 = vsel %vm827_vm2, %v3549_v32, %v822_v52  ;;  %v1070_v32 = vld [vmem:[%s4243_s2] sm:$0xff] }
 0x122   : > { %v861_v1 = vmul.f32 %v845_v9, %v830_v45  ;;  %v3128_v25 = vmov 0   ;;  %v799_v43 = vmul.f32 %v783_v30, %v768_v13  ;;  %v959_v45 = vsel %vm951_vm1, %v3663_v41, %v3439_v18 }
 0x123   : > { %1153 = vmatpush.msra.mxu3 %v637_v38  ;;  %v846_v38 = vperm.slane %v3447_v24, 5  ;;  %2794 = vset.pattern.permute.xlu1 %v3128_v25  ;;  %v897_v18 = vsel %vm889_vm0, %v3692_v59, %v3437_v17  ;;  %vm2339_vm1 = vcmask 387330  }
 0x124   : > { %1073 = vperm.xlu1 %2794, %v1070_v32   ;;  %2835 = vset.pattern.permute.xlu2 %v3128_v25 }
 0x125   : > { %2846 = vset.pattern.permute.xlu0 %v3128_v25 }
 0x126   : > { %v466_v0 = vpop.permute.xlu1 %465 }
 0x127   : > { %v487_v12 = vsel %vm481_vm7, %v466_v0, %v3681_v57  ;;  %v488_v61 = vsel %vm481_vm7, %v3592_v63, %v466_v0  ;;  %v3734_v16 = vpop.permute.xlu0 %825  ;;  %v3767_v56 = vpop.permute.xlu2 %534 }
 0x128   : > { %v828_v10 = vsel %vm827_vm2, %v3665_v44, %v3734_v16  ;;  %v511_v15 = vmul.f32 %v495_v42, %v488_v61  ;;  %v512_v11 = vmul.f32 %v496_v48, %v487_v12  ;;  %v829_v42 = vsel %vm827_vm2, %v822_v52, %v3665_v44 }
 0x129   : > { %v863_v63 = vmul.f32 %v847_v47, %v828_v10  ;;  %v924_v48 = vmul.f32 %v908_v46, %v891_v28  ;;  %v785_v47 = vperm.slane %v3469_v39, 6  ;;  %v723_v44 = vperm.slane %v3471_v40, 6 }
 0x12a   : > { %1115 = vmatpush.msra.mxu1 %v511_v15  ;;  %1135 = vmatpush.msrb.mxu0 %v512_v11  ;;  %v559_v52 = vperm.slane %v3557_v37, 3  ;;  %v862_v33 = vmul.f32 %v846_v38, %v829_v42  ;;  %v737_v12 = vmul.f32 %v721_v34, %v3361_v5  ;;  %v560_v38 = vperm.slane %v3557_v37, 4 }
 0x12b   : > { %1209 = vmatpush.msra.mxu2 %v863_v63  ;;  %2647 = vmatmul.msk.f32.vlgmr.msrb.gmra.mxu0 %vm1076_vm8, %v3671_v51  ;;  %v739_v11 = vmul.f32 %v723_v44, %v3397_v7  ;;  %v608_v7 = vsel %vm604_vm5, %v3701_v29, %v3722_v60  ;;  %v835_v17 = vsel %vm827_vm2, %v3734_v16, %v3411_v8  ;;  %v686_v44 = vperm.slane %v3497_v53, 6 }
 0x12c   : > { %1167 = vmatpush.msra.mxu0 %v985_v3  ;;  %1187 = vmatpush.msrb.mxu1 %v986_v31  ;;  %v738_v3 = vmul.f32 %v722_v27, %v3388_v6  ;;  %v684_v6 = vperm.slane %v3497_v53, 4  ;;  %v498_v27 = vperm.slane %v3579_v54, 4  ;;  %vm2344_vm2 = vcmask 519555  }
 0x12d   : > { %2646 = vmatmul.msk.f32.vlgmr.msra.gmra.mxu1 %vm1076_vm8, %v3671_v51 }
 0x12e   : > { %1168 = vmatpush.msra.mxu0 %v923_v36  ;;  %1188 = vmatpush.msrb.mxu1 %v924_v48  ;;  %v762_v0 = vpop.permute.xlu1 %761  ;;  %v972_v36 = vperm.slane %v3441_v19, 7  ;;  %v910_v19 = vperm.slane %v3443_v20, 7  ;;  %v848_v48 = vperm.slane %v3447_v24, 7  ;;  %v773_v20 = vsel %vm765_vm3, %v3698_v35, %v3490_v49 }
 0x12f   : > { %v766_v61 = vsel %vm765_vm3, %v762_v0, %v3698_v35  ;;  %v767_v9 = vsel %vm765_vm3, %v760_v2, %v762_v0  ;;  %v533_v46 = vpop.permute.xlu0 %532  ;;  %v497_v2 = vperm.slane %v3579_v54, 3  ;;  %v3798_v34 = vpop.permute.xlu2 %471  ;;  %v685_v24 = vperm.slane %v3497_v53, 5 }
 0x130   : > { %1169 = vmatpush.msra.mxu0 %v861_v1  ;;  %v547_v10 = vsel %vm542_vm6, %v3647_v26, %v533_v46  ;;  %1189 = vmatpush.msrb.mxu1 %v862_v33  ;;  %v800_v5 = vmul.f32 %v784_v58, %v767_v9  ;;  %v801_v15 = vmul.f32 %v785_v47, %v766_v61  ;;  %v622_v26 = vperm.slane %v3522_v14, 4 }
 0x131   : > { %v575_v28 = vmul.f32 %v559_v52, %v547_v10  ;;  %v988_v32 = vmul.f32 %v972_v36, %v959_v45  ;;  %v786_v58 = vperm.slane %v3469_v39, 7  ;;  %v926_v47 = vmul.f32 %v910_v19, %v897_v18 }
 0x132   : > { %1170 = vmatpush.msra.mxu0 %v799_v43  ;;  %1190 = vmatpush.msrb.mxu1 %v800_v5  ;;  %v638_v41 = vmul.f32 %v622_v26, %v608_v7  ;;  %v724_v49 = vperm.slane %v3471_v40, 7  ;;  %v864_v16 = vmul.f32 %v848_v48, %v835_v17  ;;  %v687_v33 = vperm.slane %v3497_v53, 7 }
 0x133   : > { %1210 = vmatpush.msra.mxu2 %v801_v15  ;;  %1154 = vmatpush.msra.mxu3 %v575_v28  ;;  %v802_v25 = vmul.f32 %v786_v58, %v773_v20  ;;  %v625_v61 = vperm.slane %v3522_v14, 7 }
 0x134   : > { %1171 = vmatpush.msra.mxu0 %v737_v12  ;;  %1191 = vmatpush.msrb.mxu1 %v738_v3  ;;  %v740_v0 = vmul.f32 %v724_v49, %v3346_v4  ;;  %v624_v3 = vperm.slane %v3522_v14, 6 }
 0x135   : > { %1211 = vmatpush.msra.mxu2 %v739_v11 }
 0x136   : > { %v659_v30 = vpop.permute.xlu1 %658 }
 0x137   : > { %v670_v63 = vsel %vm666_vm4, %v3676_v55, %v659_v30  ;;  %v470_v31 = vpop.permute.xlu0 %469  ;;  %v546_v55 = vsel %vm542_vm6, %v533_v46, %v3767_v56  ;;  %v623_v46 = vperm.slane %v3522_v14, 5  ;;  %v563_v14 = vperm.slane %v3557_v37, 7 }
 0x138   : > { %v700_v42 = vmul.f32 %v684_v6, %v670_v63  ;;  %v486_v29 = vsel %vm481_vm7, %v3681_v57, %v470_v31  ;;  %v485_v57 = vsel %vm481_vm7, %v470_v31, %v3798_v34  ;;  %v576_v59 = vmul.f32 %v560_v38, %v546_v55  ;;  %v474_v6 = vpop.permute.xlu2 %473 }
 0x139   : > { %v513_v13 = vmul.f32 %v497_v2, %v486_v29  ;;  %v514_v35 = vmul.f32 %v498_v27, %v485_v57  ;;  %v561_v2 = vperm.slane %v3557_v37, 5  ;;  %v484_v63 = vsel %vm481_vm7, %v3798_v34, %v474_v6 }
 0x13a   : > { %1172 = vmatpush.msra.mxu0 %v700_v42  ;;  %v500_v42 = vperm.slane %v3579_v54, 6  ;;  %v501_v29 = vperm.slane %v3579_v54, 7 }
 0x13b   : > { %1155 = vmatpush.msra.mxu3 %v513_v13 }
 0x13c   : > { %2648 = vmatmul.msk.f32.vlgmr.msra.gmra.mxu3 %vm1076_vm8, %v3671_v51  ;;  %1173 = vmatpush.msra.mxu0 %v638_v41 }
 0x13d   : > { %1227 = vmatpush.msrb.mxu3 %v988_v32 }
 0x13e   : > { %v663_v1 = vpop.permute.xlu1 %662  ;;  %1174 = vmatpush.msra.mxu0 %v576_v59 }
 0x13f   : > { %1228 = vmatpush.msrb.mxu3 %v926_v47  ;;  %v661_v8 = vpop.permute.xlu0 %660  ;;  %v667_v12 = vsel %vm666_vm4, %v663_v1, %v3514_v62 }
 0x140   : > { %v668_v52 = vsel %vm666_vm4, %v661_v8, %v663_v1  ;;  %v669_v39 = vsel %vm666_vm4, %v659_v30, %v661_v8  ;;  %1175 = vmatpush.msra.mxu0 %v514_v35  ;;  %v703_v9 = vmul.f32 %v687_v33, %v667_v12 }
 0x141   : > { %1229 = vmatpush.msrb.mxu3 %v864_v16  ;;  %2649 = vmatmul.msk.f32.vlgmr.msra.gmra.mxu0 %vm1076_vm8, %v3671_v51  ;;  %v701_v43 = vmul.f32 %v685_v24, %v669_v39  ;;  %v702_v40 = vmul.f32 %v686_v44, %v668_v52 }
 0x143   : > { %1230 = vmatpush.msrb.mxu3 %v802_v25  ;;  %1192 = vmatpush.msrb.mxu1 %v701_v43 }
 0x144   : > { %1212 = vmatpush.msra.mxu2 %v702_v40 }
 0x145   : > { %1231 = vmatpush.msrb.mxu3 %v740_v0 }
 0x146   : > { %v601_v10 = vpop.permute.xlu1 %600 }
 0x147   : > { %1232 = vmatpush.msrb.mxu3 %v703_v9  ;;  %v605_v4 = vsel %vm604_vm5, %v601_v10, %v3534_v22  ;;  %v599_v53 = vpop.permute.xlu0 %598  ;;  %v562_v22 = vperm.slane %v3557_v37, 6 }
 0x148   : > { %v606_v62 = vsel %vm604_vm5, %v599_v53, %v601_v10  ;;  %v607_v5 = vsel %vm604_vm5, %v3722_v60, %v599_v53  ;;  %v641_v15 = vmul.f32 %v625_v61, %v605_v4  ;;  %v499_v60 = vperm.slane %v3579_v54, 5  ;;  %v1438_v10 = vld [vmem:[#allocation11 + $0x3f0] sm:$0xff]  ;;  %v1404_v4 = vld [vmem:[#allocation11 + $0x2e0] sm:$0xff] }
 0x149   : > { %v639_v11 = vmul.f32 %v623_v46, %v607_v5  ;;  %v640_v28 = vmul.f32 %v624_v3, %v606_v62  ;;  %v1406_v3 = vld [vmem:[#allocation11 + $0x2f0] sm:$0xff]  ;;  %v1436_v53 = vld [vmem:[#allocation11 + $0x3e0] sm:$0xff]  ;;  %vm2359_vm5 = vcmask 916230  }
 0x14a   : > { %1233 = vmatpush.msrb.mxu3 %v641_v15  ;;  %v1402_v5 = vld [vmem:[#allocation11 + $0x2d0] sm:$0xff] }
 0x14b   : > { %1193 = vmatpush.msrb.mxu1 %v639_v11  ;;  %1213 = vmatpush.msra.mxu2 %v640_v28  ;;  %v1434_v15 = vld [vmem:[#allocation11 + $0x3d0] sm:$0xff] }
 0x14e   : > { %v539_v26 = vpop.permute.xlu1 %538 }
 0x14f   : > { %v543_v30 = vsel %vm542_vm6, %v539_v26, %v3573_v50  ;;  %v537_v7 = vpop.permute.xlu0 %536  ;;  %v515_v50 = vmul.f32 %v499_v60, %v484_v63  ;;  %v1342_v60 = vld [vmem:[#allocation11 + $0xf0] sm:$0xff] }
 0x150   : > { %v544_v31 = vsel %vm542_vm6, %v537_v7, %v539_v26  ;;  %v545_v36 = vsel %vm542_vm6, %v3767_v56, %v537_v7  ;;  %v579_v37 = vmul.f32 %v563_v14, %v543_v30  ;;  %v1400_v14 = vld [vmem:[#allocation11 + $0x2c0] sm:$0xff]  ;;  %v1398_v30 = vld [vmem:[#allocation11 + $0x2b0] sm:$0xff]  ;;  %1568 = vmatpush.msrb.mxu0 %v1342_v60  ;;  %vm2364_vm6 = vcmask 1048455  }
 0x151   : > { %v577_v45 = vmul.f32 %v561_v2, %v545_v36  ;;  %v578_v38 = vmul.f32 %v562_v22, %v544_v31  ;;  %v1430_v7 = vld [vmem:[#allocation11 + $0x3b0] sm:$0xff]  ;;  %v1396_v36 = vld [vmem:[#allocation11 + $0x2a0] sm:$0xff] }
 0x152   : > { %1234 = vmatpush.msrb.mxu3 %v579_v37  ;;  %v1374_v63 = vld [vmem:[#allocation11 + $0x1f0] sm:$0xff]  ;;  %v1428_v37 = vld [vmem:[#allocation11 + $0x3a0] sm:$0xff] }
 0x153   : > { %1194 = vmatpush.msrb.mxu1 %v577_v45  ;;  %1214 = vmatpush.msra.mxu2 %v578_v38  ;;  %v1340_v45 = vld [vmem:[#allocation11 + $0xe0] sm:$0xff] }
 0x154   : > { %v1372_v38 = vld [vmem:[#allocation11 + $0x1e0] sm:$0xff]  ;;  %1569 = vmatpush.msrb.mxu0 %v1340_v45 }
 0x155   : > { %1195 = vmatpush.msrb.mxu1 %v515_v50  ;;  %v1338_v50 = vld [vmem:[#allocation11 + $0xd0] sm:$0xff] }
 0x156   : > { %2650 = vmatmul.msk.f32.vlgmr.msrb.gmra.mxu1 %vm1076_vm8, %v3671_v51  ;;  %1570 = vmatpush.msrb.mxu0 %v1338_v50  ;;  %v1322_v50 = vld [vmem:[#allocation11 + $0x50] sm:$0xff] }
 0x157   : > { %v476_v34 = vpop.permute.xlu0 %475  ;;  %1588 = vmatpush.msra.mxu1 %v1374_v63 }
 0x158   : > { %v482_v56 = vsel %vm481_vm7, %v476_v34, %v3532_v21  ;;  %v483_v55 = vsel %vm481_vm7, %v474_v6, %v476_v34  ;;  %v1432_v6 = vld [vmem:[#allocation11 + $0x3c0] sm:$0xff]  ;;  %v1370_v34 = vld [vmem:[#allocation11 + $0x1d0] sm:$0xff]  ;;  %vm2414_vm7 = vcmask 261120  }
 0x159   : > { %v516_v13 = vmul.f32 %v500_v42, %v483_v55  ;;  %v517_v19 = vmul.f32 %v501_v29, %v482_v56  ;;  %v1394_v42 = vld [vmem:[#allocation11 + $0x290] sm:$0xff]  ;;  %v1336_v56 = vld [vmem:[#allocation11 + $0xc0] sm:$0xff]  ;;  %1589 = vmatpush.msra.mxu1 %v1372_v38 }
 0x15a   : > { %v1426_v29 = vld [vmem:[#allocation11 + $0x390] sm:$0xff]  ;;  %v1392_v55 = vld [vmem:[#allocation11 + $0x280] sm:$0xff]  ;;  %1571 = vmatpush.msrb.mxu0 %v1336_v56 }
 0x15b   : > { %1215 = vmatpush.msra.mxu2 %v516_v13  ;;  %1235 = vmatpush.msrb.mxu3 %v517_v19  ;;  %v1424_v13 = vld [vmem:[#allocation11 + $0x380] sm:$0xff] }
 0x15c   : > { %2651 = vmatmul.msk.f32.vlgmr.msra.gmra.mxu2 %vm1076_vm8, %v3671_v51  ;;  %2652 = vmatmul.msk.f32.vlgmr.msrb.gmra.mxu3 %vm1076_vm8, %v3671_v51  ;;  %v1368_v19 = vld [vmem:[#allocation11 + $0x1c0] sm:$0xff] }
 0x15d   : > { %1608 = vmatpush.msrb.mxu2 %v1406_v3  ;;  %1628 = vmatpush.msra.mxu3 %v1438_v10  ;;  %v1416_v3 = vld [vmem:[#allocation11 + $0x340] sm:$0xff] }
 0x15e   : > { %1590 = vmatpush.msra.mxu1 %v1370_v34  ;;  %v1360_v10 = vld [vmem:[#allocation11 + $0x180] sm:$0xff] }
 0x15f   : > { %1609 = vmatpush.msrb.mxu2 %v1404_v4  ;;  %1629 = vmatpush.msra.mxu3 %v1436_v53  ;;  %v1326_v4 = vld [vmem:[#allocation11 + $0x70] sm:$0xff]  ;;  %v1564_v34 = vld [vmem:[#allocation11 + $0x7e0] sm:$0xff] }
 0x160   : > { %1591 = vmatpush.msra.mxu1 %v1368_v19  ;;  %v1352_v56 = vld [vmem:[#allocation11 + $0x140] sm:$0xff]  ;;  %v1562_v19 = vld [vmem:[#allocation11 + $0x7d0] sm:$0xff] }
 0x161   : > { %1610 = vmatpush.msrb.mxu2 %v1402_v5  ;;  %1630 = vmatpush.msra.mxu3 %v1434_v15  ;;  %v1382_v15 = vld [vmem:[#allocation11 + $0x230] sm:$0xff] }
 0x163   : > { %1611 = vmatpush.msrb.mxu2 %v1400_v14  ;;  %1631 = vmatpush.msra.mxu3 %v1432_v6  ;;  %v1358_v6 = vld [vmem:[#allocation11 + $0x170] sm:$0xff] }
 0x165   : > { %1612 = vmatpush.msrb.mxu2 %v1398_v30  ;;  %1632 = vmatpush.msra.mxu3 %v1430_v7  ;;  %v1380_v7 = vld [vmem:[#allocation11 + $0x220] sm:$0xff] }
 0x167   : > { %1613 = vmatpush.msrb.mxu2 %v1396_v36  ;;  %1633 = vmatpush.msra.mxu3 %v1428_v37  ;;  %v1324_v36 = vld [vmem:[#allocation11 + $0x60] sm:$0xff] }
 0x169   : > { %1614 = vmatpush.msrb.mxu2 %v1394_v42  ;;  %1634 = vmatpush.msra.mxu3 %v1426_v29  ;;  %v1532_v42 = vld [vmem:[#allocation11 + $0x6e0] sm:$0xff] }
 0x16a   : > { %v1320_v29 = vld [vmem:[#allocation11 + $0x40] sm:$0xff] }
 0x16b   : > { %1615 = vmatpush.msrb.mxu2 %v1392_v55  ;;  %1635 = vmatpush.msra.mxu3 %v1424_v13  ;;  %v1530_v55 = vld [vmem:[#allocation11 + $0x6d0] sm:$0xff] }
 0x16c   : > { %v1318_v13 = vld [vmem:[#allocation11 + $0x30] sm:$0xff] }
 0x16f   : > { %v1097_v54 = vpop.f32.mrf.mxu0 }
 0x196   : > { %v1074_v41 = vpop.permute.xlu1 %1073 }
 0x197   : > { %v3880_v27 = vadd.f32 %v1097_v54, %v1074_v41  ;;  %v1334_v54 = vld [vmem:[#allocation11 + $0xb0] sm:$0xff] }
 0x198   : > { %1572 = vmatpush.msrb.mxu0 %v1334_v54  ;;  %v1350_v54 = vld [vmem:[#allocation11 + $0x130] sm:$0xff] }
 0x199   : > { %v1240_v20 = vmax.f32 %v3880_v27, 0.0 }
 0x1a8   : > { %v1137_v18 = vpop.f32.mrf.mxu0 }
 0x1a9   : > { %v1138_v57 = vadd.f32 %v1137_v18, %v1074_v41  ;;  %v1390_v18 = vld [vmem:[#allocation11 + $0x270] sm:$0xff] }
 0x1aa   : > { %v1117_v44 = vpop.f32.mrf.mxu1  ;;  %1616 = vmatpush.msrb.mxu2 %v1390_v18  ;;  %v1528_v18 = vld [vmem:[#allocation11 + $0x6c0] sm:$0xff] }
 0x1ab   : > { %v1242_v59 = vmax.f32 %v1138_v57, 0.0  ;;  %v3892_v49 = vadd.f32 %v1117_v44, %v1074_v41 }
 0x1ad   : > { %v1241_v8 = vmax.f32 %v3892_v49, 0.0 }
 0x1be   : > { %v1177_v21 = vpop.f32.mrf.mxu0 }
 0x1bf   : > { %v1157_v32 = vpop.f32.mrf.mxu3  ;;  %v3882_v48 = vadd.f32 %v1177_v21, %v1074_v41  ;;  %v1366_v21 = vld [vmem:[#allocation11 + $0x1b0] sm:$0xff] }
 0x1c0   : > { %v1158_v17 = vadd.f32 %v1157_v32, %v1074_v41  ;;  %v1332_v32 = vld [vmem:[#allocation11 + $0xa0] sm:$0xff]  ;;  %1592 = vmatpush.msra.mxu1 %v1366_v21 }
 0x1c1   : > { %v1244_v58 = vmax.f32 %v3882_v48, 0.0  ;;  %1573 = vmatpush.msrb.mxu0 %v1332_v32  ;;  %v1408_v48 = vld [vmem:[#allocation11 + $0x300] sm:$0xff]  ;;  %v1526_v32 = vld [vmem:[#allocation11 + $0x6b0] sm:$0xff] }
 0x1c2   : > { %v1243_v47 = vmax.f32 %v1158_v17, 0.0  ;;  %v1388_v17 = vld [vmem:[#allocation11 + $0x260] sm:$0xff] }
 0x1c3   : > { %v2800_v51 = vpack.i.bf16 %v1240_v20, %v1244_v58  ;;  %1617 = vmatpush.msrb.mxu2 %v1388_v17  ;;  %v1348_v21 = vld [vmem:[#allocation11 + $0x120] sm:$0xff]  ;;  %v1314_v17 = vld [vmem:[#allocation11 + $0x10] sm:$0xff] }
 0x1c4   : > { %v2795_v24 = vpack.i.bf16 %v1243_v47, %v1242_v59 }
 0x1c5   : > { %2801 = vrot.lane.b32.xlu0 %v2800_v51, %s3124_s26  ;;  %v1330_v51 = vld [vmem:[#allocation11 + $0x90] sm:$0xff] }
 0x1c6   : > { %2796 = vrot.lane.b32.xlu2 %v2795_v24, %s3124_s26  ;;  %1574 = vmatpush.msrb.mxu0 %v1330_v51  ;;  %v1524_v51 = vld [vmem:[#allocation11 + $0x6a0] sm:$0xff] }
 0x1d3   : > { %v1197_v35 = vpop.f32.mrf.mxu1 }
 0x1d4   : > { %v3894_v1 = vadd.f32 %v1197_v35, %v1074_v41  ;;  %v1386_v35 = vld [vmem:[#allocation11 + $0x250] sm:$0xff] }
 0x1d5   : > { %1618 = vmatpush.msrb.mxu2 %v1386_v35  ;;  %v1344_v35 = vld [vmem:[#allocation11 + $0x100] sm:$0xff] }
 0x1d6   : > { %v1245_v16 = vmax.f32 %v3894_v1, 0.0  ;;  %v1376_v1 = vld [vmem:[#allocation11 + $0x200] sm:$0xff] }
 0x1d8   : > { %v2805_v52 = vpack.i.bf16 %v1245_v16, %v1241_v8 }
 0x1da   : > { %2806 = vrot.lane.b32.xlu1 %v2805_v52, %s3124_s26  ;;  %v1418_v52 = vld [vmem:[#allocation11 + $0x350] sm:$0xff] }
 0x1df   : > { %v1217_v39 = vpop.f32.mrf.mxu2  ;;  %v1237_v25 = vpop.f32.mrf.mxu3 }
 0x1e0   : > { %v3903_v43 = vadd.f32 %v1217_v39, %v1074_v41  ;;  %v3905_v40 = vadd.f32 %v1237_v25, %v1074_v41  ;;  %v1422_v41 = vld [vmem:[#allocation11 + $0x370] sm:$0xff]  ;;  %v1328_v25 = vld [vmem:[#allocation11 + $0x80] sm:$0xff] }
 0x1e1   : > { %1636 = vmatpush.msra.mxu3 %v1422_v41  ;;  %v1362_v39 = vld [vmem:[#allocation11 + $0x190] sm:$0xff]  ;;  %1575 = vmatpush.msrb.mxu0 %v1328_v25  ;;  %v1316_v41 = vld [vmem:[#allocation11 + $0x20] sm:$0xff] }
 0x1e2   : > { %v1246_v0 = vmax.f32 %v3903_v43, 0.0  ;;  %v1247_v33 = vmax.f32 %v3905_v40, 0.0  ;;  %v1554_v25 = vld [vmem:[#allocation11 + $0x790] sm:$0xff] }
 0x1e3   : > { %1576 = vmatpush.msrb.mxu0 %v1326_v4  ;;  %v1550_v4 = vld [vmem:[#allocation11 + $0x770] sm:$0xff] }
 0x1e4   : > { %v2810_v12 = vpack.i.bf16 %v1247_v33, %v1246_v0 }
 0x1e5   : > { %1577 = vmatpush.msrb.mxu0 %v1324_v36  ;;  %v1510_v36 = vld [vmem:[#allocation11 + $0x630] sm:$0xff] }
 0x1e6   : > { %2811 = vrot.lane.b32.xlu2 %v2810_v12, %s3124_s26 }
 0x1e7   : > { %1578 = vmatpush.msrb.mxu0 %v1322_v50  ;;  %v1506_v50 = vld [vmem:[#allocation11 + $0x610] sm:$0xff] }
 0x1e9   : > { %1579 = vmatpush.msrb.mxu0 %v1320_v29  ;;  %v1454_v29 = vld [vmem:[#allocation11 + $0x470] sm:$0xff] }
 0x1eb   : > { %1580 = vmatpush.msrb.mxu0 %v1318_v13  ;;  %v1450_v13 = vld [vmem:[#allocation11 + $0x450] sm:$0xff] }
 0x1ed   : > { %1581 = vmatpush.msrb.mxu0 %v1316_v41  ;;  %v1446_v41 = vld [vmem:[#allocation11 + $0x430] sm:$0xff] }
 0x1ef   : > { %1582 = vmatpush.msrb.mxu0 %v1314_v17  ;;  %v1442_v17 = vld [vmem:[#allocation11 + $0x410] sm:$0xff] }
 0x220   : > { %v3914_v61 = vpop.permute.xlu2 %2796 }
 0x221   : > { %v2799_v9 = vunpack.i.h.bf16 %v3914_v61  ;;  %v2798_v46 = vunpack.i.l.bf16 %v3914_v61 }
 0x223   : > { %v1268_v11 = vsel %vm765_vm3, %v2798_v46, %v2799_v9 }
 0x224   : > { %v3929_v22 = vmax.f32 %v1242_v59, %v1268_v11  ;;  %v1420_v59 = vld [vmem:[#allocation11 + $0x360] sm:$0xff]  ;;  %v1414_v11 = vld [vmem:[#allocation11 + $0x330] sm:$0xff] }
 0x225   : > { %1637 = vmatpush.msra.mxu3 %v1420_v59  ;;  %v1558_v59 = vld [vmem:[#allocation11 + $0x7b0] sm:$0xff] }
 0x227   : > { %1638 = vmatpush.msra.mxu3 %v1418_v52  ;;  %v1522_v52 = vld [vmem:[#allocation11 + $0x690] sm:$0xff] }
 0x229   : > { %1639 = vmatpush.msra.mxu3 %v1416_v3  ;;  %v1552_v3 = vld [vmem:[#allocation11 + $0x780] sm:$0xff] }
 0x22b   : > { %1640 = vmatpush.msra.mxu3 %v1414_v11  ;;  %v1546_v11 = vld [vmem:[#allocation11 + $0x750] sm:$0xff] }
 0x237   : > { %v3918_v62 = vpop.permute.xlu0 %2801 }
 0x238   : > { %v2803_v28 = vunpack.i.l.bf16 %v3918_v62  ;;  %v2804_v12 = vunpack.i.h.bf16 %v3918_v62 }
 0x23a   : > { %v1267_v2 = vsel %vm765_vm3, %v2799_v9, %v2803_v28  ;;  %v1384_v9 = vld [vmem:[#allocation11 + $0x240] sm:$0xff] }
 0x23b   : > { %v3931_v26 = vmax.f32 %v1243_v47, %v1267_v2  ;;  %v1364_v47 = vld [vmem:[#allocation11 + $0x1a0] sm:$0xff]  ;;  %1619 = vmatpush.msrb.mxu2 %v1384_v9 }
 0x23c   : > { %1593 = vmatpush.msra.mxu1 %v1364_v47  ;;  %v1346_v47 = vld [vmem:[#allocation11 + $0x110] sm:$0xff]  ;;  %v1520_v9 = vld [vmem:[#allocation11 + $0x680] sm:$0xff] }
 0x23d   : > { %v2820_v31 = vpack.i.bf16 %v3931_v26, %v3929_v22  ;;  %1620 = vmatpush.msrb.mxu2 %v1382_v15  ;;  %v1514_v15 = vld [vmem:[#allocation11 + $0x650] sm:$0xff] }
 0x23e   : > { %1594 = vmatpush.msra.mxu1 %v1362_v39  ;;  %v1470_v39 = vld [vmem:[#allocation11 + $0x4f0] sm:$0xff] }
 0x23f   : > { %2821 = vrot.lane.b32.xlu0 %v2820_v31, %s3121_s30  ;;  %v1412_v31 = vld [vmem:[#allocation11 + $0x320] sm:$0xff]  ;;  %1621 = vmatpush.msrb.mxu2 %v1380_v7  ;;  %v1466_v7 = vld [vmem:[#allocation11 + $0x4d0] sm:$0xff] }
 0x240   : > { %v2812_v57 = vpop.permute.xlu2 %2811  ;;  %1595 = vmatpush.msra.mxu1 %v1360_v10  ;;  %1641 = vmatpush.msra.mxu3 %v1412_v31  ;;  %v1518_v10 = vld [vmem:[#allocation11 + $0x670] sm:$0xff] }
 0x241   : > { %v2814_v24 = vunpack.i.h.bf16 %v2812_v57  ;;  %v2813_v44 = vunpack.i.l.bf16 %v2812_v57  ;;  %v1560_v57 = vld [vmem:[#allocation11 + $0x7c0] sm:$0xff]  ;;  %v1498_v31 = vld [vmem:[#allocation11 + $0x5d0] sm:$0xff] }
 0x242   : > { %1596 = vmatpush.msra.mxu1 %v1358_v6  ;;  %v1500_v6 = vld [vmem:[#allocation11 + $0x5e0] sm:$0xff] }
 0x243   : > { %v1264_v53 = vsel %vm765_vm3, %v2813_v44, %v2814_v24  ;;  %v1271_v5 = vsel %vm765_vm3, %v2814_v24, %v2804_v12  ;;  %v1312_v24 = vld [vmem:[#allocation11] sm:$0xff] }
 0x244   : > { %v3943_v60 = vmax.f32 %v1247_v33, %v1271_v5  ;;  %v3947_v63 = vmax.f32 %v1246_v0, %v1264_v53  ;;  %v1378_v0 = vld [vmem:[#allocation11 + $0x210] sm:$0xff]  ;;  %v1356_v33 = vld [vmem:[#allocation11 + $0x160] sm:$0xff]  ;;  %1583 = vmatpush.msrb.mxu0 %v1312_v24 }
 0x245   : > { %1622 = vmatpush.msrb.mxu2 %v1378_v0  ;;  %1597 = vmatpush.msra.mxu1 %v1356_v33  ;;  %v1516_v53 = vld [vmem:[#allocation11 + $0x660] sm:$0xff]  ;;  %v1462_v33 = vld [vmem:[#allocation11 + $0x4b0] sm:$0xff] }
 0x246   : > { %1648 = vmatpush.msra.mxu0 %v1470_v39  ;;  %v1548_v5 = vld [vmem:[#allocation11 + $0x760] sm:$0xff] }
 0x247   : > { %1623 = vmatpush.msrb.mxu2 %v1376_v1  ;;  %v1540_v0 = vld [vmem:[#allocation11 + $0x720] sm:$0xff] }
 0x248   : > { %v1504_v1 = vld [vmem:[#allocation11 + $0x600] sm:$0xff] }
 0x24c   : > { %v2807_v14 = vpop.permute.xlu1 %2806 }
 0x24d   : > { %v2809_v2 = vunpack.i.h.bf16 %v2807_v14  ;;  %v2808_v30 = vunpack.i.l.bf16 %v2807_v14  ;;  %v1468_v14 = vld [vmem:[#allocation11 + $0x4e0] sm:$0xff] }
 0x24e   : > { %1649 = vmatpush.msra.mxu0 %v1468_v14  ;;  %v1401_v14 = vld [vmem:[#allocation11 + $0x2c8] sm:$0xff] }
 0x24f   : > { %v1265_v37 = vsel %vm765_vm3, %v2809_v2, %v2813_v44  ;;  %v1266_v45 = vsel %vm765_vm3, %v2803_v28, %v2809_v2  ;;  %v1269_v40 = vsel %vm765_vm3, %v2808_v30, %v2798_v46  ;;  %v1270_v43 = vsel %vm765_vm3, %v2804_v12, %v2808_v30  ;;  %v1410_v28 = vld [vmem:[#allocation11 + $0x310] sm:$0xff]  ;;  %v1556_v44 = vld [vmem:[#allocation11 + $0x7a0] sm:$0xff] }
 0x250   : > { %v3963_v38 = vmax.f32 %v1240_v20, %v1270_v43  ;;  %v3967_v62 = vmax.f32 %v1241_v8, %v1269_v40  ;;  %v3971_v61 = vmax.f32 %v1245_v16, %v1265_v37  ;;  %v3975_v46 = vmax.f32 %v1244_v58, %v1266_v45  ;;  %1642 = vmatpush.msra.mxu3 %v1410_v28  ;;  %v1534_v58 = vld [vmem:[#allocation11 + $0x6f0] sm:$0xff]  ;;  %v1512_v2 = vld [vmem:[#allocation11 + $0x640] sm:$0xff] }
 0x251   : > { %v1566_v8 = vld [vmem:[#allocation11 + $0x7f0] sm:$0xff]  ;;  %1688 = vmatpush.msra.mxu2 %v1534_v58  ;;  %v1544_v30 = vld [vmem:[#allocation11 + $0x740] sm:$0xff]  ;;  %1650 = vmatpush.msra.mxu0 %v1466_v7  ;;  %v1395_v7 = vld [vmem:[#allocation11 + $0x298] sm:$0xff] }
 0x252   : > { %v2815_v27 = vpack.i.bf16 %v3967_v62, %v3963_v38  ;;  %v2830_v20 = vpack.i.bf16 %v3971_v61, %v3943_v60  ;;  %v2825_v49 = vpack.i.bf16 %v3947_v63, %v3975_v46  ;;  %v1354_v16 = vld [vmem:[#allocation11 + $0x150] sm:$0xff]  ;;  %1643 = vmatpush.msra.mxu3 %v1408_v48  ;;  %v1464_v45 = vld [vmem:[#allocation11 + $0x4c0] sm:$0xff] }
 0x253   : > { %1598 = vmatpush.msra.mxu1 %v1354_v16  ;;  %1689 = vmatpush.msra.mxu2 %v1532_v42  ;;  %v1502_v12 = vld [vmem:[#allocation11 + $0x5f0] sm:$0xff]  ;;  %v1496_v40 = vld [vmem:[#allocation11 + $0x5c0] sm:$0xff] }
 0x254   : > { %2816 = vrot.lane.b32.xlu1 %v2815_v27, %s3121_s30  ;;  %2831 = vrot.lane.b32.xlu0 %v2830_v20, %s3121_s30  ;;  %v1542_v37 = vld [vmem:[#allocation11 + $0x730] sm:$0xff]  ;;  %v1508_v43 = vld [vmem:[#allocation11 + $0x620] sm:$0xff] }
 0x255   : > { %2826 = vrot.lane.b32.xlu2 %v2825_v49, %s3121_s30  ;;  %1708 = vmatpush.msrb.mxu3 %v1566_v8  ;;  %v1494_v28 = vld [vmem:[#allocation11 + $0x5b0] sm:$0xff]  ;;  %v1460_v20 = vld [vmem:[#allocation11 + $0x4a0] sm:$0xff] }
 0x256   : > { %1599 = vmatpush.msra.mxu1 %v1352_v56  ;;  %1690 = vmatpush.msra.mxu2 %v1530_v55  ;;  %v1538_v27 = vld [vmem:[#allocation11 + $0x710] sm:$0xff]  ;;  %v1492_v49 = vld [vmem:[#allocation11 + $0x5a0] sm:$0xff] }
 0x257   : > { %1709 = vmatpush.msrb.mxu3 %v1564_v34  ;;  %1651 = vmatpush.msra.mxu0 %v1464_v45  ;;  %v1536_v48 = vld [vmem:[#allocation11 + $0x700] sm:$0xff]  ;;  %v1458_v58 = vld [vmem:[#allocation11 + $0x490] sm:$0xff]  ;;  %v1391_v45 = vld [vmem:[#allocation11 + $0x278] sm:$0xff] }
 0x258   : > { %1600 = vmatpush.msra.mxu1 %v1350_v54  ;;  %1691 = vmatpush.msra.mxu2 %v1528_v18  ;;  %v1490_v8 = vld [vmem:[#allocation11 + $0x590] sm:$0xff]  ;;  %v1456_v16 = vld [vmem:[#allocation11 + $0x480] sm:$0xff] }
 0x259   : > { %1710 = vmatpush.msrb.mxu3 %v1562_v19  ;;  %1652 = vmatpush.msra.mxu0 %v1462_v33  ;;  %v1488_v42 = vld [vmem:[#allocation11 + $0x580] sm:$0xff]  ;;  %v1486_v34 = vld [vmem:[#allocation11 + $0x570] sm:$0xff] }
 0x25a   : > { %1601 = vmatpush.msra.mxu1 %v1348_v21  ;;  %1692 = vmatpush.msra.mxu2 %v1526_v32  ;;  %v1452_v56 = vld [vmem:[#allocation11 + $0x460] sm:$0xff]  ;;  %v1482_v19 = vld [vmem:[#allocation11 + $0x550] sm:$0xff] }
 0x25b   : > { %1711 = vmatpush.msrb.mxu3 %v1560_v57  ;;  %1653 = vmatpush.msra.mxu0 %v1460_v20  ;;  %v1484_v55 = vld [vmem:[#allocation11 + $0x560] sm:$0xff]  ;;  %v1478_v57 = vld [vmem:[#allocation11 + $0x530] sm:$0xff]  ;;  %v1389_v20 = vld [vmem:[#allocation11 + $0x268] sm:$0xff] }
 0x25c   : > { %1602 = vmatpush.msra.mxu1 %v1346_v47  ;;  %1693 = vmatpush.msra.mxu2 %v1524_v51  ;;  %v1448_v54 = vld [vmem:[#allocation11 + $0x440] sm:$0xff] }
 0x25d   : > { %1712 = vmatpush.msrb.mxu3 %v1558_v59  ;;  %1654 = vmatpush.msra.mxu0 %v1458_v58  ;;  %v1480_v18 = vld [vmem:[#allocation11 + $0x540] sm:$0xff]  ;;  %v1474_v59 = vld [vmem:[#allocation11 + $0x510] sm:$0xff] }
 0x25e   : > { %1603 = vmatpush.msra.mxu1 %v1344_v35  ;;  %1694 = vmatpush.msra.mxu2 %v1522_v52  ;;  %v1444_v21 = vld [vmem:[#allocation11 + $0x420] sm:$0xff] }
 0x25f   : > { %1713 = vmatpush.msrb.mxu3 %v1556_v44  ;;  %1655 = vmatpush.msra.mxu0 %v1456_v16  ;;  %v1476_v32 = vld [vmem:[#allocation11 + $0x520] sm:$0xff] }
 0x260   : > { %1668 = vmatpush.msrb.mxu1 %v1502_v12  ;;  %1695 = vmatpush.msra.mxu2 %v1520_v9  ;;  %v1440_v47 = vld [vmem:[#allocation11 + $0x400] sm:$0xff] }
 0x261   : > { %1714 = vmatpush.msrb.mxu3 %v1554_v25  ;;  %1656 = vmatpush.msra.mxu0 %v1454_v29  ;;  %v1472_v51 = vld [vmem:[#allocation11 + $0x500] sm:$0xff] }
 0x262   : > { %1696 = vmatpush.msra.mxu2 %v1518_v10  ;;  %1669 = vmatpush.msrb.mxu1 %v1500_v6  ;;  %v1407_v10 = vld [vmem:[#allocation11 + $0x2f8] sm:$0xff] }
 0x263   : > { %1715 = vmatpush.msrb.mxu3 %v1552_v3  ;;  %1657 = vmatpush.msra.mxu0 %v1452_v56  ;;  %v1431_v6 = vld [vmem:[#allocation11 + $0x3b8] sm:$0xff] }
 0x264   : > { %1697 = vmatpush.msra.mxu2 %v1516_v53  ;;  %1670 = vmatpush.msrb.mxu1 %v1498_v31  ;;  %v1405_v53 = vld [vmem:[#allocation11 + $0x2e8] sm:$0xff]  ;;  %v1427_v31 = vld [vmem:[#allocation11 + $0x398] sm:$0xff] }
 0x265   : > { %1716 = vmatpush.msrb.mxu3 %v1550_v4  ;;  %1658 = vmatpush.msra.mxu0 %v1450_v13  ;;  %v1439_v4 = vld [vmem:[#allocation11 + $0x3f8] sm:$0xff] }
 0x266   : > { %1698 = vmatpush.msra.mxu2 %v1514_v15  ;;  %1671 = vmatpush.msrb.mxu1 %v1496_v40  ;;  %v1403_v15 = vld [vmem:[#allocation11 + $0x2d8] sm:$0xff] }
 0x267   : > { %1717 = vmatpush.msrb.mxu3 %v1548_v5  ;;  %1659 = vmatpush.msra.mxu0 %v1448_v54  ;;  %v1437_v5 = vld [vmem:[#allocation11 + $0x3e8] sm:$0xff]  ;;  %v1423_v40 = vld [vmem:[#allocation11 + $0x378] sm:$0xff] }
 0x268   : > { %1699 = vmatpush.msra.mxu2 %v1512_v2  ;;  %1672 = vmatpush.msrb.mxu1 %v1494_v28  ;;  %v1397_v2 = vld [vmem:[#allocation11 + $0x2a8] sm:$0xff]  ;;  %v1343_v56 = vld [vmem:[#allocation11 + $0xf8] sm:$0xff] }
 0x269   : > { %1718 = vmatpush.msrb.mxu3 %v1546_v11  ;;  %1660 = vmatpush.msra.mxu0 %v1446_v41  ;;  %v1435_v11 = vld [vmem:[#allocation11 + $0x3d8] sm:$0xff]  ;;  %v1417_v54 = vld [vmem:[#allocation11 + $0x348] sm:$0xff] }
 0x26a   : > { %1700 = vmatpush.msra.mxu2 %v1510_v36  ;;  %1673 = vmatpush.msrb.mxu1 %v1492_v49  ;;  %v1393_v36 = vld [vmem:[#allocation11 + $0x288] sm:$0xff]  ;;  %v1371_v41 = vld [vmem:[#allocation11 + $0x1d8] sm:$0xff] }
 0x26b   : > { %1719 = vmatpush.msrb.mxu3 %v1544_v30  ;;  %1661 = vmatpush.msra.mxu0 %v1444_v21  ;;  %v1429_v30 = vld [vmem:[#allocation11 + $0x3a8] sm:$0xff]  ;;  %v1415_v21 = vld [vmem:[#allocation11 + $0x338] sm:$0xff] }
 0x26c   : > { %1701 = vmatpush.msra.mxu2 %v1508_v43  ;;  %1674 = vmatpush.msrb.mxu1 %v1490_v8  ;;  %v1421_v49 = vld [vmem:[#allocation11 + $0x368] sm:$0xff] }
 0x26d   : > { %1720 = vmatpush.msrb.mxu3 %v1542_v37  ;;  %1662 = vmatpush.msra.mxu0 %v1442_v17  ;;  %v1425_v37 = vld [vmem:[#allocation11 + $0x388] sm:$0xff] }
 0x26e   : > { %1702 = vmatpush.msra.mxu2 %v1506_v50  ;;  %1675 = vmatpush.msrb.mxu1 %v1488_v42 }
 0x26f   : > { %1721 = vmatpush.msrb.mxu3 %v1540_v0  ;;  %1663 = vmatpush.msra.mxu0 %v1440_v47  ;;  %v1369_v47 = vld [vmem:[#allocation11 + $0x1c8] sm:$0xff] }
 0x270   : > { %1703 = vmatpush.msra.mxu2 %v1504_v1  ;;  %1676 = vmatpush.msrb.mxu1 %v1486_v34 }
 0x271   : > { %1722 = vmatpush.msrb.mxu3 %v1538_v27 }
 0x272   : > { %1677 = vmatpush.msrb.mxu1 %v1484_v55  ;;  %v1375_v55 = vld [vmem:[#allocation11 + $0x1f8] sm:$0xff] }
 0x273   : > { %1723 = vmatpush.msrb.mxu3 %v1536_v48 }
 0x274   : > { %1678 = vmatpush.msrb.mxu1 %v1482_v19  ;;  %v1341_v19 = vld [vmem:[#allocation11 + $0xe8] sm:$0xff] }
 0x276   : > { %1679 = vmatpush.msrb.mxu1 %v1480_v18  ;;  %v1339_v18 = vld [vmem:[#allocation11 + $0xd8] sm:$0xff] }
 0x278   : > { %1680 = vmatpush.msrb.mxu1 %v1478_v57  ;;  %v1383_v57 = vld [vmem:[#allocation11 + $0x238] sm:$0xff] }
 0x27a   : > { %1681 = vmatpush.msrb.mxu1 %v1476_v32 }
 0x27c   : > { %1682 = vmatpush.msrb.mxu1 %v1474_v59  ;;  %v1337_v59 = vld [vmem:[#allocation11 + $0xc8] sm:$0xff] }
 0x27e   : > { %1683 = vmatpush.msrb.mxu1 %v1472_v51  ;;  %v1381_v51 = vld [vmem:[#allocation11 + $0x228] sm:$0xff] }
 0x2af   : > { %v3986_v24 = vpop.permute.xlu2 %2826 }
 0x2b0   : > { %v2828_v35 = vunpack.i.l.bf16 %v3986_v24  ;;  %v2829_v33 = vunpack.i.h.bf16 %v3986_v24  ;;  %v1335_v24 = vld [vmem:[#allocation11 + $0xb8] sm:$0xff] }
 0x2b1   : > { %v2822_v44 = vpop.permute.xlu0 %2821 }
 0x2b2   : > { %v2824_v52 = vunpack.i.h.bf16 %v2822_v44  ;;  %v2823_v39 = vunpack.i.l.bf16 %v2822_v44  ;;  %v1413_v44 = vld [vmem:[#allocation11 + $0x328] sm:$0xff] }
 0x2b4   : > { %v1299_v25 = vsel %vm889_vm0, %v2824_v52, %v2828_v35  ;;  %v1300_v12 = vsel %vm889_vm0, %v2823_v39, %v2824_v52 }
 0x2b5   : > { %v3996_v9 = vmax.f32 %v3931_v26, %v1299_v25  ;;  %v3999_v3 = vmax.f32 %v3929_v22, %v1300_v12  ;;  %v1433_v26 = vld [vmem:[#allocation11 + $0x3c8] sm:$0xff]  ;;  %v1399_v22 = vld [vmem:[#allocation11 + $0x2b8] sm:$0xff] }
 0x2b6   : > { %v1379_v25 = vld [vmem:[#allocation11 + $0x218] sm:$0xff] }
 0x2b7   : > { %1624 = vmatmul.f32.vlgmr.msrb.gmra.mxu2 %v3999_v3  ;;  %1644 = vmatmul.f32.vlgmr.msra.gmra.mxu3 %v3996_v9  ;;  %v1411_v12 = vld [vmem:[#allocation11 + $0x318] sm:$0xff] }
 0x2b8   : > { %1768 = vmatpush.msrb.mxu2 %v1407_v10  ;;  %1788 = vmatpush.msra.mxu3 %v1439_v4  ;;  %v1333_v10 = vld [vmem:[#allocation11 + $0xa8] sm:$0xff] }
 0x2b9   : > { %v1365_v4 = vld [vmem:[#allocation11 + $0x1a8] sm:$0xff] }
 0x2ba   : > { %1769 = vmatpush.msrb.mxu2 %v1405_v53  ;;  %1789 = vmatpush.msra.mxu3 %v1437_v5  ;;  %v1409_v53 = vld [vmem:[#allocation11 + $0x308] sm:$0xff]  ;;  %v1567_v5 = vld [vmem:[#allocation11 + $0x7f8] sm:$0xff] }
 0x2bc   : > { %1770 = vmatpush.msrb.mxu2 %v1403_v15  ;;  %1790 = vmatpush.msra.mxu3 %v1435_v11  ;;  %v1331_v15 = vld [vmem:[#allocation11 + $0x98] sm:$0xff] }
 0x2bd   : > { %v1363_v11 = vld [vmem:[#allocation11 + $0x198] sm:$0xff] }
 0x2be   : > { %1771 = vmatpush.msrb.mxu2 %v1401_v14  ;;  %1791 = vmatpush.msra.mxu3 %v1433_v26  ;;  %v1533_v14 = vld [vmem:[#allocation11 + $0x6e8] sm:$0xff] }
 0x2bf   : > { %v1565_v26 = vld [vmem:[#allocation11 + $0x7e8] sm:$0xff] }
 0x2c0   : > { %1772 = vmatpush.msrb.mxu2 %v1399_v22  ;;  %1792 = vmatpush.msra.mxu3 %v1431_v6  ;;  %v1329_v22 = vld [vmem:[#allocation11 + $0x88] sm:$0xff] }
 0x2c1   : > { %v1361_v6 = vld [vmem:[#allocation11 + $0x188] sm:$0xff] }
 0x2c2   : > { %1773 = vmatpush.msrb.mxu2 %v1397_v2  ;;  %1793 = vmatpush.msra.mxu3 %v1429_v30  ;;  %v1531_v2 = vld [vmem:[#allocation11 + $0x6d8] sm:$0xff] }
 0x2c3   : > { %v1563_v30 = vld [vmem:[#allocation11 + $0x7d8] sm:$0xff] }
 0x2c4   : > { %1774 = vmatpush.msrb.mxu2 %v1395_v7  ;;  %1794 = vmatpush.msra.mxu3 %v1427_v31  ;;  %v1327_v7 = vld [vmem:[#allocation11 + $0x78] sm:$0xff] }
 0x2c5   : > { %v1359_v31 = vld [vmem:[#allocation11 + $0x178] sm:$0xff] }
 0x2c6   : > { %v2817_v43 = vpop.permute.xlu1 %2816  ;;  %v2832_v0 = vpop.permute.xlu0 %2831  ;;  %1775 = vmatpush.msrb.mxu2 %v1393_v36  ;;  %1795 = vmatpush.msra.mxu3 %v1425_v37  ;;  %v1529_v36 = vld [vmem:[#allocation11 + $0x6c8] sm:$0xff] }
 0x2c7   : > { %v2819_v28 = vunpack.i.h.bf16 %v2817_v43  ;;  %v2818_v50 = vunpack.i.l.bf16 %v2817_v43  ;;  %v2833_v27 = vunpack.i.l.bf16 %v2832_v0  ;;  %v2834_v13 = vunpack.i.h.bf16 %v2832_v0  ;;  %v1357_v37 = vld [vmem:[#allocation11 + $0x168] sm:$0xff]  ;;  %v1323_v43 = vld [vmem:[#allocation11 + $0x58] sm:$0xff] }
 0x2c8   : > { %1776 = vmatpush.msrb.mxu2 %v1391_v45  ;;  %1796 = vmatpush.msra.mxu3 %v1423_v40  ;;  %v1527_v45 = vld [vmem:[#allocation11 + $0x6b8] sm:$0xff] }
 0x2c9   : > { %v1301_v1 = vsel %vm889_vm0, %v2819_v28, %v2823_v39  ;;  %v1302_v48 = vsel %vm889_vm0, %v2818_v50, %v2819_v28  ;;  %v1296_v58 = vsel %vm889_vm0, %v2829_v33, %v2833_v27  ;;  %v1303_v42 = vsel %vm889_vm0, %v2833_v27, %v2818_v50  ;;  %v1559_v40 = vld [vmem:[#allocation11 + $0x7b8] sm:$0xff]  ;;  %v1557_v28 = vld [vmem:[#allocation11 + $0x7a8] sm:$0xff] }
 0x2ca   : > { %v4011_v8 = vmax.f32 %v3963_v38, %v1302_v48  ;;  %v4014_v16 = vmax.f32 %v3967_v62, %v1301_v1  ;;  %1777 = vmatpush.msrb.mxu2 %v1389_v20  ;;  %v4019_v29 = vmax.f32 %v3947_v63, %v1296_v58  ;;  %v4022_v34 = vmax.f32 %v3943_v60, %v1303_v42  ;;  %v1387_v38 = vld [vmem:[#allocation11 + $0x258] sm:$0xff]  ;;  %v1373_v63 = vld [vmem:[#allocation11 + $0x1e8] sm:$0xff] }
 0x2cb   : > { %1797 = vmatpush.msra.mxu3 %v1421_v49  ;;  %v1419_v62 = vld [vmem:[#allocation11 + $0x358] sm:$0xff]  ;;  %v1385_v60 = vld [vmem:[#allocation11 + $0x248] sm:$0xff]  ;;  %v1297_v32 = vsel %vm889_vm0, %v2834_v13, %v2829_v33  ;;  %v1298_v17 = vsel %vm889_vm0, %v2828_v35, %v2834_v13  ;;  %vm2334_vm0 = vcmask 255105  }
 0x2cc   : > { %1584 = vmatmul.f32.vlgmr.msrb.gmra.mxu0 %v4011_v8  ;;  %1604 = vmatmul.f32.vlgmr.msra.gmra.mxu1 %v4014_v16  ;;  %v4035_v52 = vmax.f32 %v3975_v46, %v1298_v17  ;;  %v4038_v39 = vmax.f32 %v3971_v61, %v1297_v32  ;;  %v1367_v35 = vld [vmem:[#allocation11 + $0x1b8] sm:$0xff]  ;;  %v1377_v46 = vld [vmem:[#allocation11 + $0x208] sm:$0xff] }
 0x2cd   : > { %1704 = vmatmul.f32.vlgmr.msra.gmra.mxu2 %v4019_v29  ;;  %1724 = vmatmul.f32.vlgmr.msrb.gmra.mxu3 %v4022_v34  ;;  %v1535_v61 = vld [vmem:[#allocation11 + $0x6f8] sm:$0xff]  ;;  %v1525_v33 = vld [vmem:[#allocation11 + $0x6a8] sm:$0xff] }
 0x2ce   : > { %1728 = vmatpush.msrb.mxu0 %v1343_v56  ;;  %1748 = vmatpush.msra.mxu1 %v1375_v55  ;;  %v1355_v0 = vld [vmem:[#allocation11 + $0x158] sm:$0xff]  ;;  %v1321_v50 = vld [vmem:[#allocation11 + $0x48] sm:$0xff] }
 0x2cf   : > { %1778 = vmatpush.msrb.mxu2 %v1387_v38  ;;  %1798 = vmatpush.msra.mxu3 %v1419_v62  ;;  %v1353_v27 = vld [vmem:[#allocation11 + $0x148] sm:$0xff]  ;;  %v1523_v20 = vld [vmem:[#allocation11 + $0x698] sm:$0xff] }
 0x2d0   : > { %1729 = vmatpush.msrb.mxu0 %v1341_v19  ;;  %1749 = vmatpush.msra.mxu1 %v1373_v63  ;;  %v1555_v49 = vld [vmem:[#allocation11 + $0x798] sm:$0xff]  ;;  %v1521_v58 = vld [vmem:[#allocation11 + $0x688] sm:$0xff] }
 0x2d1   : > { %1779 = vmatpush.msrb.mxu2 %v1385_v60  ;;  %1799 = vmatpush.msra.mxu3 %v1417_v54  ;;  %v1319_v1 = vld [vmem:[#allocation11 + $0x38] sm:$0xff]  ;;  %v1553_v42 = vld [vmem:[#allocation11 + $0x788] sm:$0xff] }
 0x2d2   : > { %1730 = vmatpush.msrb.mxu0 %v1339_v18  ;;  %1750 = vmatpush.msra.mxu1 %v1371_v41  ;;  %v1351_v48 = vld [vmem:[#allocation11 + $0x138] sm:$0xff]  ;;  %v1317_v56 = vld [vmem:[#allocation11 + $0x28] sm:$0xff] }
 0x2d3   : > { %1780 = vmatpush.msrb.mxu2 %v1383_v57  ;;  %1800 = vmatpush.msra.mxu3 %v1415_v21  ;;  %v1349_v55 = vld [vmem:[#allocation11 + $0x128] sm:$0xff]  ;;  %v1519_v38 = vld [vmem:[#allocation11 + $0x678] sm:$0xff] }
 0x2d4   : > { %1731 = vmatpush.msrb.mxu0 %v1337_v59  ;;  %1751 = vmatpush.msra.mxu1 %v1369_v47  ;;  %v1551_v62 = vld [vmem:[#allocation11 + $0x778] sm:$0xff]  ;;  %v1517_v63 = vld [vmem:[#allocation11 + $0x668] sm:$0xff] }
 0x2d5   : > { %1781 = vmatpush.msrb.mxu2 %v1381_v51  ;;  %1801 = vmatpush.msra.mxu3 %v1413_v44  ;;  %v1315_v13 = vld [vmem:[#allocation11 + $0x18] sm:$0xff]  ;;  %v1549_v60 = vld [vmem:[#allocation11 + $0x768] sm:$0xff] }
 0x2d6   : > { %1664 = vmatmul.f32.vlgmr.msra.gmra.mxu0 %v4035_v52  ;;  %1684 = vmatmul.f32.vlgmr.msrb.gmra.mxu1 %v4038_v39  ;;  %v1347_v19 = vld [vmem:[#allocation11 + $0x118] sm:$0xff]  ;;  %v1313_v54 = vld [vmem:[#allocation11 + $0x8] sm:$0xff] }
 0x2d7   : > { %1732 = vmatpush.msrb.mxu0 %v1335_v24  ;;  %1752 = vmatpush.msra.mxu1 %v1367_v35  ;;  %v1345_v18 = vld [vmem:[#allocation11 + $0x108] sm:$0xff]  ;;  %v1471_v41 = vld [vmem:[#allocation11 + $0x4f8] sm:$0xff] }
 0x2d8   : > { %1782 = vmatpush.msrb.mxu2 %v1379_v25  ;;  %1802 = vmatpush.msra.mxu3 %v1411_v12  ;;  %v1503_v57 = vld [vmem:[#allocation11 + $0x5f8] sm:$0xff]  ;;  %v1469_v17 = vld [vmem:[#allocation11 + $0x4e8] sm:$0xff] }
 0x2d9   : > { %1733 = vmatpush.msrb.mxu0 %v1333_v10  ;;  %1753 = vmatpush.msra.mxu1 %v1365_v4  ;;  %v1515_v21 = vld [vmem:[#allocation11 + $0x658] sm:$0xff]  ;;  %v1501_v59 = vld [vmem:[#allocation11 + $0x5e8] sm:$0xff] }
 0x2da   : > { %1783 = vmatpush.msrb.mxu2 %v1377_v46  ;;  %1803 = vmatpush.msra.mxu3 %v1409_v53  ;;  %v1547_v32 = vld [vmem:[#allocation11 + $0x758] sm:$0xff]  ;;  %v1513_v47 = vld [vmem:[#allocation11 + $0x648] sm:$0xff] }
 0x2db   : > { %1784 = vmatmul.f32.vlgmr.msrb.gmra.mxu2 %v3999_v3  ;;  %1804 = vmatmul.f32.vlgmr.msra.gmra.mxu3 %v3996_v9  ;;  %v1561_v3 = vld [vmem:[#allocation11 + $0x7c8] sm:$0xff]  ;;  %v1467_v44 = vld [vmem:[#allocation11 + $0x4d8] sm:$0xff] }
 0x2dc   : > { %1848 = vmatpush.msra.mxu2 %v1535_v61  ;;  %1868 = vmatpush.msrb.mxu3 %v1567_v5  ;;  %v1325_v9 = vld [vmem:[#allocation11 + $0x68] sm:$0xff]  ;;  %v1499_v24 = vld [vmem:[#allocation11 + $0x5d8] sm:$0xff] }
 0x2dd   : > { %1734 = vmatpush.msrb.mxu0 %v1331_v15  ;;  %1754 = vmatpush.msra.mxu1 %v1363_v11  ;;  %v1545_v51 = vld [vmem:[#allocation11 + $0x748] sm:$0xff]  ;;  %v1511_v35 = vld [vmem:[#allocation11 + $0x638] sm:$0xff] }
 0x2de   : > { %1849 = vmatpush.msra.mxu2 %v1533_v14  ;;  %1869 = vmatpush.msrb.mxu3 %v1565_v26  ;;  %v1543_v25 = vld [vmem:[#allocation11 + $0x738] sm:$0xff]  ;;  %v1465_v12 = vld [vmem:[#allocation11 + $0x4c8] sm:$0xff] }
 0x2df   : > { %1735 = vmatpush.msrb.mxu0 %v1329_v22  ;;  %1755 = vmatpush.msra.mxu1 %v1361_v6  ;;  %v1541_v10 = vld [vmem:[#allocation11 + $0x728] sm:$0xff]  ;;  %v1463_v4 = vld [vmem:[#allocation11 + $0x4b8] sm:$0xff] }
 0x2e0   : > { %1850 = vmatpush.msra.mxu2 %v1531_v2  ;;  %1870 = vmatpush.msrb.mxu3 %v1563_v30  ;;  %v1495_v46 = vld [vmem:[#allocation11 + $0x5b8] sm:$0xff]  ;;  %v1461_v5 = vld [vmem:[#allocation11 + $0x4a8] sm:$0xff] }
 0x2e1   : > { %1736 = vmatpush.msrb.mxu0 %v1327_v7  ;;  %1756 = vmatpush.msra.mxu1 %v1359_v31  ;;  %v1507_v53 = vld [vmem:[#allocation11 + $0x618] sm:$0xff]  ;;  %v1493_v15 = vld [vmem:[#allocation11 + $0x5a8] sm:$0xff] }
 0x2e2   : > { %1851 = vmatpush.msra.mxu2 %v1529_v36  ;;  %1871 = vmatpush.msrb.mxu3 %v1561_v3  ;;  %v1539_v61 = vld [vmem:[#allocation11 + $0x718] sm:$0xff]  ;;  %v1505_v11 = vld [vmem:[#allocation11 + $0x608] sm:$0xff] }
 0x2e3   : > { %1737 = vmatpush.msrb.mxu0 %v1325_v9  ;;  %1757 = vmatpush.msra.mxu1 %v1357_v37  ;;  %v1537_v14 = vld [vmem:[#allocation11 + $0x708] sm:$0xff]  ;;  %v1459_v26 = vld [vmem:[#allocation11 + $0x498] sm:$0xff] }
 0x2e4   : > { %1852 = vmatpush.msra.mxu2 %v1527_v45  ;;  %1872 = vmatpush.msrb.mxu3 %v1559_v40  ;;  %v1491_v22 = vld [vmem:[#allocation11 + $0x598] sm:$0xff]  ;;  %v1457_v6 = vld [vmem:[#allocation11 + $0x488] sm:$0xff] }
 0x2e5   : > { %1738 = vmatpush.msrb.mxu0 %v1323_v43  ;;  %1758 = vmatpush.msra.mxu1 %v1355_v0  ;;  %v1489_v2 = vld [vmem:[#allocation11 + $0x588] sm:$0xff]  ;;  %v1455_v30 = vld [vmem:[#allocation11 + $0x478] sm:$0xff] }
 0x2e6   : > { %1853 = vmatpush.msra.mxu2 %v1525_v33  ;;  %1873 = vmatpush.msrb.mxu3 %v1557_v28  ;;  %v1487_v7 = vld [vmem:[#allocation11 + $0x578] sm:$0xff]  ;;  %v1453_v31 = vld [vmem:[#allocation11 + $0x468] sm:$0xff] }
 0x2e7   : > { %1739 = vmatpush.msrb.mxu0 %v1321_v50  ;;  %1759 = vmatpush.msra.mxu1 %v1353_v27  ;;  %v1485_v36 = vld [vmem:[#allocation11 + $0x568] sm:$0xff]  ;;  %v1451_v3 = vld [vmem:[#allocation11 + $0x458] sm:$0xff] }
 0x2e8   : > { %1854 = vmatpush.msra.mxu2 %v1523_v20  ;;  %1874 = vmatpush.msrb.mxu3 %v1555_v49  ;;  %v1483_v9 = vld [vmem:[#allocation11 + $0x558] sm:$0xff]  ;;  %v1449_v37 = vld [vmem:[#allocation11 + $0x448] sm:$0xff] }
 0x2e9   : > { %1740 = vmatpush.msrb.mxu0 %v1319_v1  ;;  %1760 = vmatpush.msra.mxu1 %v1351_v48  ;;  %v1479_v45 = vld [vmem:[#allocation11 + $0x538] sm:$0xff]  ;;  %v1445_v40 = vld [vmem:[#allocation11 + $0x428] sm:$0xff] }
 0x2ea   : > { %1855 = vmatpush.msra.mxu2 %v1521_v58  ;;  %1875 = vmatpush.msrb.mxu3 %v1553_v42  ;;  %v1477_v43 = vld [vmem:[#allocation11 + $0x528] sm:$0xff]  ;;  %v1443_v0 = vld [vmem:[#allocation11 + $0x418] sm:$0xff] }
 0x2eb   : > { %1741 = vmatpush.msrb.mxu0 %v1317_v56  ;;  %1761 = vmatpush.msra.mxu1 %v1349_v55  ;;  %v1475_v33 = vld [vmem:[#allocation11 + $0x518] sm:$0xff]  ;;  %v1441_v28 = vld [vmem:[#allocation11 + $0x408] sm:$0xff] }
 0x2ec   : > { %1856 = vmatpush.msra.mxu2 %v1519_v38  ;;  %1876 = vmatpush.msrb.mxu3 %v1551_v62  ;;  %v1473_v50 = vld [vmem:[#allocation11 + $0x508] sm:$0xff] }
 0x2ed   : > { %1742 = vmatpush.msrb.mxu0 %v1315_v13  ;;  %1762 = vmatpush.msra.mxu1 %v1347_v19 }
 0x2ee   : > { %1857 = vmatpush.msra.mxu2 %v1517_v63  ;;  %1877 = vmatpush.msrb.mxu3 %v1549_v60 }
 0x2ef   : > { %1743 = vmatpush.msrb.mxu0 %v1313_v54  ;;  %1763 = vmatpush.msra.mxu1 %v1345_v18 }
 0x2f0   : > { %1744 = vmatmul.f32.vlgmr.msrb.gmra.mxu0 %v4011_v8  ;;  %1764 = vmatmul.f32.vlgmr.msra.gmra.mxu1 %v4014_v16  ;;  %v1497_v8 = vld [vmem:[#allocation11 + $0x5c8] sm:$0xff] }
 0x2f1   : > { %1808 = vmatpush.msra.mxu0 %v1471_v41  ;;  %1828 = vmatpush.msrb.mxu1 %v1503_v57  ;;  %v1509_v16 = vld [vmem:[#allocation11 + $0x628] sm:$0xff] }
 0x2f2   : > { %1858 = vmatpush.msra.mxu2 %v1515_v21  ;;  %1878 = vmatpush.msrb.mxu3 %v1547_v32 }
 0x2f3   : > { %1809 = vmatpush.msra.mxu0 %v1469_v17  ;;  %1829 = vmatpush.msrb.mxu1 %v1501_v59 }
 0x2f4   : > { %1859 = vmatpush.msra.mxu2 %v1513_v47  ;;  %1879 = vmatpush.msrb.mxu3 %v1545_v51 }
 0x2f5   : > { %1810 = vmatpush.msra.mxu0 %v1467_v44  ;;  %1830 = vmatpush.msrb.mxu1 %v1499_v24 }
 0x2f6   : > { %1860 = vmatpush.msra.mxu2 %v1511_v35  ;;  %1880 = vmatpush.msrb.mxu3 %v1543_v25 }
 0x2f7   : > { %1811 = vmatpush.msra.mxu0 %v1465_v12  ;;  %1831 = vmatpush.msrb.mxu1 %v1497_v8  ;;  %v2031_v8 = vld [vmem:[#allocation9 + $0x98] ss:$8 sm:$0x3] }
 0x2f8   : > { %1861 = vmatpush.msra.mxu2 %v1509_v16  ;;  %1881 = vmatpush.msrb.mxu3 %v1541_v10  ;;  %v2033_v10 = vperm.slane %v2031_v8, 0 }
 0x2f9   : > { %1812 = vmatpush.msra.mxu0 %v1463_v4  ;;  %1832 = vmatpush.msrb.mxu1 %v1495_v46  ;;  %v2034_v4 = vperm.slane %v2031_v8, 1 }
 0x2fa   : > { %1862 = vmatpush.msra.mxu2 %v1507_v53  ;;  %1882 = vmatpush.msrb.mxu3 %v1539_v61 }
 0x2fb   : > { %1813 = vmatpush.msra.mxu0 %v1461_v5  ;;  %1833 = vmatpush.msrb.mxu1 %v1493_v15 }
 0x2fc   : > { %1863 = vmatpush.msra.mxu2 %v1505_v11  ;;  %1883 = vmatpush.msrb.mxu3 %v1537_v14 }
 0x2fd   : > { %1864 = vmatmul.f32.vlgmr.msra.gmra.mxu2 %v4019_v29  ;;  %1884 = vmatmul.f32.vlgmr.msrb.gmra.mxu3 %v4022_v34  ;;  %v1481_v29 = vld [vmem:[#allocation11 + $0x548] sm:$0xff]  ;;  %v1447_v34 = vld [vmem:[#allocation11 + $0x438] sm:$0xff] }
 0x2fe   : > { %1814 = vmatpush.msra.mxu0 %v1459_v26  ;;  %1834 = vmatpush.msrb.mxu1 %v1491_v22  ;;  %v2653_v26 = vld [vmem:[%s4243_s2 + $0x8] sm:$0xff] }
 0x300   : > { %1815 = vmatpush.msra.mxu0 %v1457_v6  ;;  %1835 = vmatpush.msrb.mxu1 %v1489_v2  ;;  %v2013_v2 = vld [vmem:[#allocation9 + $0x47] ss:$8 sm:$0x3] }
 0x302   : > { %1816 = vmatpush.msra.mxu0 %v1455_v30  ;;  %1836 = vmatpush.msrb.mxu1 %v1487_v7  ;;  %v1995_v30 = vld [vmem:[#allocation9 + $0x46] ss:$8 sm:$0x3] }
 0x304   : > { %1817 = vmatpush.msra.mxu0 %v1453_v31  ;;  %1837 = vmatpush.msrb.mxu1 %v1485_v36  ;;  %v2015_v31 = vperm.slane %v2013_v2, 0  ;;  %v2016_v36 = vperm.slane %v2013_v2, 1 }
 0x306   : > { %1818 = vmatpush.msra.mxu0 %v1451_v3  ;;  %1838 = vmatpush.msrb.mxu1 %v1483_v9  ;;  %v1977_v3 = vld [vmem:[#allocation9 + $0x45] ss:$8 sm:$0x3] }
 0x308   : > { %1819 = vmatpush.msra.mxu0 %v1449_v37  ;;  %1839 = vmatpush.msrb.mxu1 %v1481_v29  ;;  %v1997_v37 = vperm.slane %v1995_v30, 0  ;;  %v1998_v29 = vperm.slane %v1995_v30, 1 }
 0x30a   : > { %1820 = vmatpush.msra.mxu0 %v1447_v34  ;;  %1840 = vmatpush.msrb.mxu1 %v1479_v45  ;;  %v1960_v45 = vld [vmem:[#allocation9 + $0x44] ss:$8 sm:$0x3] }
 0x30c   : > { %1821 = vmatpush.msra.mxu0 %v1445_v40  ;;  %1841 = vmatpush.msrb.mxu1 %v1477_v43 }
 0x30e   : > { %1822 = vmatpush.msra.mxu0 %v1443_v0  ;;  %1842 = vmatpush.msrb.mxu1 %v1475_v33 }
 0x310   : > { %1823 = vmatpush.msra.mxu0 %v1441_v28  ;;  %1843 = vmatpush.msrb.mxu1 %v1473_v50  ;;  %v1979_v28 = vperm.slane %v1977_v3, 0  ;;  %v1980_v50 = vperm.slane %v1977_v3, 1 }
 0x311   : > { %1824 = vmatmul.f32.vlgmr.msra.gmra.mxu0 %v4035_v52  ;;  %1844 = vmatmul.f32.vlgmr.msrb.gmra.mxu1 %v4038_v39 }
 0x33a   : > { %v1625_v1 = vpop.f32.mrf.mxu2  ;;  %v1645_v58 = vpop.f32.mrf.mxu3 }
 0x349   : > { %v1585_v27 = vpop.f32.mrf.mxu0  ;;  %v1605_v20 = vpop.f32.mrf.mxu1 }
 0x34a   : > { %v1606_v49 = vadd.f32 %v1605_v20, %v1585_v27 }
 0x34c   : > { %v1626_v48 = vadd.f32 %v1625_v1, %v1606_v49 }
 0x34e   : > { %v1646_v42 = vadd.f32 %v1645_v58, %v1626_v48  ;;  %v1949_v48 = vld [vmem:[#allocation9 + $0x43] ss:$8 sm:$0x3]  ;;  %v1962_v58 = vperm.slane %v1960_v45, 0 }
 0x350   : > { %v1705_v13 = vpop.f32.mrf.mxu2  ;;  %v1725_v63 = vpop.f32.mrf.mxu3 }
 0x353   : > { %v1665_v56 = vpop.f32.mrf.mxu0  ;;  %v1685_v38 = vpop.f32.mrf.mxu1 }
 0x354   : > { %v1666_v55 = vadd.f32 %v1665_v56, %v1646_v42 }
 0x356   : > { %v1686_v62 = vadd.f32 %v1685_v38, %v1666_v55  ;;  %v1963_v55 = vperm.slane %v1960_v45, 1  ;;  %v1932_v38 = vld [vmem:[#allocation9 + $0x42] ss:$8 sm:$0x3]  ;;  %v2143_v45 = vld [vmem:[#allocation11 + $0x8e0] sm:$0xff] }
 0x358   : > { %v1706_v19 = vadd.f32 %v1705_v13, %v1686_v62 }
 0x35a   : > { %v4050_v60 = vadd.f32 %v1725_v63, %v1706_v19  ;;  %v1951_v19 = vperm.slane %v1949_v48, 0  ;;  %v1952_v63 = vperm.slane %v1949_v48, 1  ;;  %v2154_v48 = vld [vmem:[#allocation11 + $0x990] sm:$0xff] }
 0x35c   : > { %1987 = vrot.lane.b32.xlu2 %v4050_v60, %s3129_s15  ;;  %2005 = vrot.lane.b32.xlu0 %v4050_v60, %s3130_s28 }
 0x35d   : > { %2023 = vrot.lane.b32.xlu1 %v4050_v60, %s3131_s3 }
 0x35e   : > { %v1785_v18 = vpop.f32.mrf.mxu2  ;;  %v1805_v57 = vpop.f32.mrf.mxu3 }
 0x364   : > { %1924 = vrot.lane.b32.xlu2 %v4050_v60, %s3132_s19  ;;  %1942 = vrot.lane.b32.xlu0 %v4050_v60, %s3123_s20 }
 0x365   : > { %1970 = vrot.lane.b32.xlu1 %v4050_v60, %s3124_s26 }
 0x36d   : > { %1906 = vrot.lane.b32.xlu1 %v4050_v60, %s3133_s24  ;;  %v1745_v52 = vpop.f32.mrf.mxu0  ;;  %v1765_v39 = vpop.f32.mrf.mxu1 }
 0x36e   : > { %v1766_v54 = vadd.f32 %v1765_v39, %v1745_v52  ;;  %v1914_v52 = vld [vmem:[#allocation9 + $0x41] ss:$8 sm:$0x3] }
 0x370   : > { %v1786_v41 = vadd.f32 %v1785_v18, %v1766_v54  ;;  %v1966_v54 = vmul.f32 %v1962_v58, %v4050_v60  ;;  %v2137_v58 = vld [vmem:[#allocation11 + $0x880] sm:$0xff] }
 0x372   : > { %v1806_v21 = vadd.f32 %v1805_v57, %v1786_v41  ;;  %v1934_v41 = vperm.slane %v1932_v38, 0  ;;  %v1935_v57 = vperm.slane %v1932_v38, 1  ;;  %v2135_v38 = vld [vmem:[#allocation11 + $0x860] sm:$0xff] }
 0x380   : > { %v1865_v51 = vpop.f32.mrf.mxu2  ;;  %v1885_v24 = vpop.f32.mrf.mxu3 }
 0x38e   : > { %v1825_v32 = vpop.f32.mrf.mxu0  ;;  %v1845_v59 = vpop.f32.mrf.mxu1 }
 0x38f   : > { %v1826_v17 = vadd.f32 %v1825_v32, %v1806_v21 }
 0x391   : > { %v1846_v47 = vadd.f32 %v1845_v59, %v1826_v17 }
 0x393   : > { %v1866_v44 = vadd.f32 %v1865_v51, %v1846_v47  ;;  %v1916_v51 = vperm.slane %v1914_v52, 0 }
 0x395   : > { %v4063_v35 = vadd.f32 %v1885_v24, %v1866_v44  ;;  %v1917_v44 = vperm.slane %v1914_v52, 1  ;;  %v2149_v52 = vld [vmem:[#allocation11 + $0x940] sm:$0xff] }
 0x397   : > { %2025 = vrot.lane.b32.xlu2 %v4063_v35, %s3131_s3  ;;  %1989 = vrot.lane.b32.xlu0 %v4063_v35, %s3129_s15  ;;  %v1967_v32 = vmul.f32 %v1963_v55, %v4063_v35  ;;  %v2152_v55 = vld [vmem:[#allocation11 + $0x970] sm:$0xff]  ;;  %s3139_s15 = smov 9   ;;  %s3140_s3 = smov 8  }
 0x398   : > { %2007 = vrot.lane.b32.xlu1 %v4063_v35, %s3130_s28 }
 0x39f   : > { %1972 = vrot.lane.b32.xlu2 %v4063_v35, %s3124_s26  ;;  %1926 = vrot.lane.b32.xlu0 %v4063_v35, %s3132_s19  ;;  %s3143_s19 = smov 64  }
 0x3a0   : > { %1944 = vrot.lane.b32.xlu1 %v4063_v35, %s3123_s20 }
 0x3a7   : > { %1908 = vrot.lane.b32.xlu2 %v4063_v35, %s3133_s24  ;;  %1888 = vrot.lane.b32.xlu0 %v4050_v60, %s3134_s25 }
 0x3a8   : > { %1890 = vrot.lane.b32.xlu1 %v4063_v35, %s3134_s25 }
 0x3af   : > { %2065 = vperm.xlu2 %2835, %v2653_v26  }
 0x3b6   : > { %v1988_v25 = vpop.permute.xlu2 %1987 }
 0x3be   : > { %v4078_v12 = vpop.permute.xlu2 %1924 }
 0x3ce   : > { %v2006_v11 = vpop.permute.xlu0 %2005 }
 0x3cf   : > { %v2024_v16 = vpop.permute.xlu1 %2023 }
 0x3d6   : > { %v1943_v22 = vpop.permute.xlu0 %1942 }
 0x3d7   : > { %v1971_v14 = vpop.permute.xlu1 %1970 }
 0x3df   : > { %v1907_v6 = vpop.permute.xlu1 %1906 }
 0x3f1   : > { %v2026_v46 = vpop.permute.xlu2 %2025 }
 0x3f2   : > { %v2028_v53 = vsel %vm2027_vm9, %v2024_v16, %v2026_v46  ;;  %v2029_v61 = vsel %vm2027_vm9, %v2026_v46, %v2024_v16  ;;  %v1896_v16 = vld [vmem:[#allocation9 + $0x40] ss:$8 sm:$0x3]  ;;  %vm2497_vm9 = vcmask 73728  }
 0x3f3   : > { %v2037_v5 = vmul.f32 %v2033_v10, %v2028_v53  ;;  %v2038_v15 = vmul.f32 %v2034_v4, %v2029_v61  ;;  %v1898_v53 = vperm.slane %v1896_v16, 0  ;;  %v1899_v61 = vperm.slane %v1896_v16, 1 }
 0x3f5   : > { %2078 = vmatpush.msrb.mxu0 %v2037_v5  ;;  %2098 = vmatpush.msra.mxu1 %v2038_v15 }
 0x3f9   : > { %v1973_v7 = vpop.permute.xlu2 %1972 }
 0x3fa   : > { %v1974_v49 = vsel %vm765_vm3, %v1971_v14, %v1973_v7  ;;  %v1975_v1 = vsel %vm765_vm3, %v1973_v7, %v1971_v14 }
 0x3fb   : > { %v1983_v62 = vmul.f32 %v1979_v28, %v1974_v49  ;;  %v1984_v13 = vmul.f32 %v1980_v50, %v1975_v1  ;;  %v2157_v28 = vld [vmem:[#allocation11 + $0x9c0] sm:$0xff]  ;;  %v2140_v50 = vld [vmem:[#allocation11 + $0x8b0] sm:$0xff] }
 0x3fc   : > { %v2155_v49 = vld [vmem:[#allocation11 + $0x9a0] sm:$0xff]  ;;  %v2138_v1 = vld [vmem:[#allocation11 + $0x890] sm:$0xff] }
 0x401   : > { %v1909_v18 = vpop.permute.xlu2 %1908 }
 0x402   : > { %v1911_v35 = vsel %vm1910_vm13, %v1907_v6, %v1909_v18  ;;  %v1912_v8 = vsel %vm1910_vm13, %v1909_v18, %v1907_v6  ;;  %v2042_v6 = vld [vmem:[#allocation6 + $0x8] sm:$0xff] }
 0x403   : > { %v1920_v4 = vmul.f32 %v1916_v51, %v1912_v8  ;;  %v1921_v46 = vmul.f32 %v1917_v44, %v1911_v35  ;;  %v2147_v51 = vld [vmem:[#allocation11 + $0x920] sm:$0xff]  ;;  %v2130_v44 = vld [vmem:[#allocation11 + $0x810] sm:$0xff] }
 0x404   : > { %v2145_v35 = vld [vmem:[#allocation11 + $0x900] sm:$0xff] }
 0x409   : > { %v1990_v9 = vpop.permute.xlu0 %1989  ;;  %v2066_v2 = vpop.permute.xlu2 %2065 }
 0x40a   : > { %v2008_v34 = vpop.permute.xlu1 %2007  ;;  %v1992_v40 = vsel %vm1991_vm10, %v1988_v25, %v1990_v9  ;;  %v1993_v43 = vsel %vm1991_vm10, %v1990_v9, %v1988_v25 }
 0x40b   : > { %v2010_v0 = vsel %vm2009_vm11, %v2006_v11, %v2008_v34  ;;  %v2011_v33 = vsel %vm2009_vm11, %v2008_v34, %v2006_v11  ;;  %v2001_v42 = vmul.f32 %v1997_v37, %v1992_v40  ;;  %v2002_v56 = vmul.f32 %v1998_v29, %v1993_v43  ;;  %v2144_v29 = vld [vmem:[#allocation11 + $0x8f0] sm:$0xff]  ;;  %v2159_v40 = vld [vmem:[#allocation11 + $0x9e0] sm:$0xff] }
 0x40c   : > { %v2019_v27 = vmul.f32 %v2015_v31, %v2010_v0  ;;  %v2020_v20 = vmul.f32 %v2016_v36, %v2011_v33  ;;  %v2160_v34 = vld [vmem:[#allocation11 + $0x9f0] sm:$0xff]  ;;  %2161 = vmatpush.msrb.mxu2 %v2144_v29  ;;  %v2141_v33 = vld [vmem:[#allocation11 + $0x8c0] sm:$0xff] }
 0x40d   : > { %2181 = vmatpush.msra.mxu3 %v2160_v34  ;;  %v2142_v43 = vld [vmem:[#allocation11 + $0x8d0] sm:$0xff]  ;;  %v2218_v29 = vld [vmem:[#allocation9 + $0x53] ss:$0 sm:$0xff] }
 0x40e   : > { %2079 = vmatpush.msrb.mxu0 %v2019_v27  ;;  %2099 = vmatpush.msra.mxu1 %v2020_v20  ;;  %v2158_v0 = vld [vmem:[#allocation11 + $0x9d0] sm:$0xff]  ;;  %v2139_v20 = vld [vmem:[#allocation11 + $0x8a0] sm:$0xff] }
 0x40f   : > { %2162 = vmatpush.msrb.mxu2 %v2143_v45  ;;  %2182 = vmatpush.msra.mxu3 %v2159_v40  ;;  %v2156_v27 = vld [vmem:[#allocation11 + $0x9b0] sm:$0xff]  ;;  %v2213_v45 = vld [vmem:[#allocation9 + $0x52] ss:$0 sm:$0xff] }
 0x410   : > { %2080 = vmatpush.msrb.mxu0 %v2001_v42  ;;  %2100 = vmatpush.msra.mxu1 %v2002_v56  ;;  %v2153_v42 = vld [vmem:[#allocation11 + $0x980] sm:$0xff]  ;;  %v2136_v56 = vld [vmem:[#allocation11 + $0x870] sm:$0xff] }
 0x411   : > { %v1927_v39 = vpop.permute.xlu0 %1926  ;;  %2163 = vmatpush.msrb.mxu2 %v2142_v43  ;;  %2183 = vmatpush.msra.mxu3 %v2158_v0 }
 0x412   : > { %2081 = vmatpush.msrb.mxu0 %v1983_v62  ;;  %2101 = vmatpush.msra.mxu1 %v1984_v13  ;;  %v1945_v21 = vpop.permute.xlu1 %1944  ;;  %v1929_v17 = vsel %vm1928_vm12, %v4078_v12, %v1927_v39  ;;  %v1930_v59 = vsel %vm1928_vm12, %v1927_v39, %v4078_v12  ;;  %v2151_v62 = vld [vmem:[#allocation11 + $0x960] sm:$0xff]  ;;  %v2134_v13 = vld [vmem:[#allocation11 + $0x850] sm:$0xff] }
 0x413   : > { %v1946_v60 = vsel %vm666_vm4, %v1943_v22, %v1945_v21  ;;  %v1947_v47 = vsel %vm666_vm4, %v1945_v21, %v1943_v22  ;;  %v1938_v12 = vmul.f32 %v1934_v41, %v1930_v59  ;;  %v1939_v10 = vmul.f32 %v1935_v57, %v1929_v17  ;;  %2164 = vmatpush.msrb.mxu2 %v2141_v33  ;;  %v2132_v39 = vld [vmem:[#allocation11 + $0x830] sm:$0xff]  ;;  %v2208_v33 = vld [vmem:[#allocation9 + $0x51] ss:$0 sm:$0xff] }
 0x414   : > { %v1955_v24 = vmul.f32 %v1951_v19, %v1947_v47  ;;  %v1956_v25 = vmul.f32 %v1952_v63, %v1946_v60  ;;  %2082 = vmatpush.msrb.mxu0 %v1966_v54  ;;  %2102 = vmatpush.msra.mxu1 %v1967_v32  ;;  %v2150_v19 = vld [vmem:[#allocation11 + $0x950] sm:$0xff]  ;;  %v2133_v63 = vld [vmem:[#allocation11 + $0x840] sm:$0xff]  ;;  %vm2354_vm4 = vcmask 784005  }
 0x415   : > { %2184 = vmatpush.msra.mxu3 %v2157_v28  ;;  %2165 = vmatpush.msrb.mxu2 %v2140_v50  ;;  %v2148_v54 = vld [vmem:[#allocation11 + $0x930] sm:$0xff]  ;;  %v2131_v47 = vld [vmem:[#allocation11 + $0x820] sm:$0xff] }
 0x416   : > { %2083 = vmatpush.msrb.mxu0 %v1955_v24  ;;  %2103 = vmatpush.msra.mxu1 %v1956_v25  ;;  %v2146_v24 = vld [vmem:[#allocation11 + $0x910] sm:$0xff]  ;;  %v2129_v25 = vld [vmem:[#allocation11 + $0x800] sm:$0xff] }
 0x417   : > { %2185 = vmatpush.msra.mxu3 %v2156_v27  ;;  %2166 = vmatpush.msrb.mxu2 %v2139_v20  ;;  %v2203_v20 = vld [vmem:[#allocation9 + $0x50] ss:$0 sm:$0xff] }
 0x418   : > { %2084 = vmatpush.msrb.mxu0 %v1938_v12  ;;  %2104 = vmatpush.msra.mxu1 %v1939_v10 }
 0x419   : > { %v1889_v5 = vpop.permute.xlu0 %1888  ;;  %2186 = vmatpush.msra.mxu3 %v2155_v49  ;;  %2167 = vmatpush.msrb.mxu2 %v2138_v1 }
 0x41a   : > { %2105 = vmatpush.msra.mxu1 %v1921_v46  ;;  %v1891_v15 = vpop.permute.xlu1 %1890  ;;  %2085 = vmatpush.msrb.mxu0 %v1920_v4 }
 0x41b   : > { %v1893_v11 = vsel %vm1892_vm14, %v1889_v5, %v1891_v15  ;;  %v1894_v14 = vsel %vm1892_vm14, %v1891_v15, %v1889_v5  ;;  %2187 = vmatpush.msra.mxu3 %v2154_v48  ;;  %2168 = vmatpush.msrb.mxu2 %v2137_v58  ;;  %v2245_v48 = vld [vmem:[#allocation6 + $0x10] sm:$0xff] }
 0x41c   : > { %v1902_v26 = vmul.f32 %v1898_v53, %v1894_v14  ;;  %v1903_v22 = vmul.f32 %v1899_v61, %v1893_v11  ;;  %v2241_v11 = vld [vmem:[#allocation9 + $0xa8] ss:$0 sm:$0xff] }
 0x41d   : > { %2188 = vmatpush.msra.mxu3 %v2153_v42  ;;  %2169 = vmatpush.msrb.mxu2 %v2136_v56 }
 0x41e   : > { %2086 = vmatpush.msrb.mxu0 %v1902_v26  ;;  %2106 = vmatpush.msra.mxu1 %v1903_v22  ;;  %v2236_v22 = vld [vmem:[#allocation9 + $0x57] ss:$0 sm:$0xff] }
 0x41f   : > { %2654 = vmatmul.msk.f32.vlgmr.msrb.gmra.mxu0 %vm1076_vm8, %v2042_v6  ;;  %2655 = vmatmul.msk.f32.vlgmr.msra.gmra.mxu1 %vm1076_vm8, %v2042_v6 }
 0x420   : > { %2189 = vmatpush.msra.mxu3 %v2152_v55  ;;  %2170 = vmatpush.msrb.mxu2 %v2135_v38  ;;  %v2307_v38 = vld [vmem:[#allocation11 + $0xaf0] sm:$0xff] }
 0x421   : > { %2308 = vmatpush.msrb.mxu1 %v2307_v38 }
 0x422   : > { %2190 = vmatpush.msra.mxu3 %v2151_v62  ;;  %2171 = vmatpush.msrb.mxu2 %v2134_v13  ;;  %v2306_v62 = vld [vmem:[#allocation11 + $0xae0] sm:$0xff]  ;;  %v2305_v13 = vld [vmem:[#allocation11 + $0xad0] sm:$0xff] }
 0x423   : > { %2309 = vmatpush.msrb.mxu1 %v2306_v62 }
 0x424   : > { %2191 = vmatpush.msra.mxu3 %v2150_v19  ;;  %2172 = vmatpush.msrb.mxu2 %v2133_v63  ;;  %v2304_v19 = vld [vmem:[#allocation11 + $0xac0] sm:$0xff]  ;;  %v2303_v63 = vld [vmem:[#allocation11 + $0xab0] sm:$0xff] }
 0x425   : > { %2310 = vmatpush.msrb.mxu1 %v2305_v13 }
 0x426   : > { %2192 = vmatpush.msra.mxu3 %v2149_v52  ;;  %2173 = vmatpush.msrb.mxu2 %v2132_v39  ;;  %v2302_v52 = vld [vmem:[#allocation11 + $0xaa0] sm:$0xff]  ;;  %v2301_v39 = vld [vmem:[#allocation11 + $0xa90] sm:$0xff] }
 0x427   : > { %2311 = vmatpush.msrb.mxu1 %v2304_v19 }
 0x428   : > { %2193 = vmatpush.msra.mxu3 %v2148_v54  ;;  %2174 = vmatpush.msrb.mxu2 %v2131_v47  ;;  %v2300_v54 = vld [vmem:[#allocation11 + $0xa80] sm:$0xff] }
 0x429   : > { %2312 = vmatpush.msrb.mxu1 %v2303_v63 }
 0x42a   : > { %2194 = vmatpush.msra.mxu3 %v2147_v51  ;;  %2175 = vmatpush.msrb.mxu2 %v2130_v44  ;;  %v2292_v51 = vld [vmem:[#allocation11 + $0xa00] sm:$0xff] }
 0x42b   : > { %2313 = vmatpush.msrb.mxu1 %v2302_v52 }
 0x42c   : > { %2195 = vmatpush.msra.mxu3 %v2146_v24  ;;  %2176 = vmatpush.msrb.mxu2 %v2129_v25 }
 0x42d   : > { %2314 = vmatpush.msrb.mxu1 %v2301_v39 }
 0x42e   : > { %2196 = vmatpush.msra.mxu3 %v2145_v35  ;;  %v2382_v35 = vld [vmem:[%s4246_s5 + $0x78] sm:$0xff] }
 0x42f   : > { %2315 = vmatpush.msrb.mxu1 %v2300_v54  ;;  %2384 = vmatpush.msra.mxu2 %v2382_v35 }
 0x49c   : > { %v2088_v30 = vpop.f32.mrf.mxu0  ;;  %v2108_v7 = vpop.f32.mrf.mxu1 }
 0x49d   : > { %v4115_v31 = vadd.f32 %v2088_v30, %v2066_v2  ;;  %v4117_v36 = vadd.f32 %v2108_v7, %v2066_v2  ;;  %v2231_v2 = vld [vmem:[#allocation9 + $0x56] ss:$0 sm:$0xff] }
 0x49f   : > { %v2111_v3 = vmax.f32 %v4115_v31, 0.0  ;;  %v2112_v9 = vmax.f32 %v4117_v36, 0.0  ;;  %v2226_v36 = vld [vmem:[#allocation9 + $0x55] ss:$0 sm:$0xff] }
 0x4a1   : > { %v2836_v37 = vpack.i.bf16 %v2112_v9, %v2111_v3 }
 0x4a3   : > { %2837 = vrot.lane.b32.xlu0 %v2836_v37, %s3124_s26 }
 0x515   : > { %v2838_v18 = vpop.permute.xlu0 %2837 }
 0x516   : > { %v2840_v41 = vunpack.i.h.bf16 %v2838_v18  ;;  %v2839_v57 = vunpack.i.l.bf16 %v2838_v18  ;;  %v2299_v18 = vld [vmem:[#allocation11 + $0xa70] sm:$0xff] }
 0x517   : > { %2316 = vmatpush.msrb.mxu1 %v2299_v18 }
 0x518   : > { %v2117_v21 = vsel %vm765_vm3, %v2839_v57, %v2840_v41  ;;  %v2118_v32 = vsel %vm765_vm3, %v2840_v41, %v2839_v57  ;;  %v2298_v41 = vld [vmem:[#allocation11 + $0xa60] sm:$0xff]  ;;  %v2297_v57 = vld [vmem:[#allocation11 + $0xa50] sm:$0xff]  ;;  %vm2349_vm3 = vcmask 651780  }
 0x519   : > { %v2119_v17 = vmax.f32 %v2111_v3, %v2117_v21  ;;  %v2120_v59 = vmax.f32 %v2112_v9, %v2118_v32  ;;  %v2221_v9 = vld [vmem:[#allocation9 + $0x54] ss:$0 sm:$0xff]  ;;  %2317 = vmatpush.msrb.mxu1 %v2298_v41  ;;  %v2295_v32 = vld [vmem:[#allocation11 + $0xa30] sm:$0xff] }
 0x51a   : > { %v2296_v21 = vld [vmem:[#allocation11 + $0xa40] sm:$0xff] }
 0x51b   : > { %v2841_v60 = vpack.i.bf16 %v2120_v59, %v2119_v17  ;;  %2318 = vmatpush.msrb.mxu1 %v2297_v57 }
 0x51d   : > { %2842 = vrot.lane.b32.xlu1 %v2841_v60, %s3130_s28  ;;  %2319 = vmatpush.msrb.mxu1 %v2296_v21 }
 0x51f   : > { %2320 = vmatpush.msrb.mxu1 %v2295_v32 }
 0x58f   : > { %v2843_v8 = vpop.permute.xlu1 %2842 }
 0x590   : > { %v2845_v16 = vunpack.i.h.bf16 %v2843_v8  ;;  %v2844_v12 = vunpack.i.l.bf16 %v2843_v8  ;;  %v2381_v8 = vld [vmem:[%s4246_s5 + $0x70] sm:$0xff] }
 0x591   : > { %2385 = vmatpush.msra.mxu2 %v2381_v8 }
 0x592   : > { %v2125_v10 = vsel %vm2009_vm11, %v2844_v12, %v2845_v16  ;;  %v2126_v4 = vsel %vm2009_vm11, %v2845_v16, %v2844_v12  ;;  %v2380_v16 = vld [vmem:[%s4246_s5 + $0x68] sm:$0xff]  ;;  %v2379_v12 = vld [vmem:[%s4246_s5 + $0x60] sm:$0xff] }
 0x593   : > { %v2127_v46 = vmax.f32 %v2119_v17, %v2125_v10  ;;  %v2128_v53 = vmax.f32 %v2120_v59, %v2126_v4  ;;  %v2294_v17 = vld [vmem:[#allocation11 + $0xa20] sm:$0xff]  ;;  %v2293_v59 = vld [vmem:[#allocation11 + $0xa10] sm:$0xff]  ;;  %2386 = vmatpush.msra.mxu2 %v2380_v16 }
 0x594   : > { %2321 = vmatpush.msrb.mxu1 %v2294_v17  ;;  %v2378_v10 = vld [vmem:[%s4246_s5 + $0x58] sm:$0xff]  ;;  %v2377_v4 = vld [vmem:[%s4246_s5 + $0x50] sm:$0xff] }
 0x595   : > { %2177 = vmatmul.f32.vlgmr.msrb.gmra.mxu2 %v2127_v46  ;;  %2197 = vmatmul.f32.vlgmr.msra.gmra.mxu3 %v2128_v53  ;;  %v2376_v46 = vld [vmem:[%s4246_s5 + $0x48] sm:$0xff]  ;;  %v2375_v53 = vld [vmem:[%s4246_s5 + $0x40] sm:$0xff] }
 0x596   : > { %2322 = vmatpush.msrb.mxu1 %v2293_v59  ;;  %2387 = vmatpush.msra.mxu2 %v2379_v12 }
 0x598   : > { %2323 = vmatpush.msrb.mxu1 %v2292_v51  ;;  %2388 = vmatpush.msra.mxu2 %v2378_v10 }
 0x59a   : > { %2389 = vmatpush.msra.mxu2 %v2377_v4 }
 0x59c   : > { %2390 = vmatpush.msra.mxu2 %v2376_v46 }
 0x59e   : > { %2391 = vmatpush.msra.mxu2 %v2375_v53 }
 0x618   : > { %v2178_v61 = vpop.f32.mrf.mxu2  ;;  %v2198_v5 = vpop.f32.mrf.mxu3 }
 0x619   : > { %v2199_v15 = vadd.f32 %v2198_v5, %v2178_v61  ;;  %v2374_v61 = vld [vmem:[%s4246_s5 + $0x38] sm:$0xff]  ;;  %v2373_v5 = vld [vmem:[%s4246_s5 + $0x30] sm:$0xff] }
 0x61a   : > { %2392 = vmatpush.msra.mxu2 %v2374_v61 }
 0x61b   : > { %2229 = vrot.lane.b32.xlu1 %v2199_v15, %s3135_s22  ;;  %2234 = vrot.lane.b32.xlu0 %v2199_v15, %s3136_s21  ;;  %v2222_v34 = vmul.f32 %v2221_v9, %v2199_v15  ;;  %s3048_s22 = scalar_lea.hbm %s4251_s10, 2 }
 0x61c   : > { %2239 = vrot.lane.b32.xlu2 %v2199_v15, %s3137_s7  ;;  %2393 = vmatpush.msra.mxu2 %v2373_v5 }
 0x623   : > { %2211 = vrot.lane.b32.xlu1 %v2199_v15, %s3138_s13  ;;  %2216 = vrot.lane.b32.xlu0 %v2199_v15, %s3123_s20  ;;  %s3141_s20 = smov 48  }
 0x624   : > { %2224 = vrot.lane.b32.xlu2 %v2199_v15, %s3124_s26 }
 0x62b   : > { %2259 = vperm.xlu1 %2794, %v2656_v23   ;;  %2201 = vrot.lane.b32.xlu0 %v2199_v15, %s3139_s15  ;;  %v2371_v23 = vld [vmem:[%s4246_s5 + $0x20] sm:$0xff] }
 0x62c   : > { %2206 = vrot.lane.b32.xlu2 %v2199_v15, %s3140_s3  ;;  %v2372_v15 = vld [vmem:[%s4246_s5 + $0x28] sm:$0xff]  ;;  %s2512_s3 = sshll.u32 %s2508_s29, 4  ;;  %s2513_s3 = int_to_ptr.hbm [resolvable:$true] %s2512_s3 }
 0x62d   : > { %2394 = vmatpush.msra.mxu2 %v2372_v15  ;;  %s3042_s25 = sshra.s32 %s2513_s3, 4  ;;  %s3043_s25 = int_to_ptr.hbm [resolvable:$true] %s3042_s25 }
 0x62e   : > { %s3044_s11 = scalar_lea.hbm %s3043_s25, 1  ;;  %p3049_p3 = scmp.lt.s32.totalorder %s3043_s25, %s4251_s10 }
 0x62f   : > { %2395 = vmatpush.msra.mxu2 %v2371_v23  ;;  %p3045_p0 = scmp.ne.s32.totalorder %s3043_s25, %s3044_s11  ;;  %p3050_p4 = scmp.lt.s32.totalorder %s3048_s22, %s3044_s11 }
 0x631   : > { %p3046_p1 = pnand %p3045_p0, %p3237_p5  ;;  %p3051_p7 = por %p3050_p4, %p3049_p3 }
 0x633   : > { %p3047_p2 = pneg %p3046_p1 }
 0x635   : > { %p3052_p8 = pnand %p3051_p7, %p3047_p2 }
 0x676   : > { %v2240_v14 = vpop.permute.xlu2 %2239 }
 0x677   : > { %v2242_v26 = vmul.f32 %v2241_v11, %v2240_v14  ;;  %v2370_v11 = vld [vmem:[%s4246_s5 + $0x18] sm:$0xff]  ;;  %v2369_v14 = vld [vmem:[%s4246_s5 + $0x10] sm:$0xff] }
 0x678   : > { %2396 = vmatpush.msra.mxu2 %v2370_v11 }
 0x679   : > { %2272 = vmatpush.msra.mxu0 %v2242_v26  ;;  %v2368_v26 = vld [vmem:[%s4246_s5 + $0x8] sm:$0xff] }
 0x67a   : > { %2397 = vmatpush.msra.mxu2 %v2369_v14 }
 0x67c   : > { %2398 = vmatpush.msra.mxu2 %v2368_v26 }
 0x67e   : > { %v2225_v6 = vpop.permute.xlu2 %2224 }
 0x67f   : > { %v2227_v37 = vmul.f32 %v2226_v36, %v2225_v6  ;;  %v2408_v6 = vld [vmem:[%s4247_s6 + $0x18] sm:$0xff] }
 0x680   : > { %2430 = vmatpush.msrb.mxu3 %v2408_v6 }
 0x686   : > { %v2207_v28 = vpop.permute.xlu2 %2206 }
 0x687   : > { %v2209_v27 = vmul.f32 %v2208_v33, %v2207_v28 }
 0x68d   : > { %v2230_v30 = vpop.permute.xlu1 %2229  ;;  %v2235_v7 = vpop.permute.xlu0 %2234 }
 0x68e   : > { %v2237_v31 = vmul.f32 %v2236_v22, %v2235_v7  ;;  %v2232_v3 = vmul.f32 %v2231_v2, %v2230_v30  ;;  %v2367_v22 = vld [vmem:[%s4246_s5] sm:$0xff]  ;;  %v2407_v2 = vld [vmem:[%s4247_s6 + $0x10] sm:$0xff] }
 0x68f   : > { %2399 = vmatpush.msra.mxu2 %v2367_v22  ;;  %2431 = vmatpush.msrb.mxu3 %v2407_v2 }
 0x690   : > { %2273 = vmatpush.msra.mxu0 %v2237_v31 }
 0x692   : > { %2274 = vmatpush.msra.mxu0 %v2232_v3 }
 0x694   : > { %2275 = vmatpush.msra.mxu0 %v2227_v37 }
 0x695   : > { %v2212_v40 = vpop.permute.xlu1 %2211  ;;  %v2217_v43 = vpop.permute.xlu0 %2216 }
 0x696   : > { %v2219_v0 = vmul.f32 %v2218_v29, %v2217_v43  ;;  %2276 = vmatpush.msra.mxu0 %v2222_v34  ;;  %v2214_v50 = vmul.f32 %v2213_v45, %v2212_v40  ;;  %v2406_v34 = vld [vmem:[%s4247_s6 + $0x8] sm:$0xff]  ;;  %v2405_v40 = vld [vmem:[%s4247_s6] sm:$0xff]  ;;  %v2440_v43 = vld [vmem:[#allocation12 + $0x8] sm:$0xff] }
 0x697   : > { %2432 = vmatpush.msrb.mxu3 %v2406_v34  ;;  %v2847_v45 = vld [vmem:[#allocation15] ss:$0 sm:$0xff]  ;;  %2462 = vmatpush.msrb.mxu2 %v2440_v43 }
 0x698   : > { %2277 = vmatpush.msra.mxu0 %v2219_v0  ;;  %v2383_v0 = vld [vmem:[#allocation15] sm:$0x1] }
 0x699   : > { %2433 = vmatpush.msrb.mxu3 %v2405_v40 }
 0x69a   : > { %2278 = vmatpush.msra.mxu0 %v2214_v50 }
 0x69c   : > { %2279 = vmatpush.msra.mxu0 %v2209_v27  ;;  %v2439_v27 = vld [vmem:[#allocation12] sm:$0xff] }
 0x69d   : > { %v2202_v49 = vpop.permute.xlu0 %2201  ;;  %v2260_v58 = vpop.permute.xlu1 %2259  ;;  %2463 = vmatpush.msrb.mxu2 %v2439_v27 }
 0x69e   : > { %v2204_v1 = vmul.f32 %v2203_v20, %v2202_v49  ;;  %v2470_v20 = vld [vmem:[#allocation14 + $0x8] sm:$0xff] }
 0x69f   : > { %2491 = vmatpush.msra.mxu3 %v2470_v20 }
 0x6a0   : > { %2280 = vmatpush.msra.mxu0 %v2204_v1 }
 0x6a1   : > { %2657 = vmatmul.msk.f32.vlgmr.msra.gmra.mxu0 %vm1076_vm8, %v2245_v48  ;;  %vm2444_vm8 = vcmask 130048  }
 0x71e   : > { %v2282_v42 = vpop.f32.mrf.mxu0 }
 0x71f   : > { %v2283_v56 = vadd.f32 %v2282_v42, %v2260_v58  ;;  %v2469_v42 = vld [vmem:[#allocation14] sm:$0xff] }
 0x720   : > { %2492 = vmatpush.msra.mxu3 %v2469_v42 }
 0x721   : > { %v2285_v55 = vmax.f32 %v2283_v56, 0.0 }
 0x723   : > { %2286 = vrot.lane.b32.xlu2 %v2285_v55, %s3124_s26  ;;  %s3142_s26 = smov 80  }
 0x77d   : > { %v2287_v60 = vpop.permute.xlu2 %2286 }
 0x77e   : > { %v2288_v47 = vmax.f32 %v2285_v55, %v2287_v60 }
 0x780   : > { %2289 = vrot.lane.b32.xlu0 %v2288_v47, %s3136_s21 }
 0x7f2   : > { %v2290_v44 = vpop.permute.xlu0 %2289 }
 0x7f3   : > { %v2291_v24 = vmax.f32 %v2288_v47, %v2290_v44 }
 0x7f5   : > { %2324 = vmatmul.f32.vlgmr.msrb.gmra.mxu1 %v2291_v24 }
 0x872   : > { %v2325_v25 = vpop.f32.mrf.mxu1 }
 0x873   : > { %2341 = vrot.lane.b32.xlu0 %v2325_v25, %s3141_s20  ;;  %2336 = vrot.lane.b32.xlu2 %v2325_v25, %s3126_s27  ;;  %2329 = vst.msk [vmem:[#allocation5] sm:$0x1] %vm2328_vm15, %v2325_v25 }
 0x874   : > { %2331 = vrot.lane.b32.xlu1 %v2325_v25, %s3133_s24 }
 0x87b   : > { %2356 = vrot.lane.b32.xlu0 %v2325_v25, %s3121_s30  ;;  %2351 = vrot.lane.b32.xlu2 %v2325_v25, %s3142_s26 }
 0x87c   : > { %2346 = vrot.lane.b32.xlu1 %v2325_v25, %s3143_s19 }
 0x883   : > { %2411 = vrot.lane.b32.xlu2 %v2847_v45, %s3121_s30  ;;  %2441 = vrot.lane.b32.xlu0 %v2847_v45, %s3142_s26  ;;  %s448_s30 = sand.u32 1, %s3098_s14  }
 0x884   : > { %2361 = vrot.lane.b32.xlu1 %v2325_v25, %s3130_s28  ;;  %s449_s18 = scalar_lea.vmem [#allocation17], %s448_s30  ;;  %s2500_s20 = scalar_lea.sflag [#allocation8], %s448_s30 }
 0x885   : > { %s2510_s15 = sshll.u32 %s449_s18, 4  ;;  %s2511_s15 = int_to_ptr.vmem [resolvable:$true] %s2510_s15 }
 0x88c   : > { %2471 = vrot.lane.b32.xlu1 %v2847_v45, %s3143_s19 }
 0x8cd   : > { %v2337_v30 = vpop.permute.xlu2 %2336 }
 0x8d5   : > { %v2352_v3 = vpop.permute.xlu2 %2351 }
 0x8dd   : > { %v2412_v49 = vpop.permute.xlu2 %2411 }
 0x8e5   : > { %v2342_v7 = vpop.permute.xlu0 %2341 }
 0x8e6   : > { %v2332_v31 = vpop.permute.xlu1 %2331 }
 0x8e7   : > { %2335 = vst.msk [vmem:[#allocation5 - $0x1] sm:$0x2] %vm2334_vm0, %v2332_v31 }
 0x8e8   : > { %2340 = vst.msk [vmem:[#allocation5 - $0x2] sm:$0x4] %vm2339_vm1, %v2337_v30 }
 0x8e9   : > { %2345 = vst.msk [vmem:[#allocation5 - $0x3] sm:$0x8] %vm2344_vm2, %v2342_v7 }
 0x8ed   : > { %v2357_v9 = vpop.permute.xlu0 %2356 }
 0x8ee   : > { %v2347_v36 = vpop.permute.xlu1 %2346 }
 0x8ef   : > { %2350 = vst.msk [vmem:[#allocation5 - $0x4] sm:$0x10] %vm2349_vm3, %v2347_v36 }
 0x8f0   : > { %2355 = vst.msk [vmem:[#allocation5 - $0x5] sm:$0x20] %vm2354_vm4, %v2352_v3 }
 0x8f1   : > { %2360 = vst.msk [vmem:[#allocation5 - $0x6] sm:$0x40] %vm2359_vm5, %v2357_v9 }
 0x8f5   : > { %v2442_v56 = vpop.permute.xlu0 %2441 }
 0x8f6   : > { %v2362_v37 = vpop.permute.xlu1 %2361 }
 0x8f7   : > { %2365 = vst.msk [vmem:[#allocation5 - $0x7] sm:$0x80] %vm2364_vm6, %v2362_v37 }
 0x8fe   : > { %v2366_v29 = vld [vmem:[#allocation5] sm:$0x1]  ;;  %v2472_v13 = vpop.permute.xlu1 %2471 }
 0x8ff   : > { %2400 = vmatmul.f32.vlgmr.msra.gmra.mxu2 %v2366_v29 }
 0x982   : > { %v2401_v33 = vpop.f32.mrf.mxu2 }
 0x983   : > { %v2402_v28 = vadd.f32 %v2401_v33, %v2383_v0 }
 0x985   : > { %v2404_v50 = vmax.f32 %v2402_v28, 0.0 }
 0x987   : > { %2658 = vmatmul.msk.f32.vlgmr.msrb.gmra.mxu3 %vm2414_vm7, %v2404_v50 }
 0xa0a   : > { %v2435_v1 = vpop.f32.mrf.mxu3 }
 0xa0b   : > { %v2436_v48 = vadd.f32 %v2435_v1, %v2412_v49 }
 0xa0d   : > { %v2438_v58 = vmax.f32 %v2436_v48, 0.0 }
 0xa0f   : > { %2659 = vmatmul.msk.f32.vlgmr.msrb.gmra.mxu2 %vm2444_vm8, %v2438_v58 }
 0xa92   : > { %v2465_v55 = vpop.f32.mrf.mxu2 }
 0xa93   : > { %v2466_v38 = vadd.f32 %v2465_v55, %v2442_v56 }
 0xa95   : > { %v2468_v62 = vmax.f32 %v2466_v38, 0.0 }
 0xa97   : > { %2660 = vmatmul.msk.f32.vlgmr.msra.gmra.mxu3 %vm2444_vm8, %v2468_v62 }
 0xb1a   : > { %v2494_v19 = vpop.f32.mrf.mxu3 }
 0xb1b   : > { %v2495_v63 = vadd.f32 %v2494_v19, %v2472_v13 }
 0xb1d   : > { %2498 = vst.msk [vmem:[%s449_s18] sm:$0x1] %vm2497_vm9, %v2495_v63 }
 0xb1e   : > { %3055 = shalt.err (!%p3052_p8)
}
 0xb1f   : > { %2688 = dma.vmem_to_hbm [thread:$0]  (%p3237_p5), %s2511_s15, 16, %s2513_s3, %s2500_s20  }
 0xb20 PF: > { %s4270_s21 = sld [smem:[#allocation23_spill]]  ;;  %p2725_p9 = scmp.ge.s32.totalorder %s3106_s16, 2 }
 0xb22   : > { %p2710_p10 = pnand %p2725_p9, %p3241_p6 }
 0xb24   : > { %p2711_p11 = pneg %p2710_p10 }
 0xb26   : > { %s2524_s28 = sand.u32 1, %s4270_s21  }
 0xb27   : > { %s2525_s13 = scalar_lea.sflag [#allocation8], %s2524_s28 }
 0xb28   : > { %3089 = dma.done.wait (%p2711_p11), %s2525_s13, 16  }
 0xb29   : > { %3091 = vsyncadd (%p2711_p11), %s2525_s13, 4294967280  ;;  %s4272_s16 = sld [smem:[#allocation25_spill]]  ;;  %s4275_s13 = smov %s3098_s14 }
 0xb2a   : > { %s4273_s30 = sld [smem:[#allocation24_spill]] }
 0xb2b   : > { %s4274_s15 = sld [smem:[#allocation26_spill]] }
 0xb2f   : > { %p24_p12 = scmp.ge.s32.totalorder %s4272_s16, 4  }
 0xb30   : > { %s4276_s14 = smov %s4273_s30 }
 0xb31   :  { %26 = sbr.rel (!%p24_p12) target bundleno = 10 (0xa), region = 141 }
 0xb36   :  { %2530 = vsyncpa [#allocation7], 1 }
 0xb37   :  { %2532 = vsyncpa [#allocation7 + $0x1], 1 }
 0xb38   :  { %2533 = vsyncpa [#allocation10], 1 }
 0xb39   :  { %2534 = vsyncpa [#allocation13], 1 }
 0xb3a   :  { %2535 = vsyncpa [#allocation16], 1 }
 0xb3b   :  { %2536 = vsyncpa [#allocation8], 1 }
 0xb3c   :  { %2538 = vsyncpa [#allocation8 + $0x1], 1 }

</bundles_post_ra>
